<compile_context>
chip_gen: v7x
topology: tpu7x:2x2x1
jax: 0.10.0
libtpu: 0.0.40
codegen_flags: <defaults>
</compile_context>

<pallas_src>
import functools

import jax
import jax.numpy as jnp
from jax.experimental import pallas as pl
from jax.experimental.pallas import tpu as pltpu


# ----------------------------------------------------------------------------
# Kernel 1: per-batch KxK conv as a single MXU contraction + per-batch
#           per-channel sum / sum-of-squares (for BatchNorm batch statistics).
# ----------------------------------------------------------------------------
def _conv_stats_kernel(x_ref, w_ref, out_ref, psum_ref, pssq_ref, xp_scr, *, K, pad):
    # x_ref   : (1, H, W, Cin)            f32 input block (one batch element)
    # w_ref   : (K*K*Cin, Cout)           bf16 weights, row order = (kh, kw, cin)
    # out_ref : (1, H*W, Cout)            bf16 conv output (flattened spatial)
    # psum_ref, pssq_ref : (1, 1, Cout)   f32 per-batch channel statistics
    # xp_scr  : (H+2p, W+2p, Cin)         bf16 VMEM scratch (zero-padded halo)
    H = x_ref.shape[1]
    W = x_ref.shape[2]
    Cin = x_ref.shape[3]
    HW = H * W
    Cout = out_ref.shape[2]

    # Build the zero halo in VMEM (no padded input copy in HBM). Cast to bf16 here
    # so the MXU sees bf16 operands (f32 accumulation below).
    xp_scr[...] = jnp.zeros_like(xp_scr)
    xp_scr[pad:pad + H, pad:pad + W, :] = x_ref[0].astype(xp_scr.dtype)

    # im2col: K*K shifted views concatenated along the channel (lane) axis, giving a
    # single (H*W, K*K*Cin) patch and ONE MXU matmul instead of K*K tiny ones.
    taps = []
    for kh in range(K):
        for kw in range(K):
            taps.append(xp_scr[kh:kh + H, kw:kw + W, :])
    patch = jnp.concatenate(taps, axis=-1).reshape(HW, K * K * Cin)          # bf16

    acc = jnp.dot(patch, w_ref[...], preferred_element_type=jnp.float32)    # (HW, Cout) f32

    out_ref[...] = acc.reshape(1, HW, Cout).astype(out_ref.dtype)           # bf16 writeback
    # Per-batch partial statistics (reduced across the batch in the JAX glue).
    # TODO(synk): E[x^2]-E[x]^2 in f32 can cancel for very large activations; a shifted /
    # Welford accumulation would be more robust if that regime matters.
    psum_ref[...] = acc.sum(axis=0, keepdims=True).reshape(1, 1, Cout)
    pssq_ref[...] = (acc * acc).sum(axis=0, keepdims=True).reshape(1, 1, Cout)


# ----------------------------------------------------------------------------
# Kernel 2: fused BatchNorm affine + ReLU on a lane-dense flat 2D view.
#           Loads bf16, computes in f32 (v5e has no bf16 VALU), stores f32.
# ----------------------------------------------------------------------------
def _bn_relu_kernel(y_ref, scale_ref, shift_ref, o_ref):
    y = y_ref[...].astype(jnp.float32)                 # (TR, 128)
    scale = scale_ref[...]                             # (1, 128), channel-tiled
    shift = shift_ref[...]                             # (1, 128)
    o_ref[...] = jnp.maximum(y * scale + shift, 0.0).astype(o_ref.dtype)


def convolution_layer_forward(x_nchw, w_oihw, gamma, beta, *, eps=1e-5):
    """Conv(KxK, pad=K//2, no bias) -> BatchNorm2d (batch stats) -> ReLU.

    x_nchw : (N, Cin, H, W) float32
    w_oihw : (Cout, Cin, K, K) float32 (PyTorch Conv2d weight layout)
    gamma, beta : (Cout,) BatchNorm affine parameters
    returns (N, Cout, H, W) float32
    """
    N, Cin, H, W = x_nchw.shape
    Cout, _, K, _ = w_oihw.shape
    pad = K // 2
    if K % 2 == 0:
        raise ValueError("same-size output assumes odd kernel_size (module default K=3)")

    HW = H * W
    LANES = 128
    FLAT = N * HW * Cout
    # Lane-dense flat layout for the BN+ReLU pass requires these (hold for the module's
    # small channel counts). TODO(synk): add a channel-last fallback path otherwise.
    assert FLAT % LANES == 0 and LANES % Cout == 0

    # --- glue: layout conversion + weight repack (tiny, one-off) --------------
    x_nhwc = jnp.transpose(x_nchw, (0, 2, 3, 1))                          # (N,H,W,Cin) f32
    w_packed = (jnp.transpose(w_oihw, (2, 3, 1, 0))                       # (K,K,Cin,Cout)
                .reshape(K * K * Cin, Cout).astype(jnp.bfloat16))         # rows = (kh,kw,cin)

    # --- Pallas call 1: conv + per-batch batch statistics ----------------------
    conv_out, psum, pssq = pl.pallas_call(
        functools.partial(_conv_stats_kernel, K=K, pad=pad),
        out_shape=(
            jax.ShapeDtypeStruct((N, HW, Cout), jnp.bfloat16),
            jax.ShapeDtypeStruct((N, 1, Cout), jnp.float32),
            jax.ShapeDtypeStruct((N, 1, Cout), jnp.float32),
        ),
        grid_spec=pltpu.PrefetchScalarGridSpec(
            num_scalar_prefetch=0,
            grid=(N,),
            in_specs=[
                pl.BlockSpec((1, H, W, Cin), lambda n: (n, 0, 0, 0)),
                # constant block index -> Pallas does not re-fetch the weights per step
                pl.BlockSpec((K * K * Cin, Cout), lambda n: (0, 0)),
            ],
            out_specs=[
                pl.BlockSpec((1, HW, Cout), lambda n: (n, 0, 0)),
                pl.BlockSpec((1, 1, Cout), lambda n: (n, 0, 0)),
                pl.BlockSpec((1, 1, Cout), lambda n: (n, 0, 0)),
            ],
            scratch_shapes=[
                pltpu.VMEM((H + 2 * pad, W + 2 * pad, Cin), jnp.bfloat16),
            ],
        ),
        compiler_params=pltpu.CompilerParams(
            dimension_semantics=("parallel",),   # per-batch outputs -> safe for megacore
        ),
    )(x_nhwc, w_packed)

    # --- tiny per-channel scalar math (JAX glue) -------------------------------
    count = jnp.float32(N * HW)
    mean = psum.sum(axis=(0, 1)) / count                      # (Cout,)
    var = pssq.sum(axis=(0, 1)) / count - mean * mean         # biased var (BN training)
    inv_std = jax.lax.rsqrt(var + eps)
    scale = gamma * inv_std                                   # (Cout,)
    shift = beta - mean * scale                               # (Cout,)
    rep = LANES // Cout
    # Channel index is the fastest-varying dim of the flat layout, with period Cout that
    # divides 128, so tiling the per-channel params across 128 lanes applies them exactly.
    scale_t = jnp.tile(scale, rep).reshape(1, LANES).astype(jnp.float32)
    shift_t = jnp.tile(shift, rep).reshape(1, LANES).astype(jnp.float32)

    # --- Pallas call 2: fused BN affine + ReLU on a lane-dense flat view --------
    T = FLAT // LANES
    conv_flat = conv_out.reshape(T, LANES)     # contiguous (n, hw, c) order -> free reshape
    TR = T if T <= 512 else 512                # big lane-dense tiles; tiny demo => 1 block

    y_flat = pl.pallas_call(
        _bn_relu_kernel,
        out_shape=jax.ShapeDtypeStruct((T, LANES), jnp.float32),
        grid_spec=pltpu.PrefetchScalarGridSpec(
            num_scalar_prefetch=0,
            grid=(pl.cdiv(T, TR),),
            in_specs=[
                pl.BlockSpec((TR, LANES), lambda i: (i, 0)),
                pl.BlockSpec((1, LANES), lambda i: (0, 0)),
                pl.BlockSpec((1, LANES), lambda i: (0, 0)),
            ],
            out_specs=pl.BlockSpec((TR, LANES), lambda i: (i, 0)),
        ),
        compiler_params=pltpu.CompilerParams(
            dimension_semantics=("parallel",),
        ),
    )(conv_flat, scale_t, shift_t)

    y_nhwc = y_flat.reshape(N, H, W, Cout)
    return jnp.transpose(y_nhwc, (0, 3, 1, 2))                # back to NCHW


# ----------------------------------------------------------------------------
# Pure-JAX reference (module semantics, full f32) for the correctness check.
# ----------------------------------------------------------------------------
def _reference(x_nchw, w_oihw, gamma, beta, eps=1e-5):
    conv = jax.lax.conv_general_dilated(
        x_nchw, w_oihw, window_strides=(1, 1), padding="SAME",
        dimension_numbers=("NCHW", "OIHW", "NCHW"))
    mean = conv.mean(axis=(0, 2, 3), keepdims=True)
    var = conv.var(axis=(0, 2, 3), keepdims=True)
    g = gamma.reshape(1, -1, 1, 1)
    b = beta.reshape(1, -1, 1, 1)
    return jnp.maximum((conv - mean) * jax.lax.rsqrt(var + eps) * g + b, 0.0)


if __name__ == "__main__":
    # Small deterministic shapes consistent with the module's forward.
    N, Cin, Cout, K = 2, 4, 4, 3
    H = W = 16

    key = jax.random.PRNGKey(0)
    kx, kw = jax.random.split(key)
    x = jax.random.normal(kx, (N, Cin, H, W), dtype=jnp.float32)
    w = 0.1 * jax.random.normal(kw, (Cout, Cin, K, K), dtype=jnp.float32)   # OIHW, bias=False
    gamma = jnp.ones((Cout,), jnp.float32)     # BatchNorm2d default affine init
    beta = jnp.zeros((Cout,), jnp.float32)

    out = jax.block_until_ready(convolution_layer_forward(x, w, gamma, beta))
    ref = _reference(x, w, gamma, beta)

    assert out.shape == (N, Cout, H, W)
    # Conv operands are bf16 on the MXU (f32 accumulation), so compare against the f32
    # reference with a bf16-appropriate tolerance.
    assert jnp.allclose(out, ref, atol=3e-2, rtol=3e-2), "mismatch vs JAX reference"

    print("KERNEL_OK")
</pallas_src>

<mosaic_0001>
module attributes {stable_mosaic.version = 11 : i64} {
  func.func @_conv_stats_kernel(%arg0: i32, %arg1: memref<1x16x16x4xf32, #tpu.memory_space<vmem>>, %arg2: memref<36x4xbf16, #tpu.memory_space<vmem>>, %arg3: memref<1x256x4xbf16, #tpu.memory_space<vmem>>, %arg4: memref<1x1x4xf32, #tpu.memory_space<vmem>>, %arg5: memref<1x1x4xf32, #tpu.memory_space<vmem>>, %arg6: memref<18x18x4xbf16, #tpu.memory_space<vmem>>) attributes {dimension_semantics = [#tpu.dimension_semantics<parallel>], iteration_bounds = array<i64: 2>, scalar_prefetch = 0 : i64, scratch_operands = 1 : i64, tpu.core_type = #tpu.core_type<tc>, window_params = [{transform_indices = @transform_0, window_bounds = array<i64: 1, 16, 16, 4>}, {pipeline_mode = #tpu.pipeline_mode<synchronous>, transform_indices = @transform_1, window_bounds = array<i64: 36, 4>}, {transform_indices = @transform_2, window_bounds = array<i64: 1, 256, 4>}, {transform_indices = @transform_3, window_bounds = array<i64: 1, 1, 4>}, {transform_indices = @transform_4, window_bounds = array<i64: 1, 1, 4>}]} {
    %cst = arith.constant 0.000000e+00 : bf16
    %0 = vector.broadcast %cst : bf16 to vector<18x18x4xbf16>
    %c0 = arith.constant 0 : index
    %c0_0 = arith.constant 0 : index
    %c0_1 = arith.constant 0 : index
    %1 = vector.load %arg6[%c0, %c0_0, %c0_1] : memref<18x18x4xbf16, #tpu.memory_space<vmem>>, vector<18x18x4xbf16>
    tpu.vector_store %arg6[%c0, %c0_0, %c0_1], %0 {strides = array<i32>} : memref<18x18x4xbf16, #tpu.memory_space<vmem>>, vector<18x18x4xbf16>,
    %c0_2 = arith.constant 0 : index
    %c0_3 = arith.constant 0 : index
    %c0_4 = arith.constant 0 : index
    %c0_5 = arith.constant 0 : index
    %2 = vector.load %arg1[%c0_2, %c0_3, %c0_4, %c0_5] : memref<1x16x16x4xf32, #tpu.memory_space<vmem>>, vector<1x16x16x4xf32>
    %3 = vector.shape_cast %2 : vector<1x16x16x4xf32> to vector<16x16x4xf32>
    %4 = arith.truncf %3 : vector<16x16x4xf32> to vector<16x16x4xbf16>
    %c1 = arith.constant 1 : index
    %c1_6 = arith.constant 1 : index
    %c0_7 = arith.constant 0 : index
    %5 = vector.load %arg6[%c1, %c1_6, %c0_7] : memref<18x18x4xbf16, #tpu.memory_space<vmem>>, vector<16x16x4xbf16>
    tpu.vector_store %arg6[%c1, %c1_6, %c0_7], %4 {strides = array<i32>} : memref<18x18x4xbf16, #tpu.memory_space<vmem>>, vector<16x16x4xbf16>,
    %c0_8 = arith.constant 0 : index
    %c0_9 = arith.constant 0 : index
    %c0_10 = arith.constant 0 : index
    %6 = vector.load %arg6[%c0_8, %c0_9, %c0_10] : memref<18x18x4xbf16, #tpu.memory_space<vmem>>, vector<16x16x4xbf16>
    %c0_11 = arith.constant 0 : index
    %c1_12 = arith.constant 1 : index
    %c0_13 = arith.constant 0 : index
    %7 = vector.load %arg6[%c0_11, %c1_12, %c0_13] : memref<18x18x4xbf16, #tpu.memory_space<vmem>>, vector<16x16x4xbf16>
    %c0_14 = arith.constant 0 : index
    %c2 = arith.constant 2 : index
    %c0_15 = arith.constant 0 : index
    %8 = vector.load %arg6[%c0_14, %c2, %c0_15] : memref<18x18x4xbf16, #tpu.memory_space<vmem>>, vector<16x16x4xbf16>
    %c1_16 = arith.constant 1 : index
    %c0_17 = arith.constant 0 : index
    %c0_18 = arith.constant 0 : index
    %9 = vector.load %arg6[%c1_16, %c0_17, %c0_18] : memref<18x18x4xbf16, #tpu.memory_space<vmem>>, vector<16x16x4xbf16>
    %c1_19 = arith.constant 1 : index
    %c1_20 = arith.constant 1 : index
    %c0_21 = arith.constant 0 : index
    %10 = vector.load %arg6[%c1_19, %c1_20, %c0_21] : memref<18x18x4xbf16, #tpu.memory_space<vmem>>, vector<16x16x4xbf16>
    %c1_22 = arith.constant 1 : index
    %c2_23 = arith.constant 2 : index
    %c0_24 = arith.constant 0 : index
    %11 = vector.load %arg6[%c1_22, %c2_23, %c0_24] : memref<18x18x4xbf16, #tpu.memory_space<vmem>>, vector<16x16x4xbf16>
    %c2_25 = arith.constant 2 : index
    %c0_26 = arith.constant 0 : index
    %c0_27 = arith.constant 0 : index
    %12 = vector.load %arg6[%c2_25, %c0_26, %c0_27] : memref<18x18x4xbf16, #tpu.memory_space<vmem>>, vector<16x16x4xbf16>
    %c2_28 = arith.constant 2 : index
    %c1_29 = arith.constant 1 : index
    %c0_30 = arith.constant 0 : index
    %13 = vector.load %arg6[%c2_28, %c1_29, %c0_30] : memref<18x18x4xbf16, #tpu.memory_space<vmem>>, vector<16x16x4xbf16>
    %c2_31 = arith.constant 2 : index
    %c2_32 = arith.constant 2 : index
    %c0_33 = arith.constant 0 : index
    %14 = vector.load %arg6[%c2_31, %c2_32, %c0_33] : memref<18x18x4xbf16, #tpu.memory_space<vmem>>, vector<16x16x4xbf16>
    %15 = tpu.concatenate %6, %7, %8, %9, %10, %11, %12, %13, %14 in 2 : vector<16x16x4xbf16>, vector<16x16x4xbf16>, vector<16x16x4xbf16>, vector<16x16x4xbf16>, vector<16x16x4xbf16>, vector<16x16x4xbf16>, vector<16x16x4xbf16>, vector<16x16x4xbf16>, vector<16x16x4xbf16> -> vector<16x16x36xbf16>
    %16 = vector.shape_cast %15 : vector<16x16x36xbf16> to vector<256x36xbf16>
    %c0_34 = arith.constant 0 : index
    %c0_35 = arith.constant 0 : index
    %17 = vector.load %arg2[%c0_34, %c0_35] : memref<36x4xbf16, #tpu.memory_space<vmem>>, vector<36x4xbf16>
    %cst_36 = arith.constant dense<0.000000e+00> : vector<256x4xf32>
    %18 = tpu.matmul %16, %17, %cst_36 {dimension_numbers = #tpu.dot_dimension_numbers<[1], [0], [0], [1], [0, 0, 1, 1], [], []>} : vector<256x36xbf16>, vector<36x4xbf16>, vector<256x4xf32> -> vector<256x4xf32>
    %19 = vector.shape_cast %18 : vector<256x4xf32> to vector<1x256x4xf32>
    %20 = arith.truncf %19 : vector<1x256x4xf32> to vector<1x256x4xbf16>
    %c0_37 = arith.constant 0 : index
    %c0_38 = arith.constant 0 : index
    %c0_39 = arith.constant 0 : index
    %21 = vector.load %arg3[%c0_37, %c0_38, %c0_39] : memref<1x256x4xbf16, #tpu.memory_space<vmem>>, vector<1x256x4xbf16>
    tpu.vector_store %arg3[%c0_37, %c0_38, %c0_39], %20 {strides = array<i32>} : memref<1x256x4xbf16, #tpu.memory_space<vmem>>, vector<1x256x4xbf16>,
    %cst_40 = arith.constant dense<0.000000e+00> : vector<4xf32>
    %22 = vector.multi_reduction <add>, %18, %cst_40 [0] : vector<256x4xf32> to vector<4xf32>
    %23 = vector.shape_cast %22 : vector<4xf32> to vector<1x4xf32>
    %24 = vector.shape_cast %23 : vector<1x4xf32> to vector<1x1x4xf32>
    %c0_41 = arith.constant 0 : index
    %c0_42 = arith.constant 0 : index
    %c0_43 = arith.constant 0 : index
    %25 = vector.load %arg4[%c0_41, %c0_42, %c0_43] : memref<1x1x4xf32, #tpu.memory_space<vmem>>, vector<1x1x4xf32>
    tpu.vector_store %arg4[%c0_41, %c0_42, %c0_43], %24 {strides = array<i32>} : memref<1x1x4xf32, #tpu.memory_space<vmem>>, vector<1x1x4xf32>,
    %26 = arith.mulf %18, %18 : vector<256x4xf32>
    %cst_44 = arith.constant dense<0.000000e+00> : vector<4xf32>
    %27 = vector.multi_reduction <add>, %26, %cst_44 [0] : vector<256x4xf32> to vector<4xf32>
    %28 = vector.shape_cast %27 : vector<4xf32> to vector<1x4xf32>
    %29 = vector.shape_cast %28 : vector<1x4xf32> to vector<1x1x4xf32>
    %c0_45 = arith.constant 0 : index
    %c0_46 = arith.constant 0 : index
    %c0_47 = arith.constant 0 : index
    %30 = vector.load %arg5[%c0_45, %c0_46, %c0_47] : memref<1x1x4xf32, #tpu.memory_space<vmem>>, vector<1x1x4xf32>
    tpu.vector_store %arg5[%c0_45, %c0_46, %c0_47], %29 {strides = array<i32>} : memref<1x1x4xf32, #tpu.memory_space<vmem>>, vector<1x1x4xf32>,
    return
  }
  func.func @transform_0(%arg0: i32) -> (i32, i32, i32, i32) {
    %c0_i32 = arith.constant 0 : i32
    %c0_i32_0 = arith.constant 0 : i32
    %c0_i32_1 = arith.constant 0 : i32
    %c0_i32_2 = arith.constant 0 : i32
    return %arg0, %c0_i32, %c0_i32_0, %c0_i32_1 : i32, i32, i32, i32
  }
  func.func @transform_1(%arg0: i32) -> (i32, i32) {
    %c0_i32 = arith.constant 0 : i32
    %c0_i32_0 = arith.constant 0 : i32
    %c0_i32_1 = arith.constant 0 : i32
    return %c0_i32, %c0_i32_0 : i32, i32
  }
  func.func @transform_2(%arg0: i32) -> (i32, i32, i32) {
    %c0_i32 = arith.constant 0 : i32
    %c0_i32_0 = arith.constant 0 : i32
    %c0_i32_1 = arith.constant 0 : i32
    return %arg0, %c0_i32, %c0_i32_0 : i32, i32, i32
  }
  func.func @transform_3(%arg0: i32) -> (i32, i32, i32) {
    %c0_i32 = arith.constant 0 : i32
    %c0_i32_0 = arith.constant 0 : i32
    %c0_i32_1 = arith.constant 0 : i32
    return %arg0, %c0_i32, %c0_i32_0 : i32, i32, i32
  }
  func.func @transform_4(%arg0: i32) -> (i32, i32, i32) {
    %c0_i32 = arith.constant 0 : i32
    %c0_i32_0 = arith.constant 0 : i32
    %c0_i32_1 = arith.constant 0 : i32
    return %arg0, %c0_i32, %c0_i32_0 : i32, i32, i32
  }
}

</mosaic_0001>

<bundles_post_ra>
// kernel: tpu_custom_call.1
= control target key start
LH: loop header
LB: loop body
LE: loop exit
PB: predicated region body
PF: predicated region fallthrough
CT: control target
= control target key end

     0   :  { %10 = vsyncpa [#allocation4], 0  ;;  %s5821_s0 = inlined_call_operand.vmem [shape: f32[2,16,16,4], index: 0, kind: input, shape index: {}]   ;;  %s5822_s1 = inlined_call_operand.vmem [shape: bf16[36,4], index: 1, kind: input, shape index: {}]   ;;  %s5823_s2 = inlined_call_operand.vmem [shape: bf16[2,256,4], index: 2, kind: output, shape index: {0}]   ;;  %s5824_s3 = inlined_call_operand.hbm [shape: f32[2,1,4], index: 3, kind: output, shape index: {1}]   ;;  %s5825_s4 = inlined_call_operand.hbm [shape: f32[2,1,4], index: 4, kind: output, shape index: {2}]  }
   0x1   :  { %12 = vsyncpa [#allocation4 + $0x1], 0 }
   0x2   :  { %13 = vsyncpa [#allocation6], 0 }
   0x3   :  { %15 = vsyncpa [#allocation6 + $0x1], 0  ;;  %s4203_s15 = smov 0   ;;  %s4205_s16 = smov 0  }
   0x4   :  { %s4207_s17 = smov 0   ;;  %s4209_s18 = smov 0  }
   0x5 LB: > { %s4224_s19 = sadd.s32 4294967295, %s4165_s18   ;;  %s3502_s20 = sadd.s32 4294967294, %s4165_s18   ;;  %s4165_s18 = sphi %s4209_s18, %s5837_s18   ;;  %s4161_s17 = sphi %s4207_s17, %s5836_s17   ;;  %s4157_s16 = sphi %s4205_s16, %s5835_s16   ;;  %s4153_s15 = sphi %s4203_s15, %s5834_s15  }
   0x6   : > { %s4228_s21 = sadd.s32 1, %s4165_s18   ;;  %s101_s22 = sadd.s32 1, %s4161_s17 }
   0x7   : > { %s98_s23 = ssub.s32 %s4165_s18, %s4228_s21  ;;  %p111_p0 = scmp.ne.s32.totalorder %s4161_s17, %s4157_s16 }
   0x8   : > { %p99_p1 = scmp.eq.s32.totalorder %s98_s23, 0  ;;  %p112_p2 = scmp.eq.s32.totalorder %s4224_s19, 1 }
   0x9   : > { %p117_p3 = scmp.ne.s32.totalorder %s4157_s16, %s4153_s15  ;;  %p118_p4 = scmp.eq.s32.totalorder %s3502_s20, 1 }
   0xa   : > { %s4239_s24 = scalar_select %p99_p1, %s4161_s17, %s101_s22  }
   0xb   : > { %p4241_p5 = por %p112_p2, %p111_p0  ;;  %p4245_p6 = por %p118_p4, %p117_p3 }
   0xc   : > { %p3505_p7 = scmp.ge.s32.totalorder %s4165_s18, 1  ;;  %p173_p8 = scmp.lt.s32.totalorder %s4165_s18, 3 }
   0xe   : > { %p174_p9 = pnand %p3505_p7, %p173_p8 }
   0xf   : > { %vm218_vm0 = vcmask (!%p174_p9), 27648   ;;  %vm221_vm1 = vcmask (!%p174_p9), 24576   ;;  %v4167_v0 = vmov (!%p174_p9), 0   ;;  %p207_p10 = scmp.lt.s32.totalorder (!%p174_p9), %s4224_s19, 1  ;;  %vm402_vm2 = vsmask.f32 (!%p174_p9), 256 }
  0x10   : > { %177 = sbr.rel (%p174_p9) target bundleno = 694 (0x2b6), region = 28  ;;  %219 = vst.msk [vmem:[#allocation2] sm:$0xf] (!%p174_p9), %vm218_vm0, %v4167_v0  ;;  %220 = vst.msk [vmem:[#allocation2 + $0x4] sm:$0xf] (!%p174_p9), %vm218_vm0, %v4167_v0  ;;  %vm1437_vm6 = vcmask (!%p174_p9), 1046528  }
  0x11   : > { %222 = vst.msk [vmem:[#allocation2 + $0x8] sm:$0x1] (!%p174_p9), %vm221_vm1, %v4167_v0  ;;  %225 = vst.msk [vmem:[#allocation2 + $0x14] sm:$0x1] (!%p174_p9), %vm221_vm1, %v4167_v0  ;;  %vm403_vm3 = vsmask.f32 (!%p174_p9), 4368 }
  0x12   : > { %223 = vst.msk [vmem:[#allocation2 + $0xc] sm:$0xf] (!%p174_p9), %vm218_vm0, %v4167_v0  ;;  %224 = vst.msk [vmem:[#allocation2 + $0x10] sm:$0xf] (!%p174_p9), %vm218_vm0, %v4167_v0  ;;  %vm1164_vm4 = vsmask.f32 (!%p174_p9), 7424 }
  0x13   : > { %226 = vst.msk [vmem:[#allocation2 + $0x18] sm:$0xf] (!%p174_p9), %vm218_vm0, %v4167_v0  ;;  %227 = vst.msk [vmem:[#allocation2 + $0x1c] sm:$0xf] (!%p174_p9), %vm218_vm0, %v4167_v0  ;;  %vm727_vm5 = vsmask.f32 (!%p174_p9), 7938 }
  0x14   : > { %228 = vst.msk [vmem:[#allocation2 + $0x20] sm:$0x1] (!%p174_p9), %vm221_vm1, %v4167_v0  ;;  %231 = vst.msk [vmem:[#allocation2 + $0x2c] sm:$0x1] (!%p174_p9), %vm221_vm1, %v4167_v0  ;;  %s4168_s6 = smov (!%p174_p9), 8   ;;  %s4169_s7 = smov (!%p174_p9), 4  }
  0x15   : > { %229 = vst.msk [vmem:[#allocation2 + $0x24] sm:$0xf] (!%p174_p9), %vm218_vm0, %v4167_v0  ;;  %230 = vst.msk [vmem:[#allocation2 + $0x28] sm:$0xf] (!%p174_p9), %vm218_vm0, %v4167_v0  ;;  %s4170_s8 = smov (!%p174_p9), 12   ;;  %s4171_s9 = smov (!%p174_p9), 24  }
  0x16   : > { %232 = vst.msk [vmem:[#allocation2 + $0x30] sm:$0xf] (!%p174_p9), %vm218_vm0, %v4167_v0  ;;  %233 = vst.msk [vmem:[#allocation2 + $0x34] sm:$0xf] (!%p174_p9), %vm218_vm0, %v4167_v0  ;;  %s4172_s10 = smov (!%p174_p9), 20   ;;  %s4173_s13 = smov (!%p174_p9), 32  }
  0x17   : > { %234 = vst.msk [vmem:[#allocation2 + $0x38] sm:$0x1] %vm221_vm1, %v4167_v0  ;;  %237 = vst.msk [vmem:[#allocation2 + $0x44] sm:$0x1] %vm221_vm1, %v4167_v0  ;;  %s4307_s27 = scalar_select %p207_p10, %s4224_s19, 1  ;;  %vm2859_vm10 = vcmask 1041408  }
  0x18   : > { %235 = vst.msk [vmem:[#allocation2 + $0x3c] sm:$0xf] %vm218_vm0, %v4167_v0  ;;  %236 = vst.msk [vmem:[#allocation2 + $0x40] sm:$0xf] %vm218_vm0, %v4167_v0  ;;  %v844_v4 = vld [vmem:[#allocation2 + $0x4] sm:$0xf] }
  0x19   : > { %238 = vst.msk [vmem:[#allocation2 + $0x48] sm:$0xf] %vm218_vm0, %v4167_v0  ;;  %239 = vst.msk [vmem:[#allocation2 + $0x4c] sm:$0xf] %vm218_vm0, %v4167_v0  ;;  %s3741_s28 = sshll.u32 %s4307_s27, 8  ;;  %s4174_s22 = smov 16  }
  0x1a   : > { %240 = vst.msk [vmem:[#allocation2 + $0x50] sm:$0x1] %vm221_vm1, %v4167_v0  ;;  %243 = vst.msk [vmem:[#allocation2 + $0x5c] sm:$0x1] %vm221_vm1, %v4167_v0  ;;  %s4313_s5 = scalar_lea.vmem %s5821_s0, %s3741_s28  ;;  %v891_v5 = vld [vmem:[#allocation2] sm:$0xe] }
  0x1b   : > { %241 = vst.msk [vmem:[#allocation2 + $0x54] sm:$0xf] %vm218_vm0, %v4167_v0  ;;  %242 = vst.msk [vmem:[#allocation2 + $0x58] sm:$0xf] %vm218_vm0, %v4167_v0  ;;  %v276_v1 = vld [vmem:[%s4313_s5 + $0x10] sm:$0xff]  ;;  %v277_v2 = vld [vmem:[%s4313_s5 + $0x18] sm:$0xff]  ;;  %v3574_v9 = vcombine.low %v891_v5, %v844_v4 }
  0x1c   : > { %244 = vst.msk [vmem:[#allocation2 + $0x60] sm:$0xf] %vm218_vm0, %v4167_v0  ;;  %245 = vst.msk [vmem:[#allocation2 + $0x64] sm:$0xf] %vm218_vm0, %v4167_v0  ;;  %v274_v3 = vld [vmem:[%s4313_s5] sm:$0xff]  ;;  %v3745_v6 = vpack.c.bf16 %v276_v1, %v276_v1  ;;  %v3746_v7 = vpack.c.bf16 %v277_v2, %v277_v2  ;;  %v275_v16 = vld [vmem:[%s4313_s5 + $0x8] sm:$0xff] }
  0x1d   : > { %246 = vst.msk [vmem:[#allocation2 + $0x68] sm:$0x1] %vm221_vm1, %v4167_v0  ;;  %249 = vst.msk [vmem:[#allocation2 + $0x74] sm:$0x1] %vm221_vm1, %v4167_v0  ;;  %v843_v10 = vld [vmem:[#allocation2] sm:$0xf]  ;;  %v3743_v11 = vpack.c.bf16 %v274_v3, %v274_v3  ;;  %v3744_v30 = vpack.c.bf16 %v275_v16, %v275_v16 }
  0x1e   : > { %247 = vst.msk [vmem:[#allocation2 + $0x6c] sm:$0xf] %vm218_vm0, %v4167_v0  ;;  %248 = vst.msk [vmem:[#allocation2 + $0x70] sm:$0xf] %vm218_vm0, %v4167_v0  ;;  %v4318_v12 = vcombine.low %v843_v10, %v844_v4  ;;  %v423_v13 = vshrl.u32 %v3745_v6, 16  ;;  %v426_v14 = vshll.u32 %v3745_v6, 16 }
  0x1f   : > { %250 = vst.msk [vmem:[#allocation2 + $0x78] sm:$0xf] %vm218_vm0, %v4167_v0  ;;  %251 = vst.msk [vmem:[#allocation2 + $0x7c] sm:$0xf] %vm218_vm0, %v4167_v0  ;;  %v431_v15 = vshrl.u32 %v3746_v7, 16  ;;  %v1438_v17 = vrot.slane %v3574_v9, 1 }
  0x20   : > { %252 = vst.msk [vmem:[#allocation2 + $0x80] sm:$0x1] %vm221_vm1, %v4167_v0  ;;  %255 = vst.msk [vmem:[#allocation2 + $0x8c] sm:$0x1] %vm221_vm1, %v4167_v0  ;;  %v434_v20 = vshll.u32 %v3746_v7, 16  ;;  %v1166_v21 = vshrl.u32 %v4318_v12, 16 }
  0x21   : > { %253 = vst.msk [vmem:[#allocation2 + $0x84] sm:$0xf] %vm218_vm0, %v4167_v0  ;;  %254 = vst.msk [vmem:[#allocation2 + $0x88] sm:$0xf] %vm218_vm0, %v4167_v0  ;;  %v1168_v22 = vshll.u32 %v4318_v12, 16  ;;  %v425_v24 = vrot.slane %v423_v13, 7 }
  0x22   : > { %256 = vst.msk [vmem:[#allocation2 + $0x90] sm:$0xf] %vm218_vm0, %v4167_v0  ;;  %257 = vst.msk [vmem:[#allocation2 + $0x94] sm:$0xf] %vm218_vm0, %v4167_v0  ;;  %v433_v25 = vrot.slane %v431_v15, 7  ;;  %v406_v31 = vshrl.u32 %v3743_v11, 16 }
  0x23   : > { %258 = vst.msk [vmem:[#allocation2 + $0x98] sm:$0x1] %vm221_vm1, %v4167_v0  ;;  %261 = vst.msk [vmem:[#allocation2 + $0xa4] sm:$0x1] %vm221_vm1, %v4167_v0  ;;  %v738_v29 = vld [vmem:[#allocation2 + $0x18] sm:$0xf]  ;;  %v428_v34 = vor.u32 %v426_v14, %v425_v24 }
  0x24   : > { %259 = vst.msk [vmem:[#allocation2 + $0x9c] sm:$0xf] %vm218_vm0, %v4167_v0  ;;  %260 = vst.msk [vmem:[#allocation2 + $0xa0] sm:$0xf] %vm218_vm0, %v4167_v0  ;;  %v278_v32 = vld [vmem:[%s4313_s5 + $0x20] sm:$0xff]  ;;  %v1170_v33 = vrot.slane %v1168_v22, 1  ;;  %v436_v36 = vor.u32 %v434_v20, %v433_v25 }
  0x25   : > { %262 = vst.msk [vmem:[#allocation2 + $0xa8] sm:$0xf] %vm218_vm0, %v4167_v0  ;;  %263 = vst.msk [vmem:[#allocation2 + $0xac] sm:$0xf] %vm218_vm0, %v4167_v0  ;;  %v429_v35 = vrot.slane %v425_v24, 4  ;;  %v279_v37 = vld [vmem:[%s4313_s5 + $0x28] sm:$0xff]  ;;  %v3747_v46 = vpack.c.bf16 %v278_v32, %v278_v32 }
  0x26   : > { %264 = vst.msk [vmem:[#allocation2 + $0xb0] sm:$0x1] %vm221_vm1, %v4167_v0  ;;  %267 = vst.msk [vmem:[#allocation2 + $0xbc] sm:$0x1] %vm221_vm1, %v4167_v0  ;;  %v408_v38 = vrot.slane %v406_v31, 7  ;;  %v409_v39 = vshll.u32 %v3743_v11, 16  ;;  %v1171_v42 = vor.u32 %v1170_v33, %v1166_v21  ;;  %v3748_v50 = vpack.c.bf16 %v279_v37, %v279_v37 }
  0x27   : > { %265 = vst.msk [vmem:[#allocation2 + $0xb4] sm:$0xf] %vm218_vm0, %v4167_v0  ;;  %266 = vst.msk [vmem:[#allocation2 + $0xb8] sm:$0xf] %vm218_vm0, %v4167_v0  ;;  %v414_v40 = vshrl.u32 %v3744_v30, 16  ;;  %v417_v41 = vshll.u32 %v3744_v30, 16 }
  0x28   : > { %268 = vst.msk [vmem:[#allocation2 + $0xc0] sm:$0xf] %vm218_vm0, %v4167_v0  ;;  %269 = vst.msk [vmem:[#allocation2 + $0xc4] sm:$0xf] %vm218_vm0, %v4167_v0  ;;  %v729_v45 = vld [vmem:[#allocation2 + $0xc] sm:$0xf]  ;;  %v411_v47 = vor.u32 %v409_v39, %v408_v38 }
  0x29   : > { %270 = vst.msk [vmem:[#allocation2 + $0xc8] sm:$0x1] %vm221_vm1, %v4167_v0  ;;  %273 = vst.msk [vmem:[#allocation2 + $0xd4] sm:$0x1] %vm221_vm1, %v4167_v0  ;;  %v412_v48 = vrot.slane %v408_v38, 4  ;;  %v416_v49 = vrot.slane %v414_v40, 7 }
  0x2a   : > { %271 = vst.msk [vmem:[#allocation2 + $0xcc] sm:$0xf] %vm218_vm0, %v4167_v0  ;;  %272 = vst.msk [vmem:[#allocation2 + $0xd0] sm:$0xf] %vm218_vm0, %v4167_v0  ;;  %v742_v51 = vld [vmem:[#allocation2 + $0x20] sm:$0x1] }
  0x2b   : > { %v3925_v8 = vld [vmem:[#allocation2 + $0x8] ss:$0 sps:$4 sm:$0x11]   ;;  %vm4325_vm7 = vmor %vm402_vm2, %vm403_vm3  ;;  %v440_v53 = vshrl.u32 %v3747_v46, 16  ;;  %v443_v54 = vshll.u32 %v3747_v46, 16  ;;  %v438_v55 = vrot.slane %v433_v25, 4  ;;  %v419_v57 = vor.u32 %v417_v41, %v416_v49 }
  0x2c   : > { %v1439_v18 = vrot.slane %v3925_v8, 1  ;;  %v1173_v19 = vshll.u32 %v3925_v8, 16  ;;  %vm4332_vm8 = vmand %vm218_vm0, %vm727_vm5  ;;  %v437_v43 = vsel %vm4325_vm7, %v429_v35, %v436_v36  ;;  %v448_v59 = vshrl.u32 %v3748_v50, 16  ;;  %v735_v61 = vld [vmem:[#allocation2 + $0x14] sm:$0x1]  ;;  %v281_v5 = vld [vmem:[%s4313_s5 + $0x38] sm:$0xff] }
  0x2d   : > { %v739_v44 = vsel %vm4332_vm8, %v428_v34, %v738_v29  ;;  %741 = vst.msk [vmem:[#allocation2 + $0x1c] sm:$0xf] %vm218_vm0, %v437_v43  ;;  %vm4348_vm9 = vmand %vm221_vm1, %vm402_vm2  ;;  %v730_v58 = vsel %vm4332_vm8, %v411_v47, %v729_v45  ;;  %v451_v60 = vshll.u32 %v3748_v50, 16  ;;  %v280_v62 = vld [vmem:[%s4313_s5 + $0x30] sm:$0xff]  ;;  %v442_v63 = vrot.slane %v440_v53, 7  ;;  %v282_v38 = vld [vmem:[%s4313_s5 + $0x40] sm:$0xff] }
  0x2e   : > { %v1440_v26 = vsel %vm1437_vm6, %v1438_v17, %v1439_v18  ;;  %v1175_v27 = vrot.slane %v1173_v19, 1  ;;  %740 = vst [vmem:[#allocation2 + $0x18] sm:$0xf] %v739_v44  ;;  %731 = vst [vmem:[#allocation2 + $0xc] sm:$0xf] %v730_v58  ;;  %v421_v0 = vrot.slane %v416_v49, 4  ;;  %v743_v1 = vsel %vm4348_vm9, %v438_v55, %v742_v51 }
  0x2f   : > { %1486 = vrot.lane.b32.xlu1 %v1440_v26, %s4168_s6  ;;  %v420_v2 = vsel %vm4325_vm7, %v412_v48, %v419_v57  ;;  %v450_v3 = vrot.slane %v448_v59, 7  ;;  %v745_v4 = vld [vmem:[#allocation2 + $0x24] sm:$0xf]  ;;  %744 = vst [vmem:[#allocation2 + $0x20] sm:$0x1] %v743_v1  ;;  %v445_v6 = vor.u32 %v443_v54, %v442_v63  ;;  %v446_v7 = vrot.slane %v442_v63, 4 }
  0x30   : > { %v1176_v52 = vsel %vm1164_vm4, %v1171_v42, %v1175_v27  ;;  %732 = vst.msk [vmem:[#allocation2 + $0x10] sm:$0xf] %vm218_vm0, %v420_v2  ;;  %v736_v8 = vsel %vm4348_vm9, %v421_v0, %v735_v61  ;;  %v749_v9 = vld [vmem:[#allocation2 + $0x2c] sm:$0x1]  ;;  %v4363_v10 = vpack.c.bf16 %v280_v62, %v280_v62  ;;  %v4367_v18 = vpack.c.bf16 %v281_v5, %v281_v5  ;;  %s4175_s23 = smov 28   ;;  %s3742_s30 = sshll.u32 %s4307_s27, 7 }
  0x31   : > { %1357 = vrot.lane.b32.xlu0 %v1176_v52, %s4169_s7  ;;  %v453_v11 = vor.u32 %v451_v60, %v450_v3  ;;  %737 = vst [vmem:[#allocation2 + $0x14] sm:$0x1] %v736_v8  ;;  %v455_v13 = vrot.slane %v450_v3, 4  ;;  %v746_v17 = vsel %vm4332_vm8, %v445_v6, %v745_v4  ;;  %v283_v46 = vld [vmem:[%s4313_s5 + $0x48] sm:$0xff]  ;;  %v4403_v0 = vpack.c.bf16 %v282_v38, %v282_v38  ;;  %s5735_s27 = sand.u32 1, %s4157_s16  }
  0x32   : > { %747 = vst [vmem:[#allocation2 + $0x24] sm:$0xf] %v746_v17  ;;  %v457_v26 = vshrl.u32 %v4363_v10, 16  ;;  %v465_v35 = vshrl.u32 %v4367_v18, 16  ;;  %v4409_v5 = vpack.c.bf16 %v283_v46, %v283_v46  ;;  %v285_v46 = vld [vmem:[%s4313_s5 + $0x58] sm:$0xff]  ;;  %vm2542_vm11 = vcmask 31744  }
  0x33   : > { %v454_v20 = vsel %vm4325_vm7, %v446_v7, %v453_v11  ;;  %v750_v22 = vsel %vm4348_vm9, %v455_v13, %v749_v9  ;;  %v284_v13 = vld [vmem:[%s4313_s5 + $0x50] sm:$0xff]  ;;  %vm2575_vm12 = vcmask 64512   ;;  %vm2608_vm13 = vcmask 97280   ;;  %s206_s11 = scalar_lea.vmem [#allocation5], %s5735_s27  ;;  %s3362_s28 = scalar_lea.sflag [#allocation4], %s5735_s27 }
  0x34   : > { %v910_v15 = vld [vmem:[#allocation2 + $0x1c] sm:$0xf]  ;;  %748 = vst.msk [vmem:[#allocation2 + $0x28] sm:$0xf] %vm218_vm0, %v454_v20  ;;  %751 = vst [vmem:[#allocation2 + $0x2c] sm:$0x1] %v750_v22 }
  0x35   : > { %v909_v14 = vld [vmem:[#allocation2 + $0x18] sm:$0xf]  ;;  %v973_v25 = vld [vmem:[#allocation2 + $0x1c] sm:$0xf]  ;;  %v907_v27 = vld [vmem:[#allocation2 + $0xc] sm:$0xf] }
  0x36   : > { %v956_v16 = vld [vmem:[#allocation2 + $0x18] sm:$0xe]  ;;  %v4369_v19 = vcombine.low %v909_v14, %v910_v15  ;;  %v955_v29 = vld [vmem:[#allocation2 + $0xc] sm:$0xe]  ;;  %v4386_v45 = vld [vmem:[#allocation2 + $0x1c] sm:$0xf] }
  0x37   : > { %v1020_v21 = vld [vmem:[#allocation2 + $0x18] sm:$0xe]  ;;  %v3623_v24 = vcombine.low %v956_v16, %v910_v15  ;;  %v892_v33 = vld [vmem:[#allocation2 + $0xc] sm:$0xe]  ;;  %v908_v36 = vld [vmem:[#allocation2 + $0x10] sm:$0xf] }
  0x38   : > { %1600 = vrot.lane.b32.xlu1 %v4369_v19, %s4170_s8  ;;  %v972_v30 = vld [vmem:[#allocation2 + $0x18] sm:$0xf]  ;;  %v3670_v31 = vcombine.low %v1020_v21, %v973_v25  ;;  %v1693_v32 = vshll.u32 %v4369_v19, 16  ;;  %v845_v34 = vld [vmem:[#allocation2 + $0xc] sm:$0xf]  ;;  %v4382_v39 = vcombine.low %v907_v27, %v908_v36  ;;  %v3622_v40 = vcombine.low %v955_v29, %v908_v36  ;;  %s3394_s12 = sshll.u32 %s206_s11, 4  ;;  %s5755_s12 = int_to_ptr.vmem [resolvable:$true] %s3394_s12 }
  0x39   : > { %v846_v37 = vld [vmem:[#allocation2 + $0x10] sm:$0xf]  ;;  %v4384_v41 = vld [vmem:[#allocation2 + $0x14] ss:$0 sps:$4 sm:$0x11]   ;;  %v1953_v43 = vrot.slane %v3623_v24, 1  ;;  %v4395_v52 = vcombine.low %v972_v30, %v973_v25  ;;  %v4423_v30 = vpack.c.bf16 %v284_v13, %v284_v13 }
  0x3a   : > { %v3575_v42 = vcombine.low %v892_v33, %v846_v37  ;;  %v847_v44 = vld [vmem:[#allocation2 + $0x18] sm:$0xf]  ;;  %v4389_v47 = vld [vmem:[#allocation2 + $0x14] ss:$0 sps:$4 sm:$0x11]   ;;  %v4391_v48 = vcombine.low %v845_v34, %v846_v37  ;;  %v2462_v49 = vrot.slane %v3670_v31, 1  ;;  %1598 = vrot.lane.b32.xlu0 %v4382_v39, %s4170_s8 }
  0x3b   : > { %v974_v50 = vld [vmem:[#allocation2 + $0x24] sm:$0xf]  ;;  %v1950_v53 = vrot.slane %v3622_v40, 1  ;;  %v1691_v54 = vshrl.u32 %v4369_v19, 16  ;;  %v975_v55 = vld [vmem:[#allocation2 + $0x28] sm:$0xf]  ;;  %v4407_v4 = vcombine.low %v847_v44, %v4386_v45 }
  0x3c   : > { %v1021_v51 = vld [vmem:[#allocation2 + $0x24] sm:$0xe]  ;;  %v1951_v57 = vrot.slane %v4384_v41, 1  ;;  %v1441_v58 = vrot.slane %v3575_v42, 1  ;;  %v1442_v59 = vrot.slane %v4389_v47, 1  ;;  %v1695_v60 = vrot.slane %v1693_v32, 1 }
  0x3d   : > { %v3639_v61 = vcombine.low %v974_v50, %v975_v55  ;;  %v4400_v62 = vld [vmem:[#allocation2 + $0x20] ss:$0 sps:$4 sm:$0x11]   ;;  %v1178_v63 = vshrl.u32 %v4391_v48, 16  ;;  %v3671_v1 = vcombine.low %v1021_v51, %v975_v55  ;;  %v1180_v3 = vshll.u32 %v4391_v48, 16 }
  0x3e   : > { %v3941_v2 = vld [vmem:[#allocation2 + $0x20] ss:$0 sps:$4 sm:$0x11]   ;;  %2110 = vrot.lane.b32.xlu0 %v4395_v52, %s4171_s9  ;;  %v1952_v7 = vsel %vm1437_vm6, %v1950_v53, %v1951_v57  ;;  %v1443_v8 = vsel %vm1437_vm6, %v1441_v58, %v1442_v59  ;;  %v2463_v9 = vrot.slane %v4400_v62, 1  ;;  %v1681_v19 = vshll.u32 %v4382_v39, 16 }
  0x3f   : > { %v2205_v6 = vshll.u32 %v3639_v61, 16  ;;  %2112 = vrot.lane.b32.xlu1 %v3639_v61, %s4171_s9  ;;  %v3942_v11 = vld [vmem:[#allocation2 + $0x2c] ss:$0 sps:$4 sm:$0x11]   ;;  %v1954_v14 = vrot.slane %v3941_v2, 1  ;;  %v1698_v15 = vshll.u32 %v3941_v2, 16  ;;  %v1696_v33 = vor.u32 %v1695_v60, %v1691_v54 }
  0x40   : > { %v2203_v16 = vshrl.u32 %v3639_v61, 16  ;;  %v1182_v17 = vrot.slane %v1180_v3, 1  ;;  %v2193_v20 = vshll.u32 %v4395_v52, 16  ;;  %v2210_v22 = vshll.u32 %v3942_v11, 16  ;;  %v849_v34 = vld [vmem:[#allocation2 + $0x24] sm:$0xf] }
  0x41   : > { %v2207_v21 = vrot.slane %v2205_v6, 1  ;;  %v2465_v24 = vrot.slane %v3671_v1, 1  ;;  %v2466_v25 = vrot.slane %v3942_v11, 1  ;;  %v1185_v27 = vshll.u32 %v4389_v47, 16  ;;  %v850_v36 = vld [vmem:[#allocation2 + $0x28] sm:$0xf] }
  0x42   : > { %v4421_v29 = vld [vmem:[#allocation2 + $0x20] ss:$0 sps:$4 sm:$0x11]   ;;  %1998 = vrot.lane.b32.xlu0 %v1952_v7, %s4172_s10  ;;  %v2464_v31 = vsel %vm1437_vm6, %v2462_v49, %v2463_v9  ;;  %v1955_v32 = vsel %vm1437_vm6, %v1953_v43, %v1954_v14  ;;  %v1700_v37 = vrot.slane %v1698_v15, 1  ;;  %v1183_v40 = vor.u32 %v1182_v17, %v1178_v63  ;;  %v4430_v44 = vld [vmem:[#allocation2 + $0x18] sm:$0xe] }
  0x43   : > { %1488 = vrot.lane.b32.xlu1 %v1443_v8, %s4168_s6  ;;  %v2208_v38 = vor.u32 %v2207_v21, %v2203_v16  ;;  %v1192_v42 = vshll.u32 %v4407_v4, 16  ;;  %v2212_v47 = vrot.slane %v2210_v22, 1  ;;  %v1679_v50 = vshrl.u32 %v4382_v39, 16  ;;  %v4007_v43 = vld [vmem:[%s5822_s1] sm:$0xff]   ;;  %v4010_v61 = vld [vmem:[%s5822_s1 + $0x8] sm:$0xff]  }
  0x44   : > { %v1683_v51 = vrot.slane %v1681_v19, 1  ;;  %v1686_v53 = vshll.u32 %v4384_v41, 16  ;;  %v1187_v49 = vrot.slane %v1185_v27, 1  ;;  %v1190_v54 = vshrl.u32 %v4407_v4, 16  ;;  %v894_v58 = vld [vmem:[#allocation2 + $0x24] sm:$0xe]  ;;  %3826 = vmatprep.subr.bf16.mxu0 %v4007_v43  ;;  %3864 = vmatprep.subr.bf16.mxu1 %v4007_v43 }
  0x45   : > { %v1197_v55 = vshll.u32 %v4421_v29, 16  ;;  %v4440_v57 = vcombine.low %v849_v34, %v850_v36  ;;  %v2467_v39 = vsel %vm1437_vm6, %v2465_v24, %v2466_v25  ;;  %v4445_v41 = vld [vmem:[#allocation2 + $0x2c] ss:$0 sps:$4 sm:$0x11]   ;;  %v3576_v59 = vcombine.low %v4430_v44, %v4386_v45  ;;  %3827 = vmatpush3.bf16.msra.mxu0 %v4007_v43  ;;  %3867 = vmatpush3.bf16.msra.mxu1 %v4007_v43  ;;  %v911_v17 = vld [vmem:[#allocation2 + $0x24] sm:$0xf] }
  0x46   : > { %2510 = vrot.lane.b32.xlu0 %v2464_v31, %s4173_s13  ;;  %v4449_v60 = vpack.c.bf16 %v285_v46, %v285_v46  ;;  %v1701_v63 = vsel %vm1164_vm4, %v1696_v33, %v1700_v37  ;;  %v1194_v1 = vrot.slane %v1192_v42, 1  ;;  %v1684_v2 = vor.u32 %v1683_v51, %v1679_v50  ;;  %3828 = vmatprep.subr.bf16.mxu0 %v4010_v61  ;;  %v4470_v24 = vld [vmem:[#allocation2 + $0x28] sm:$0xf]  ;;  %v752_v33 = vld [vmem:[#allocation2 + $0x30] sm:$0xf] }
  0x47   : > { %2000 = vrot.lane.b32.xlu1 %v1955_v32, %s4172_s10  ;;  %v1204_v3 = vshll.u32 %v4440_v57, 16  ;;  %v1688_v6 = vrot.slane %v1686_v53, 1  ;;  %v2191_v7 = vshrl.u32 %v4395_v52, 16  ;;  %v2195_v8 = vrot.slane %v2193_v20, 1  ;;  %3865 = vmatprep.subr.bf16.mxu1 %v4010_v61 }
  0x48   : > { %v2198_v45 = vshll.u32 %v4400_v62, 16  ;;  %v2213_v9 = vsel %vm1164_vm4, %v2208_v38, %v2212_v47  ;;  %v1188_v11 = vsel %vm1164_vm4, %v1183_v40, %v1187_v49  ;;  %v3577_v13 = vcombine.low %v894_v58, %v850_v36 }
  0x49   : > { %v460_v14 = vshll.u32 %v4363_v10, 16  ;;  %v1199_v52 = vrot.slane %v1197_v55, 1  ;;  %v1202_v15 = vshrl.u32 %v4440_v57, 16  ;;  %v1206_v62 = vrot.slane %v1204_v3, 1  ;;  %3829 = vmatpush3.bf16.msra.mxu0 %v4010_v61  ;;  %3868 = vmatpush3.bf16.msra.mxu1 %v4010_v61 }
  0x4a   : > { %2512 = vrot.lane.b32.xlu0 %v2467_v39, %s4173_s13  ;;  %v1209_v16 = vshll.u32 %v4445_v41, 16  ;;  %v1195_v19 = vor.u32 %v1194_v1, %v1190_v54  ;;  %v459_v20 = vrot.slane %v457_v26, 7  ;;  %v467_v21 = vrot.slane %v465_v35, 7  ;;  %v756_v26 = vld [vmem:[#allocation2 + $0x38] sm:$0x1] }
  0x4b   : > { %1872 = vrot.lane.b32.xlu1 %v1701_v63, %s4174_s22  ;;  %v468_v22 = vshll.u32 %v4367_v18, 16  ;;  %v1689_v25 = vsel %vm1164_vm4, %v1684_v2, %v1688_v6  ;;  %v2196_v27 = vor.u32 %v2195_v8, %v2191_v7  ;;  %v2200_v31 = vrot.slane %v2198_v45, 1  ;;  %v4491_v54 = vld [vmem:[#allocation2 + $0x2c] ss:$0 sps:$4 sm:$0x11]  }
  0x4c   : > { %v1448_v32 = vrot.slane %v4445_v41, 1  ;;  %v1447_v34 = vrot.slane %v3577_v13, 1  ;;  %v462_v36 = vor.u32 %v460_v14, %v459_v20  ;;  %v463_v37 = vrot.slane %v459_v20, 4  ;;  %v759_v1 = vld [vmem:[#allocation2 + $0x3c] sm:$0xf] }
  0x4d   : > { %v470_v10 = vor.u32 %v468_v22, %v467_v21  ;;  %v1207_v18 = vor.u32 %v1206_v62, %v1202_v15  ;;  %v1211_v35 = vrot.slane %v1209_v16, 1  ;;  %v4477_v38 = vcombine.low %v911_v17, %v4470_v24  ;;  %v763_v8 = vld [vmem:[#allocation2 + $0x44] sm:$0x1]  ;;  %v770_v17 = vld [vmem:[#allocation2 + $0x50] sm:$0x1] }
  0x4e   : > { %1359 = vrot.lane.b32.xlu0 %v1188_v11, %s4169_s7  ;;  %v472_v40 = vrot.slane %v467_v21, 4  ;;  %v1200_v42 = vsel %vm1164_vm4, %v1195_v19, %v1199_v52  ;;  %v1444_v44 = vrot.slane %v3576_v59, 1  ;;  %v753_v47 = vsel %vm4332_vm8, %v462_v36, %v752_v33  ;;  %v766_v52 = vld [vmem:[#allocation2 + $0x48] sm:$0xf] }
  0x4f   : > { %2384 = vrot.lane.b32.xlu1 %v2213_v9, %s4175_s23  ;;  %v471_v46 = vsel %vm4325_vm7, %v463_v37, %v470_v10  ;;  %v2201_v50 = vsel %vm1164_vm4, %v2196_v27, %v2200_v31  ;;  %v1445_v51 = vrot.slane %v4421_v29, 1  ;;  %754 = vst [vmem:[#allocation2 + $0x30] sm:$0xf] %v753_v47  ;;  %v474_v43 = vshrl.u32 %v4403_v0, 16 }
  0x50   : > { %755 = vst.msk [vmem:[#allocation2 + $0x34] sm:$0xf] %vm218_vm0, %v471_v46  ;;  %v757_v53 = vsel %vm4348_vm9, %v472_v40, %v756_v26  ;;  %v1449_v49 = vsel %vm1437_vm6, %v1447_v34, %v1448_v32  ;;  %v477_v55 = vshll.u32 %v4403_v0, 16  ;;  %v482_v58 = vshrl.u32 %v4409_v5, 16 }
  0x51   : > { %758 = vst [vmem:[#allocation2 + $0x38] sm:$0x1] %v757_v53  ;;  %v485_v39 = vshll.u32 %v4409_v5, 16  ;;  %v1212_v29 = vsel %vm1164_vm4, %v1207_v18, %v1211_v35  ;;  %v1705_v41 = vshll.u32 %v4477_v38, 16  ;;  %v476_v59 = vrot.slane %v474_v43, 7 }
  0x52   : > { %1870 = vrot.lane.b32.xlu0 %v1689_v25, %s4174_s22  ;;  %v491_v61 = vshrl.u32 %v4423_v30, 16  ;;  %v484_v63 = vrot.slane %v482_v58, 7  ;;  %v494_v2 = vshll.u32 %v4423_v30, 16  ;;  %v499_v0 = vshrl.u32 %v4449_v60, 16  ;;  %v957_v30 = vld [vmem:[#allocation2 + $0x24] sm:$0xe] }
  0x53   : > { %1361 = vrot.lane.b32.xlu1 %v1200_v42, %s4169_s7  ;;  %v502_v3 = vshll.u32 %v4449_v60, 16  ;;  %v1703_v5 = vshrl.u32 %v4477_v38, 16  ;;  %v479_v6 = vor.u32 %v477_v55, %v476_v59  ;;  %v480_v7 = vrot.slane %v476_v59, 4 }
  0x54   : > { %v493_v45 = vrot.slane %v491_v61, 7  ;;  %v1710_v9 = vshll.u32 %v4491_v54, 16  ;;  %v487_v11 = vor.u32 %v485_v39, %v484_v63  ;;  %v489_v13 = vrot.slane %v484_v63, 4 }
  0x55   : > { %v501_v14 = vrot.slane %v499_v0, 7  ;;  %v1707_v15 = vrot.slane %v1705_v41, 1  ;;  %v760_v60 = vsel %vm4332_vm8, %v479_v6, %v759_v1  ;;  %v1446_v19 = vsel %vm1437_vm6, %v1444_v44, %v1445_v51 }
  0x56   : > { %2382 = vrot.lane.b32.xlu0 %v2201_v50, %s4175_s23  ;;  %v496_v62 = vor.u32 %v494_v2, %v493_v45  ;;  %v497_v16 = vrot.slane %v493_v45, 4  ;;  %v913_v20 = vld [vmem:[#allocation2 + $0x30] sm:$0xf]  ;;  %v488_v25 = vsel %vm4325_vm7, %v480_v7, %v487_v11  ;;  %761 = vst [vmem:[#allocation2 + $0x3c] sm:$0xf] %v760_v60  ;;  %v764_v27 = vsel %vm4348_vm9, %v489_v13, %v763_v8 }
  0x57   : > { %1363 = vrot.lane.b32.xlu1 %v1212_v29, %s4169_s7  ;;  %v914_v21 = vld [vmem:[#allocation2 + $0x34] sm:$0xf]  ;;  %v958_v22 = vld [vmem:[#allocation2 + $0x30] sm:$0xe]  ;;  %v504_v31 = vor.u32 %v502_v3, %v501_v14  ;;  %762 = vst.msk [vmem:[#allocation2 + $0x40] sm:$0xf] %vm218_vm0, %v488_v25  ;;  %v3624_v10 = vcombine.low %v957_v30, %v4470_v24  ;;  %v1708_v46 = vor.u32 %v1707_v15, %v1703_v5 }
  0x58   : > { %v3593_v32 = vcombine.low %v913_v20, %v914_v21  ;;  %v3953_v33 = vld [vmem:[#allocation2 + $0x38] ss:$0 sps:$4 sm:$0x11]   ;;  %765 = vst [vmem:[#allocation2 + $0x44] sm:$0x1] %v764_v27  ;;  %v767_v34 = vsel %vm4332_vm8, %v496_v62, %v766_v52  ;;  %v506_v36 = vrot.slane %v501_v14, 4  ;;  %v3625_v37 = vcombine.low %v958_v22, %v914_v21 }
  0x59   : > { %v976_v26 = vld [vmem:[#allocation2 + $0x30] sm:$0xf]  ;;  %v4519_v18 = vld [vmem:[#allocation2 + $0x34] sm:$0xf]  ;;  %v505_v35 = vsel %vm4325_vm7, %v497_v16, %v504_v31  ;;  %768 = vst [vmem:[#allocation2 + $0x48] sm:$0xf] %v767_v34 }
  0x5a   : > { %1490 = vrot.lane.b32.xlu0 %v1446_v19, %s4168_s6  ;;  %v1717_v40 = vshll.u32 %v3593_v32, 16  ;;  %v1715_v42 = vshrl.u32 %v3593_v32, 16  ;;  %v1722_v44 = vshll.u32 %v3953_v33, 16  ;;  %769 = vst.msk [vmem:[#allocation2 + $0x4c] sm:$0xf] %vm218_vm0, %v505_v35  ;;  %v1712_v47 = vrot.slane %v1710_v9, 1 }
  0x5b   : > { %1492 = vrot.lane.b32.xlu1 %v1449_v49, %s4168_s6  ;;  %v4527_v24 = vcombine.low %v976_v26, %v4519_v18  ;;  %v851_v50 = vld [vmem:[#allocation2 + $0x30] sm:$0xf]  ;;  %v771_v51 = vsel %vm4348_vm9, %v506_v36, %v770_v17  ;;  %v4531_v49 = vld [vmem:[#allocation2 + $0x34] sm:$0xf]  ;;  %v1959_v55 = vrot.slane %v3625_v37, 1  ;;  %v1956_v58 = vrot.slane %v3624_v10, 1 }
  0x5c   : > { %v1719_v53 = vrot.slane %v1717_v40, 1  ;;  %v1724_v43 = vrot.slane %v1722_v44, 1  ;;  %772 = vst [vmem:[#allocation2 + $0x50] sm:$0x1] %v771_v51  ;;  %v1957_v39 = vrot.slane %v4491_v54, 1  ;;  %v286_v29 = vld [vmem:[%s4313_s5 + $0x60] sm:$0xff]  ;;  %v4541_v1 = vcombine.low %v851_v50, %v4531_v49 }
  0x5d   : > { %v1960_v59 = vrot.slane %v3953_v33, 1  ;;  %v978_v61 = vld [vmem:[#allocation2 + $0x3c] sm:$0xf]  ;;  %v4538_v63 = vld [vmem:[#allocation2 + $0x38] ss:$0 sps:$4 sm:$0x11]   ;;  %v1713_v2 = vsel %vm1164_vm4, %v1708_v46, %v1712_v47  ;;  %v3755_v11 = vpack.c.bf16 %v286_v29, %v286_v29 }
  0x5e   : > { %1602 = vrot.lane.b32.xlu0 %v4477_v38, %s4170_s8  ;;  %v1720_v41 = vor.u32 %v1719_v53, %v1715_v42  ;;  %v4544_v0 = vld [vmem:[#allocation2 + $0x40] sm:$0xf]  ;;  %v2217_v54 = vshll.u32 %v4527_v24, 16  ;;  %v1022_v6 = vld [vmem:[#allocation2 + $0x30] sm:$0xe]  ;;  %v1958_v8 = vsel %vm1437_vm6, %v1956_v58, %v1957_v39  ;;  %v2215_v45 = vshrl.u32 %v4527_v24, 16 }
  0x5f   : > { %1604 = vrot.lane.b32.xlu1 %v3593_v32, %s4170_s8  ;;  %v3641_v5 = vcombine.low %v978_v61, %v4544_v0  ;;  %v4549_v38 = vld [vmem:[#allocation2 + $0x44] ss:$0 sps:$4 sm:$0x11]   ;;  %v853_v7 = vld [vmem:[#allocation2 + $0x3c] sm:$0xf]  ;;  %v1961_v13 = vsel %vm1437_vm6, %v1959_v55, %v1960_v59  ;;  %v2222_v52 = vshll.u32 %v4538_v63, 16  ;;  %v3672_v20 = vcombine.low %v1022_v6, %v4519_v18 }
  0x60   : > { %v1725_v3 = vsel %vm1164_vm4, %v1720_v41, %v1724_v43  ;;  %v4553_v9 = vld [vmem:[#allocation2 + $0x40] sm:$0xf]  ;;  %v4559_v30 = vld [vmem:[#allocation2 + $0x38] ss:$0 sps:$4 sm:$0x11]   ;;  %v1216_v15 = vshll.u32 %v4541_v1, 16 }
  0x61   : > { %v2229_v14 = vshll.u32 %v3641_v5, 16  ;;  %v2227_v60 = vshrl.u32 %v3641_v5, 16  ;;  %v2234_v62 = vshll.u32 %v4549_v38, 16  ;;  %v2219_v16 = vrot.slane %v2217_v54, 1  ;;  %v287_v21 = vld [vmem:[%s4313_s5 + $0x68] sm:$0xff] }
  0x62   : > { %1874 = vrot.lane.b32.xlu0 %v1713_v2, %s4174_s22  ;;  %v4564_v17 = vcombine.low %v853_v7, %v4553_v9  ;;  %v508_v22 = vshrl.u32 %v3755_v11, 16  ;;  %v1023_v25 = vld [vmem:[#allocation2 + $0x3c] sm:$0xe]  ;;  %v2224_v27 = vrot.slane %v2222_v52, 1  ;;  %v1214_v31 = vshrl.u32 %v4541_v1, 16 }
  0x63   : > { %1876 = vrot.lane.b32.xlu1 %v1725_v3, %s4174_s22  ;;  %v2231_v19 = vrot.slane %v2229_v14, 1  ;;  %v1218_v32 = vrot.slane %v1216_v15, 1  ;;  %v1221_v33 = vshll.u32 %v4559_v30, 16  ;;  %v2236_v36 = vrot.slane %v2234_v62, 1  ;;  %v896_v44 = vld [vmem:[#allocation2 + $0x3c] sm:$0xe] }
  0x64   : > { %v2220_v37 = vor.u32 %v2219_v16, %v2215_v45  ;;  %v4572_v10 = vld [vmem:[#allocation2 + $0x44] ss:$0 sps:$4 sm:$0x11]   ;;  %v1228_v26 = vshll.u32 %v4564_v17, 16  ;;  %v511_v18 = vshll.u32 %v3755_v11, 16  ;;  %v3673_v35 = vcombine.low %v1023_v25, %v4544_v0  ;;  %v289_v14 = vld [vmem:[%s4313_s5 + $0x78] sm:$0xff] }
  0x65   : > { %v2232_v34 = vor.u32 %v2231_v19, %v2227_v60  ;;  %v2468_v40 = vrot.slane %v3672_v20, 1  ;;  %v2469_v42 = vrot.slane %v4538_v63, 1  ;;  %v895_v46 = vld [vmem:[#allocation2 + $0x30] sm:$0xe]  ;;  %v3756_v47 = vpack.c.bf16 %v287_v21, %v287_v21  ;;  %v917_v41 = vld [vmem:[#allocation2 + $0x48] sm:$0xf] }
  0x66   : > { %2002 = vrot.lane.b32.xlu0 %v1958_v8, %s4172_s10  ;;  %v1219_v50 = vor.u32 %v1218_v32, %v1214_v31  ;;  %v1223_v51 = vrot.slane %v1221_v33, 1  ;;  %v1226_v53 = vshrl.u32 %v4564_v17, 16  ;;  %v510_v43 = vrot.slane %v508_v22, 7  ;;  %v4584_v59 = vld [vmem:[#allocation2 + $0x4c] sm:$0xf]  ;;  %v290_v19 = vld [vmem:[%s4313_s5 + $0x80] sm:$0xff] }
  0x67   : > { %2004 = vrot.lane.b32.xlu1 %v1961_v13, %s4172_s10  ;;  %v2237_v55 = vsel %vm1164_vm4, %v2232_v34, %v2236_v36  ;;  %v2225_v58 = vsel %vm1164_vm4, %v2220_v37, %v2224_v27  ;;  %v1230_v39 = vrot.slane %v1228_v26, 1  ;;  %v1233_v29 = vshll.u32 %v4572_v10, 16  ;;  %v4588_v2 = vld [vmem:[#allocation2 + $0x40] sm:$0xf]  ;;  %v288_v13 = vld [vmem:[%s4313_s5 + $0x70] sm:$0xff] }
  0x68   : > { %v3579_v61 = vcombine.low %v896_v44, %v4553_v9  ;;  %v3578_v63 = vcombine.low %v895_v46, %v4531_v49  ;;  %v2470_v0 = vsel %vm1437_vm6, %v2468_v40, %v2469_v42  ;;  %v2471_v54 = vrot.slane %v3673_v35, 1  ;;  %v960_v60 = vld [vmem:[#allocation2 + $0x48] sm:$0xe]  ;;  %v4608_v21 = vld [vmem:[#allocation2 + $0x50] ss:$0 sps:$4 sm:$0x11]  }
  0x69   : > { %v2472_v3 = vrot.slane %v4549_v38, 1  ;;  %v1224_v6 = vsel %vm1164_vm4, %v1219_v50, %v1223_v51  ;;  %v1454_v49 = vrot.slane %v4572_v10, 1  ;;  %v4597_v7 = vcombine.low %v917_v41, %v4584_v59  ;;  %v4614_v32 = vld [vmem:[#allocation2 + $0x44] ss:$0 sps:$4 sm:$0x11]   ;;  %v291_v51 = vld [vmem:[%s4313_s5 + $0x88] sm:$0xff] }
  0x6a   : > { %2114 = vrot.lane.b32.xlu0 %v4527_v24, %s4171_s9  ;;  %v915_v24 = vld [vmem:[#allocation2 + $0x3c] sm:$0xf]  ;;  %v513_v8 = vor.u32 %v511_v18, %v510_v43  ;;  %v1231_v45 = vor.u32 %v1230_v39, %v1226_v53  ;;  %v1235_v9 = vrot.slane %v1233_v29, 1  ;;  %v516_v38 = vshrl.u32 %v3756_v47, 16  ;;  %v980_v39 = vld [vmem:[#allocation2 + $0x48] sm:$0xf] }
  0x6b   : > { %2116 = vrot.lane.b32.xlu1 %v3641_v5, %s4171_s9  ;;  %v773_v5 = vld [vmem:[#allocation2 + $0x54] sm:$0xf]  ;;  %v4600_v11 = vcombine.low %v915_v24, %v4588_v2  ;;  %v1453_v52 = vrot.slane %v3579_v61, 1  ;;  %v1450_v15 = vrot.slane %v3578_v63, 1  ;;  %v519_v62 = vshll.u32 %v3756_v47, 16 }
  0x6c   : > { %v774_v16 = vsel %vm4332_vm8, %v513_v8, %v773_v5  ;;  %v1451_v20 = vrot.slane %v4559_v30, 1  ;;  %v514_v22 = vrot.slane %v510_v43, 4  ;;  %v518_v25 = vrot.slane %v516_v38, 7  ;;  %v777_v33 = vld [vmem:[#allocation2 + $0x5c] sm:$0x1] }
  0x6d   : > { %775 = vst [vmem:[#allocation2 + $0x54] sm:$0xf] %v774_v16  ;;  %v2473_v27 = vsel %vm1437_vm6, %v2471_v54, %v2472_v3  ;;  %v1741_v31 = vshll.u32 %v4597_v7, 16  ;;  %v3757_v34 = vpack.c.bf16 %v288_v13, %v288_v13  ;;  %v3758_v36 = vpack.c.bf16 %v289_v14, %v289_v14  ;;  %v959_v44 = vld [vmem:[#allocation2 + $0x3c] sm:$0xe] }
  0x6e   : > { %2386 = vrot.lane.b32.xlu0 %v2225_v58, %s4175_s23  ;;  %v1236_v30 = vsel %vm1164_vm4, %v1231_v45, %v1235_v9  ;;  %v1729_v37 = vshll.u32 %v4600_v11, 16  ;;  %v521_v10 = vor.u32 %v519_v62, %v518_v25  ;;  %v523_v26 = vrot.slane %v518_v25, 4  ;;  %v4635_v41 = vld [vmem:[#allocation2 + $0x4c] sm:$0xf]  ;;  %v780_v45 = vld [vmem:[#allocation2 + $0x60] sm:$0xf] }
  0x6f   : > { %2388 = vrot.lane.b32.xlu1 %v2237_v55, %s4175_s23  ;;  %v1455_v18 = vsel %vm1437_vm6, %v1453_v52, %v1454_v49  ;;  %v3627_v35 = vcombine.low %v960_v60, %v4584_v59  ;;  %v4620_v40 = vpack.c.bf16 %v290_v19, %v290_v19  ;;  %v1452_v42 = vsel %vm1437_vm6, %v1450_v15, %v1451_v20  ;;  %v784_v14 = vld [vmem:[#allocation2 + $0x68] sm:$0x1]  ;;  %v4647_v62 = vld [vmem:[#allocation2 + $0x4c] sm:$0xf] }
  0x70   : > { %v1746_v46 = vshll.u32 %v4608_v21, 16  ;;  %v522_v47 = vsel %vm4325_vm7, %v514_v22, %v521_v10  ;;  %v778_v50 = vsel %vm4348_vm9, %v523_v26, %v777_v33  ;;  %v1739_v53 = vshrl.u32 %v4597_v7, 16  ;;  %v4650_v25 = vld [vmem:[#allocation2 + $0x50] ss:$0 sps:$4 sm:$0x11]  }
  0x71   : > { %v1743_v43 = vrot.slane %v1741_v31, 1  ;;  %v1727_v55 = vshrl.u32 %v4600_v11, 16  ;;  %v1734_v58 = vshll.u32 %v4614_v32, 16  ;;  %776 = vst.msk [vmem:[#allocation2 + $0x58] sm:$0xf] %vm218_vm0, %v522_v47  ;;  %v1731_v29 = vrot.slane %v1729_v37, 1 }
  0x72   : > { %2514 = vrot.lane.b32.xlu0 %v2470_v0, %s4173_s13  ;;  %779 = vst [vmem:[#allocation2 + $0x5c] sm:$0x1] %v778_v50  ;;  %v525_v59 = vshrl.u32 %v3757_v34, 16  ;;  %v528_v61 = vshll.u32 %v3757_v34, 16  ;;  %v533_v63 = vshrl.u32 %v3758_v36, 16  ;;  %v3626_v24 = vcombine.low %v959_v44, %v4588_v2 }
  0x73   : > { %1365 = vrot.lane.b32.xlu1 %v1224_v6, %s4169_s7  ;;  %v1965_v0 = vrot.slane %v3627_v35, 1  ;;  %v1966_v54 = vrot.slane %v4608_v21, 1  ;;  %v4639_v3 = vpack.c.bf16 %v291_v51, %v291_v51  ;;  %v1748_v5 = vrot.slane %v1746_v46, 1  ;;  %v855_v2 = vld [vmem:[#allocation2 + $0x48] sm:$0xf] }
  0x74   : > { %v527_v6 = vrot.slane %v525_v59, 7  ;;  %v535_v49 = vrot.slane %v533_v63, 7  ;;  %v536_v8 = vshll.u32 %v3758_v36, 16  ;;  %v1744_v9 = vor.u32 %v1743_v43, %v1739_v53  ;;  %v982_v60 = vld [vmem:[#allocation2 + $0x54] sm:$0xf] }
  0x75   : > { %v1736_v38 = vrot.slane %v1734_v58, 1  ;;  %v4644_v13 = vcombine.low %v980_v39, %v4635_v41  ;;  %v542_v52 = vshrl.u32 %v4620_v40, 16  ;;  %v1732_v15 = vor.u32 %v1731_v29, %v1727_v55  ;;  %v857_v26 = vld [vmem:[#allocation2 + $0x54] sm:$0xf]  ;;  %v787_v43 = vld [vmem:[#allocation2 + $0x6c] sm:$0xf] }
  0x76   : > { %2516 = vrot.lane.b32.xlu0 %v2473_v27, %s4173_s13  ;;  %v530_v16 = vor.u32 %v528_v61, %v527_v6  ;;  %v531_v19 = vrot.slane %v527_v6, 4  ;;  %v538_v20 = vor.u32 %v536_v8, %v535_v49  ;;  %v1962_v21 = vrot.slane %v3626_v24, 1  ;;  %v4683_v51 = vld [vmem:[#allocation2 + $0x50] ss:$0 sps:$4 sm:$0x11]  }
  0x77   : > { %1367 = vrot.lane.b32.xlu1 %v1236_v30, %s4169_s7  ;;  %v1963_v22 = vrot.slane %v4614_v32, 1  ;;  %v540_v27 = vrot.slane %v535_v49, 4  ;;  %v4658_v36 = vrot.slane %v542_v52, 7  ;;  %v545_v30 = vshll.u32 %v4620_v40, 16  ;;  %v1024_v55 = vld [vmem:[#allocation2 + $0x48] sm:$0xe] }
  0x78   : > { %v4652_v31 = vld [vmem:[#allocation2 + $0x58] sm:$0xf]  ;;  %v539_v33 = vsel %vm4325_vm7, %v531_v19, %v538_v20  ;;  %v781_v34 = vsel %vm4332_vm8, %v530_v16, %v780_v45  ;;  %v2241_v37 = vshll.u32 %v4644_v13, 16  ;;  %v4668_v10 = vcombine.low %v855_v2, %v4647_v62 }
  0x79   : > { %v3643_v32 = vcombine.low %v982_v60, %v4652_v31  ;;  %782 = vst [vmem:[#allocation2 + $0x60] sm:$0xf] %v781_v34  ;;  %783 = vst.msk [vmem:[#allocation2 + $0x64] sm:$0xf] %vm218_vm0, %v539_v33  ;;  %v1737_v35 = vsel %vm1164_vm4, %v1732_v15, %v1736_v38  ;;  %v1967_v46 = vsel %vm1437_vm6, %v1965_v0, %v1966_v54  ;;  %v2246_v50 = vshll.u32 %v4650_v25, 16 }
  0x7a   : > { %1494 = vrot.lane.b32.xlu0 %v1452_v42, %s4168_s6  ;;  %v4673_v40 = vld [vmem:[#allocation2 + $0x5c] ss:$0 sps:$4 sm:$0x11]   ;;  %v550_v42 = vshrl.u32 %v4639_v3, 16  ;;  %v1964_v47 = vsel %vm1437_vm6, %v1962_v21, %v1963_v22  ;;  %v547_v53 = vor.u32 %v545_v30, %v4658_v36  ;;  %v2239_v58 = vshrl.u32 %v4644_v13, 16  ;;  %v292_v30 = vld [vmem:[%s4313_s5 + $0x90] sm:$0xff] }
  0x7b   : > { %1496 = vrot.lane.b32.xlu1 %v1455_v18, %s4168_s6  ;;  %v1749_v18 = vsel %vm1164_vm4, %v1744_v9, %v1748_v5  ;;  %v2253_v44 = vshll.u32 %v3643_v32, 16  ;;  %v2243_v39 = vrot.slane %v2241_v37, 1  ;;  %v1240_v29 = vshll.u32 %v4668_v10, 16  ;;  %v4702_v2 = vld [vmem:[#allocation2 + $0x5c] ss:$0 sps:$4 sm:$0x11]  }
  0x7c   : > { %v2251_v61 = vshrl.u32 %v3643_v32, 16  ;;  %v2258_v24 = vshll.u32 %v4673_v40, 16  ;;  %v552_v0 = vrot.slane %v550_v42, 7  ;;  %v553_v54 = vshll.u32 %v4639_v3, 16  ;;  %v898_v34 = vld [vmem:[#allocation2 + $0x54] sm:$0xe] }
  0x7d   : > { %v2255_v63 = vrot.slane %v2253_v44, 1  ;;  %v3674_v5 = vcombine.low %v1024_v55, %v4635_v41  ;;  %v2248_v6 = vrot.slane %v2246_v50, 1  ;;  %v1245_v49 = vshll.u32 %v4683_v51, 16  ;;  %v1025_v41 = vld [vmem:[#allocation2 + $0x54] sm:$0xe] }
  0x7e   : > { %1606 = vrot.lane.b32.xlu0 %v4600_v11, %s4170_s8  ;;  %v785_v11 = vsel %vm4348_vm9, %v540_v27, %v784_v14  ;;  %v788_v8 = vsel %vm4332_vm8, %v547_v53, %v787_v43  ;;  %v2244_v45 = vor.u32 %v2243_v39, %v2239_v58  ;;  %v1238_v9 = vshrl.u32 %v4668_v10, 16 }
  0x7f   : > { %1608 = vrot.lane.b32.xlu1 %v4597_v7, %s4170_s8  ;;  %v4675_v7 = vld [vmem:[#allocation2 + $0x58] sm:$0xf]  ;;  %786 = vst [vmem:[#allocation2 + $0x68] sm:$0x1] %v785_v11  ;;  %v1242_v38 = vrot.slane %v1240_v29, 1  ;;  %v548_v3 = vrot.slane %v4658_v36, 4  ;;  %v2256_v14 = vor.u32 %v2255_v63, %v2251_v61  ;;  %v555_v60 = vor.u32 %v553_v54, %v552_v0 }
  0x80   : > { %v4691_v59 = vcombine.low %v857_v26, %v4675_v7  ;;  %789 = vst [vmem:[#allocation2 + $0x6c] sm:$0xf] %v788_v8  ;;  %v2260_v52 = vrot.slane %v2258_v24, 1  ;;  %v1247_v16 = vrot.slane %v1245_v49, 1  ;;  %v2474_v19 = vrot.slane %v3674_v5, 1 }
  0x81   : > { %v2475_v20 = vrot.slane %v4650_v25, 1  ;;  %v3675_v21 = vcombine.low %v1025_v41, %v4652_v31  ;;  %v2249_v22 = vsel %vm1164_vm4, %v2244_v45, %v2248_v6  ;;  %v1243_v27 = vor.u32 %v1242_v38, %v1238_v9  ;;  %v897_v36 = vld [vmem:[#allocation2 + $0x48] sm:$0xe]  ;;  %v919_v31 = vld [vmem:[#allocation2 + $0x54] sm:$0xf] }
  0x82   : > { %1878 = vrot.lane.b32.xlu0 %v1737_v35, %s4174_s22  ;;  %v1252_v15 = vshll.u32 %v4691_v59, 16  ;;  %v1250_v33 = vshrl.u32 %v4691_v59, 16  ;;  %v2261_v37 = vsel %vm1164_vm4, %v2256_v14, %v2260_v52  ;;  %v1257_v25 = vshll.u32 %v4702_v2, 16  ;;  %v922_v35 = vld [vmem:[#allocation2 + $0x64] sm:$0xf] }
  0x83   : > { %1880 = vrot.lane.b32.xlu1 %v1749_v18, %s4174_s22  ;;  %v4716_v18 = vld [vmem:[#allocation2 + $0x58] sm:$0xf]  ;;  %v2476_v11 = vsel %vm1437_vm6, %v2474_v19, %v2475_v20  ;;  %v3581_v42 = vcombine.low %v898_v34, %v4675_v7  ;;  %v3580_v44 = vcombine.low %v897_v36, %v4647_v62  ;;  %v3761_v50 = vpack.c.bf16 %v292_v30, %v292_v30  ;;  %v962_v6 = vld [vmem:[#allocation2 + $0x60] sm:$0xe]  ;;  %v961_v49 = vld [vmem:[#allocation2 + $0x54] sm:$0xe] }
  0x84   : > { %v1254_v26 = vrot.slane %v1252_v15, 1  ;;  %v1248_v53 = vsel %vm1164_vm4, %v1243_v27, %v1247_v16  ;;  %v2477_v43 = vrot.slane %v3675_v21, 1  ;;  %v4729_v55 = vcombine.low %v919_v31, %v4716_v18  ;;  %v4741_v8 = vld [vmem:[#allocation2 + $0x5c] ss:$0 sps:$4 sm:$0x11]  }
  0x85   : > { %v557_v58 = vrot.slane %v552_v0, 4  ;;  %v1259_v29 = vrot.slane %v1257_v25, 1  ;;  %v2478_v7 = vrot.slane %v4673_v40, 1  ;;  %v1457_v62 = vrot.slane %v4683_v51, 1  ;;  %v4748_v16 = vld [vmem:[#allocation2 + $0x64] sm:$0xf] }
  0x86   : > { %2006 = vrot.lane.b32.xlu0 %v1964_v47, %s4172_s10  ;;  %v293_v47 = vld [vmem:[%s4313_s5 + $0x98] sm:$0xff]  ;;  %v1255_v39 = vor.u32 %v1254_v26, %v1250_v33  ;;  %v1459_v54 = vrot.slane %v3581_v42, 1  ;;  %v1456_v5 = vrot.slane %v3580_v44, 1  ;;  %v1460_v0 = vrot.slane %v4702_v2, 1  ;;  %v984_v2 = vld [vmem:[#allocation2 + $0x60] sm:$0xf] }
  0x87   : > { %2008 = vrot.lane.b32.xlu1 %v1967_v46, %s4172_s10  ;;  %v791_v46 = vld [vmem:[#allocation2 + $0x74] sm:$0x1]  ;;  %v3762_v24 = vpack.c.bf16 %v293_v47, %v293_v47  ;;  %v1753_v40 = vshll.u32 %v4729_v55, 16  ;;  %v559_v51 = vshrl.u32 %v3761_v50, 16  ;;  %v2479_v9 = vsel %vm1437_vm6, %v2477_v43, %v2478_v7  ;;  %v794_v33 = vld [vmem:[#allocation2 + $0x78] sm:$0xf] }
  0x88   : > { %v792_v63 = vsel %vm4348_vm9, %v557_v58, %v791_v46  ;;  %v1260_v45 = vsel %vm1164_vm4, %v1255_v39, %v1259_v29  ;;  %v562_v41 = vshll.u32 %v3761_v50, 16  ;;  %v3629_v14 = vcombine.low %v962_v6, %v922_v35  ;;  %v859_v42 = vld [vmem:[#allocation2 + $0x60] sm:$0xf]  ;;  %v4769_v50 = vld [vmem:[#allocation2 + $0x64] sm:$0xf] }
  0x89   : > { %793 = vst [vmem:[#allocation2 + $0x74] sm:$0x1] %v792_v63  ;;  %v567_v52 = vshrl.u32 %v3762_v24, 16  ;;  %v1458_v15 = vsel %vm1437_vm6, %v1456_v5, %v1457_v62  ;;  %v561_v19 = vrot.slane %v559_v51, 7  ;;  %v1751_v21 = vshrl.u32 %v4729_v55, 16  ;;  %v295_v62 = vld [vmem:[%s4313_s5 + $0xa8] sm:$0xff] }
  0x8a   : > { %2118 = vrot.lane.b32.xlu0 %v4644_v13, %s4171_s9  ;;  %v556_v13 = vsel %vm4325_vm7, %v548_v3, %v555_v60  ;;  %v3989_v3 = vld [vmem:[#allocation2 + $0x68] ss:$0 sps:$4 sm:$0x11]   ;;  %v3628_v60 = vcombine.low %v961_v49, %v4716_v18  ;;  %v1758_v27 = vshll.u32 %v4741_v8, 16  ;;  %v1461_v34 = vsel %vm1437_vm6, %v1459_v54, %v1460_v0  ;;  %v798_v6 = vld [vmem:[#allocation2 + $0x80] sm:$0x1] }
  0x8b   : > { %2120 = vrot.lane.b32.xlu1 %v3643_v32, %s4171_s9  ;;  %v921_v32 = vld [vmem:[#allocation2 + $0x60] sm:$0xf]  ;;  %790 = vst.msk [vmem:[#allocation2 + $0x70] sm:$0xf] %vm218_vm0, %v556_v13  ;;  %v1770_v30 = vshll.u32 %v3989_v3, 16  ;;  %v564_v25 = vor.u32 %v562_v41, %v561_v19  ;;  %v1971_v31 = vrot.slane %v3629_v14, 1  ;;  %v4759_v18 = vcombine.low %v984_v2, %v4748_v16 }
  0x8c   : > { %v4732_v61 = vcombine.low %v921_v32, %v922_v35  ;;  %v569_v13 = vrot.slane %v567_v52, 7  ;;  %v294_v32 = vld [vmem:[%s4313_s5 + $0xa0] sm:$0xff]  ;;  %v1972_v35 = vrot.slane %v3989_v3, 1  ;;  %v570_v43 = vshll.u32 %v3762_v24, 16 }
  0x8d   : > { %v795_v44 = vsel %vm4332_vm8, %v564_v25, %v794_v33  ;;  %v1772_v39 = vrot.slane %v1770_v30, 1  ;;  %v1760_v29 = vrot.slane %v1758_v27, 1  ;;  %v1969_v7 = vrot.slane %v4741_v8, 1  ;;  %v4774_v54 = vld [vmem:[#allocation2 + $0x68] ss:$0 sps:$4 sm:$0x11]  }
  0x8e   : > { %2390 = vrot.lane.b32.xlu0 %v2249_v22, %s4175_s23  ;;  %v1765_v38 = vshll.u32 %v4732_v61, 16  ;;  %v1763_v20 = vshrl.u32 %v4732_v61, 16  ;;  %v1755_v22 = vrot.slane %v1753_v40, 1  ;;  %796 = vst [vmem:[#allocation2 + $0x78] sm:$0xf] %v795_v44  ;;  %v2265_v63 = vshll.u32 %v4759_v18, 16 }
  0x8f   : > { %2392 = vrot.lane.b32.xlu1 %v2261_v37, %s4175_s23  ;;  %v986_v37 = vld [vmem:[#allocation2 + $0x6c] sm:$0xf]  ;;  %v572_v5 = vor.u32 %v570_v43, %v569_v13  ;;  %v1026_v49 = vld [vmem:[#allocation2 + $0x60] sm:$0xe]  ;;  %v4777_v0 = vcombine.low %v859_v42, %v4769_v50  ;;  %v574_v24 = vrot.slane %v569_v13, 4  ;;  %v4781_v51 = vpack.c.bf16 %v294_v32, %v294_v32  ;;  %v296_v32 = vld [vmem:[%s4313_s5 + $0xb0] sm:$0xff] }
  0x90   : > { %v1767_v36 = vrot.slane %v1765_v38, 1  ;;  %v1756_v46 = vor.u32 %v1755_v22, %v1751_v21  ;;  %v4779_v40 = vld [vmem:[#allocation2 + $0x68] ss:$0 sps:$4 sm:$0x11]   ;;  %v1973_v8 = vsel %vm1437_vm6, %v1971_v31, %v1972_v35  ;;  %v3764_v41 = vpack.c.bf16 %v295_v62, %v295_v62  ;;  %v297_v35 = vld [vmem:[%s4313_s5 + $0xb8] sm:$0xff] }
  0x91   : > { %v4011_v3 = vld [vmem:[%s5822_s1 + $0x10] ss:$0 sps:$4 sm:$0x33]   ;;  %v3676_v2 = vcombine.low %v1026_v49, %v4748_v16  ;;  %v2270_v21 = vshll.u32 %v4774_v54, 16  ;;  %v1262_v22 = vshrl.u32 %v4777_v0, 16  ;;  %v1264_v27 = vshll.u32 %v4777_v0, 16 }
  0x92   : > { %2518 = vrot.lane.b32.xlu0 %v2476_v11, %s4173_s13  ;;  %v4756_v26 = vld [vmem:[#allocation2 + $0x70] sm:$0xf]  ;;  %v1968_v11 = vrot.slane %v3628_v60, 1  ;;  %v1768_v58 = vor.u32 %v1767_v36, %v1763_v20  ;;  %v799_v60 = vsel %vm4348_vm9, %v574_v24, %v798_v6  ;;  %v2267_v20 = vrot.slane %v2265_v63, 1  ;;  %3870 = vmatprep.subr.msk.bf16.mxu0 %vm2859_vm10, %v4011_v3  ;;  %v4823_v42 = vld [vmem:[#allocation2 + $0x6c] sm:$0xe] }
  0x93   : > { %1369 = vrot.lane.b32.xlu1 %v1248_v53, %s4169_s7  ;;  %v4767_v47 = vcombine.low %v986_v37, %v4756_v26  ;;  %v565_v53 = vrot.slane %v561_v19, 4  ;;  %v2263_v19 = vshrl.u32 %v4759_v18, 16  ;;  %800 = vst [vmem:[#allocation2 + $0x80] sm:$0x1] %v799_v60  ;;  %v1269_v33 = vshll.u32 %v4779_v40, 16  ;;  %3871 = vmatprep.subr.msk.bf16.mxu1 %vm2859_vm10, %v4011_v3 }
  0x94   : > { %v1773_v14 = vsel %vm1164_vm4, %v1768_v58, %v1772_v39  ;;  %v1970_v52 = vsel %vm1437_vm6, %v1968_v11, %v1969_v7  ;;  %v2861_v30 = vsel %vm2859_vm10, %v4011_v3, 0  ;;  %v576_v25 = vshrl.u32 %v4781_v51, 16  ;;  %v899_v43 = vld [vmem:[#allocation2 + $0x60] sm:$0xe]  ;;  %v923_v7 = vld [vmem:[#allocation2 + $0x6c] sm:$0xf] }
  0x95   : > { %v573_v38 = vsel %vm4325_vm7, %v565_v53, %v572_v5  ;;  %v2275_v16 = vshrl.u32 %v4767_v47, 16  ;;  %v579_v31 = vshll.u32 %v4781_v51, 16  ;;  %v584_v13 = vshrl.u32 %v3764_v41, 16  ;;  %3831 = vmatpush3.bf16.msra.mxu0 %v2861_v30  ;;  %3869 = vmatpush3.bf16.msra.mxu1 %v2861_v30  ;;  %v801_v5 = vld [vmem:[#allocation2 + $0x84] sm:$0xf] }
  0x96   : > { %2520 = vrot.lane.b32.xlu0 %v2479_v9, %s4173_s13  ;;  %v861_v9 = vld [vmem:[#allocation2 + $0x6c] sm:$0xf]  ;;  %797 = vst.msk [vmem:[#allocation2 + $0x7c] sm:$0xf] %vm218_vm0, %v573_v38  ;;  %v2268_v44 = vor.u32 %v2267_v20, %v2263_v19  ;;  %v2481_v53 = vrot.slane %v4774_v54, 1  ;;  %v587_v58 = vshll.u32 %v3764_v41, 16  ;;  %v4835_v51 = vpack.c.bf16 %v296_v32, %v296_v32 }
  0x97   : > { %1371 = vrot.lane.b32.xlu1 %v1260_v45, %s4169_s7  ;;  %v2277_v45 = vshll.u32 %v4767_v47, 16  ;;  %v2272_v39 = vrot.slane %v2270_v21, 1  ;;  %v578_v62 = vrot.slane %v576_v25, 7  ;;  %v586_v63 = vrot.slane %v584_v13, 7  ;;  %v4833_v24 = vld [vmem:[#allocation2 + $0x70] sm:$0xf] }
  0x98   : > { %v4830_v49 = vld [vmem:[#allocation2 + $0x74] ss:$0 sps:$4 sm:$0x11]   ;;  %v900_v3 = vld [vmem:[#allocation2 + $0x6c] sm:$0xe]  ;;  %v3677_v19 = vcombine.low %v4823_v42, %v4756_v26  ;;  %v298_v25 = vld [vmem:[%s4313_s5 + $0xc0] sm:$0xff] }
  0x99   : > { %v581_v41 = vor.u32 %v579_v31, %v578_v62  ;;  %v591_v60 = vrot.slane %v586_v63, 4  ;;  %v2273_v20 = vsel %vm1164_vm4, %v2268_v44, %v2272_v39  ;;  %v1463_v13 = vrot.slane %v4779_v40, 1  ;;  %v925_v32 = vld [vmem:[#allocation2 + $0x78] sm:$0xf] }
  0x9a   : > { %1498 = vrot.lane.b32.xlu0 %v1458_v15, %s4168_s6  ;;  %v4799_v15 = vld [vmem:[#allocation2 + $0x70] sm:$0xf]  ;;  %v593_v42 = vshrl.u32 %v4835_v51, 16  ;;  %v4873_v39 = vld [vmem:[#allocation2 + $0x74] ss:$0 sps:$4 sm:$0x11]  }
  0x9b   : > { %1500 = vrot.lane.b32.xlu1 %v1461_v34, %s4168_s6  ;;  %v2279_v34 = vrot.slane %v2277_v45, 1  ;;  %v4814_v36 = vcombine.low %v861_v9, %v4799_v15  ;;  %v4837_v45 = vpack.c.bf16 %v297_v35, %v297_v35  ;;  %v2483_v40 = vrot.slane %v3677_v19, 1  ;;  %v4901_v19 = vld [vmem:[#allocation2 + $0x80] ss:$0 sps:$4 sm:$0x11]  }
  0x9c   : > { %vm2641_vm14 = vcmask 130048   ;;  %vm2674_vm15 = vcmask 162816   ;;  %vm2707_vm2 = vcmask 195584   ;;  %vm2740_vm3 = vcmask 228352  }
  0x9d   : > { %v1276_v54 = vshll.u32 %v4814_v36, 16  ;;  %v2280_v9 = vor.u32 %v2279_v34, %v2275_v16  ;;  %v3583_v16 = vcombine.low %v900_v3, %v4799_v15  ;;  %v4868_v35 = vld [vmem:[#allocation2 + $0x7c] sm:$0xf]  ;;  %vm2773_vm5 = vcmask 261120  }
  0x9e   : > { %1610 = vrot.lane.b32.xlu0 %v4729_v55, %s4170_s8  ;;  %v4797_v55 = vld [vmem:[#allocation2 + $0x74] ss:$0 sps:$4 sm:$0x11]   ;;  %vm2826_vm10 = vcmask 293888  }
  0x9f   : > { %1612 = vrot.lane.b32.xlu1 %v4732_v61, %s4170_s8  ;;  %v1761_v61 = vsel %vm1164_vm4, %v1756_v46, %v1760_v29  ;;  %v2282_v37 = vshll.u32 %v4797_v55, 16  ;;  %v2480_v46 = vrot.slane %v3676_v2, 1  ;;  %v1266_v29 = vrot.slane %v1264_v27, 1  ;;  %v805_v2 = vld [vmem:[#allocation2 + $0x8c] sm:$0x1] }
  0xa0   : > { %v4844_v27 = vcombine.low %v923_v7, %v4833_v24  ;;  %v1278_v30 = vrot.slane %v1276_v54, 1  ;;  %v596_v7 = vshll.u32 %v4835_v51, 16  ;;  %v4882_v54 = vcombine.low %v925_v32, %v4868_v35 }
  0xa1   : > { %v4821_v11 = vpop.permute.xlu1 %1486  ;;  %v2284_v38 = vrot.slane %v2282_v37, 1  ;;  %v1267_v21 = vor.u32 %v1266_v29, %v1262_v22  ;;  %v802_v22 = vsel %vm4332_vm8, %v581_v41, %v801_v5  ;;  %v963_v37 = vld [vmem:[#allocation2 + $0x6c] sm:$0xe]  ;;  %v2482_v31 = vsel %vm1437_vm6, %v2480_v46, %v2481_v53  ;;  %v988_v41 = vld [vmem:[#allocation2 + $0x78] sm:$0xf] }
  0xa2   : > { %1882 = vrot.lane.b32.xlu0 %v1761_v61, %s4174_s22  ;;  %v3582_v61 = vcombine.low %v899_v43, %v4769_v50  ;;  %803 = vst [vmem:[#allocation2 + $0x84] sm:$0xf] %v802_v22  ;;  %v601_v29 = vshrl.u32 %v4837_v45, 16  ;;  %v2484_v46 = vrot.slane %v4797_v55, 1  ;;  %v1465_v53 = vrot.slane %v3583_v16, 1 }
  0xa3   : > { %1884 = vrot.lane.b32.xlu1 %v1773_v14, %s4174_s22  ;;  %v4828_v6 = vpop.permute.xlu0 %1357  ;;  %v582_v14 = vrot.slane %v578_v62, 4  ;;  %v2285_v34 = vsel %vm1164_vm4, %v2280_v9, %v2284_v38  ;;  %v1466_v5 = vrot.slane %v4830_v49, 1  ;;  %v3630_v3 = vcombine.low %v963_v37, %v4833_v24 }
  0xa4   : > { %v1462_v43 = vrot.slane %v3582_v61, 1  ;;  %v595_v55 = vrot.slane %v593_v42, 7  ;;  %v4892_v51 = vpack.c.bf16 %v298_v25, %v298_v25  ;;  %v1775_v61 = vshrl.u32 %v4844_v27, 16 }
  0xa5   : > { %v2485_v24 = vsel %vm1437_vm6, %v2483_v40, %v2484_v46  ;;  %v2544_v25 = vsel %vm2542_vm11, %v4318_v12, %v4828_v6  ;;  %v1974_v42 = vrot.slane %v3630_v3, 1  ;;  %v301_v12 = vld [vmem:[%s4313_s5 + $0xd8] sm:$0xff]  ;;  %v1794_v46 = vshll.u32 %v4901_v19, 16 }
  0xa6   : > { %2010 = vrot.lane.b32.xlu0 %v1970_v52, %s4172_s10  ;;  %v589_v52 = vor.u32 %v587_v58, %v586_v63  ;;  %v1777_v58 = vshll.u32 %v4844_v27, 16 }
  0xa7   : > { %2012 = vrot.lane.b32.xlu1 %v1973_v8, %s4172_s10  ;;  %v1271_v8 = vrot.slane %v1269_v33, 1  ;;  %v1274_v33 = vshrl.u32 %v4814_v36, 16 }
  0xa8   : > { %v590_v26 = vsel %vm4325_vm7, %v582_v14, %v589_v52  ;;  %v4889_v14 = vld [vmem:[#allocation2 + $0x7c] sm:$0xf]  ;;  %v1782_v52 = vshll.u32 %v4873_v39, 16 }
  0xa9   : > { %804 = vst.msk [vmem:[#allocation2 + $0x88] sm:$0xf] %vm218_vm0, %v590_v26  ;;  %v1272_v44 = vsel %vm1164_vm4, %v1267_v21, %v1271_v8  ;;  %v1279_v62 = vor.u32 %v1278_v30, %v1274_v33  ;;  %v604_v8 = vshll.u32 %v4837_v45, 16  ;;  %v598_v45 = vor.u32 %v596_v7, %v595_v55  ;;  %v964_v21 = vld [vmem:[#allocation2 + $0x78] sm:$0xe] }
  0xaa   : > { %2122 = vrot.lane.b32.xlu0 %v4759_v18, %s4171_s9  ;;  %v4850_v50 = vpop.permute.xlu1 %1600  ;;  %v806_v18 = vsel %vm4348_vm9, %v591_v60, %v805_v2  ;;  %v4896_v60 = vrot.slane %v601_v29, 7  ;;  %v808_v2 = vld [vmem:[#allocation2 + $0x90] sm:$0xf]  ;;  %v1789_v33 = vshll.u32 %v4882_v54, 16  ;;  %v4906_v16 = vcombine.low %v988_v41, %v4889_v14 }
  0xab   : > { %2124 = vrot.lane.b32.xlu1 %v4767_v47, %s4171_s9  ;;  %v1281_v47 = vshll.u32 %v4830_v49, 16  ;;  %807 = vst [vmem:[#allocation2 + $0x8c] sm:$0x1] %v806_v18  ;;  %v1779_v49 = vrot.slane %v1777_v58, 1  ;;  %v599_v26 = vrot.slane %v595_v55, 4  ;;  %v1467_v30 = vsel %vm1437_vm6, %v1465_v53, %v1466_v5  ;;  %v300_v58 = vld [vmem:[%s4313_s5 + $0xd0] sm:$0xff] }
  0xac   : > { %v4864_v15 = vpop.permute.xlu0 %1598  ;;  %v606_v37 = vor.u32 %v604_v8, %v4896_v60  ;;  %v809_v18 = vsel %vm4332_vm8, %v598_v45, %v808_v2  ;;  %v1784_v32 = vrot.slane %v1782_v52, 1  ;;  %v1975_v29 = vrot.slane %v4873_v39, 1  ;;  %v1028_v53 = vld [vmem:[#allocation2 + $0x78] sm:$0xe]  ;;  %v990_v39 = vld [vmem:[#allocation2 + $0x84] sm:$0xf] }
  0xad   : > { %v1283_v63 = vrot.slane %v1281_v47, 1  ;;  %v1464_v47 = vsel %vm1437_vm6, %v1462_v43, %v1463_v13  ;;  %810 = vst [vmem:[#allocation2 + $0x90] sm:$0xf] %v809_v18  ;;  %v3631_v13 = vcombine.low %v964_v21, %v4868_v35  ;;  %v1787_v43 = vshrl.u32 %v4882_v54, 16  ;;  %v863_v52 = vld [vmem:[#allocation2 + $0x78] sm:$0xf] }
  0xae   : > { %2394 = vrot.lane.b32.xlu0 %v2273_v20, %s4175_s23  ;;  %v607_v40 = vsel %vm4325_vm7, %v599_v26, %v606_v37  ;;  %v1791_v6 = vrot.slane %v1789_v33, 1  ;;  %v2289_v7 = vshll.u32 %v4906_v16, 16  ;;  %v4942_v55 = vpack.c.bf16 %v300_v58, %v300_v58 }
  0xaf   : > { %2396 = vrot.lane.b32.xlu1 %v2285_v34, %s4175_s23  ;;  %v1284_v20 = vsel %vm1164_vm4, %v1279_v62, %v1283_v63  ;;  %811 = vst.msk [vmem:[#allocation2 + $0x94] sm:$0xf] %vm218_vm0, %v607_v40  ;;  %v812_v62 = vld [vmem:[#allocation2 + $0x98] sm:$0x1]  ;;  %v610_v63 = vshrl.u32 %v4892_v51, 16  ;;  %v2577_v8 = vsel %vm2575_vm12, %v2544_v25, %v4821_v11  ;;  %v4949_v2 = vpack.c.bf16 %v301_v12, %v301_v12 }
  0xb0   : > { %v4886_v38 = vpop.permute.xlu0 %2110  ;;  %v4938_v3 = vld [vmem:[#allocation2 + $0x88] sm:$0xf]  ;;  %v1978_v45 = vrot.slane %v4901_v19, 1  ;;  %v4957_v11 = vld [vmem:[#allocation2 + $0x7c] sm:$0xf]  ;;  %v608_v21 = vrot.slane %v4896_v60, 4  ;;  %v1792_v33 = vor.u32 %v1791_v6, %v1787_v43  ;;  %v2610_v58 = vsel %vm2608_vm13, %v2577_v8, %v4864_v15 }
  0xb1   : > { %v4884_v9 = vpop.permute.xlu1 %2112  ;;  %v1796_v26 = vrot.slane %v1794_v46, 1  ;;  %v4961_v37 = vcombine.low %v990_v39, %v4938_v3  ;;  %v2287_v25 = vshrl.u32 %v4906_v16, 16  ;;  %v612_v60 = vrot.slane %v610_v63, 7 }
  0xb2   : > { %2522 = vrot.lane.b32.xlu0 %v2482_v31, %s4173_s13  ;;  %v1780_v31 = vor.u32 %v1779_v49, %v1775_v61  ;;  %v4947_v49 = vld [vmem:[#allocation2 + $0x80] ss:$0 sps:$4 sm:$0x11]   ;;  %v4983_v43 = vld [vmem:[#allocation2 + $0x8c] ss:$0 sps:$4 sm:$0x11]  }
  0xb3   : > { %1373 = vrot.lane.b32.xlu1 %v1272_v44, %s4169_s7  ;;  %v299_v44 = vld [vmem:[%s4313_s5 + $0xc8] sm:$0xff]  ;;  %v1797_v12 = vsel %vm1164_vm4, %v1792_v33, %v1796_v26  ;;  %v616_v39 = vrot.slane %v612_v60, 4  ;;  %v2306_v33 = vshll.u32 %v4983_v43, 16  ;;  %v927_v26 = vld [vmem:[#allocation2 + $0x84] sm:$0xf] }
  0xb4   : > { %v4908_v22 = vpop.permute.xlu0 %1998  ;;  %v4940_v41 = vpack.c.bf16 %v299_v44, %v299_v44  ;;  %v1785_v61 = vsel %vm1164_vm4, %v1780_v31, %v1784_v32  ;;  %v2291_v31 = vrot.slane %v2289_v7, 1  ;;  %v813_v32 = vsel %vm4348_vm9, %v608_v21, %v812_v62  ;;  %v865_v7 = vld [vmem:[#allocation2 + $0x84] sm:$0xf]  ;;  %v4992_v62 = vld [vmem:[#allocation2 + $0x88] sm:$0xf] }
  0xb5   : > { %v4910_v34 = vpop.permute.xlu1 %1488  ;;  %v4973_v44 = vcombine.low %v863_v52, %v4957_v11  ;;  %814 = vst [vmem:[#allocation2 + $0x98] sm:$0x1] %v813_v32  ;;  %v2299_v52 = vshrl.u32 %v4961_v37, 16 }
  0xb6   : > { %2524 = vrot.lane.b32.xlu0 %v2485_v24, %s4173_s13  ;;  %v1977_v24 = vrot.slane %v3631_v13, 1  ;;  %v621_v40 = vshll.u32 %v4940_v41, 16 }
  0xb7   : > { %1375 = vrot.lane.b32.xlu1 %v1284_v20, %s4169_s7  ;;  %v4955_v20 = vsel %vm1437_vm6, %v1974_v42, %v1975_v29  ;;  %v2294_v42 = vshll.u32 %v4947_v49, 16  ;;  %v618_v29 = vshrl.u32 %v4940_v41, 16 }
  0xb8   : > { %v4934_v35 = vpop.permute.xlu0 %2510  ;;  %v1979_v13 = vsel %vm1437_vm6, %v1977_v24, %v1978_v45  ;;  %v1288_v45 = vshll.u32 %v4973_v44, 16 }
  0xb9   : > { %v4936_v5 = vpop.permute.xlu1 %2000  ;;  %v620_v41 = vrot.slane %v618_v29, 7  ;;  %v2296_v24 = vrot.slane %v2294_v42, 1  ;;  %v819_v42 = vld [vmem:[#allocation2 + $0xa4] sm:$0x1] }
  0xba   : > { %1502 = vrot.lane.b32.xlu0 %v1464_v47, %s4168_s6  ;;  %v4964_v47 = vld [vmem:[#allocation2 + $0x80] ss:$0 sps:$4 sm:$0x11]  }
  0xbb   : > { %1504 = vrot.lane.b32.xlu1 %v1467_v30, %s4168_s6  ;;  %v3678_v30 = vcombine.low %v1028_v53, %v4889_v14  ;;  %v613_v14 = vshll.u32 %v4892_v51, 16  ;;  %v2301_v51 = vshll.u32 %v4961_v37, 16  ;;  %v1293_v15 = vshll.u32 %v4964_v47, 16 }
  0xbc   : > { %v4966_v18 = vpop.permute.xlu0 %2512 }
  0xbd   : > { %v1873_v19 = vpop.permute.xlu1 %1872  ;;  %v4990_v6 = vrot.slane %v3678_v30, 1  ;;  %v615_v63 = vor.u32 %v613_v14, %v612_v60  ;;  %v5003_v30 = vld [vmem:[#allocation2 + $0x88] sm:$0xf]  ;;  %v2303_v32 = vrot.slane %v2301_v51, 1  ;;  %v5010_v60 = vcombine.low %v865_v7, %v4992_v62  ;;  %v5022_v7 = vld [vmem:[#allocation2 + $0x84] sm:$0xe] }
  0xbe   : > { %1614 = vrot.lane.b32.xlu0 %v4844_v27, %s4170_s8  ;;  %v2292_v27 = vor.u32 %v2291_v31, %v2287_v25  ;;  %v623_v25 = vor.u32 %v621_v40, %v620_v41  ;;  %v1286_v40 = vshrl.u32 %v4973_v44, 16 }
  0xbf   : > { %1616 = vrot.lane.b32.xlu1 %v4882_v54, %s4170_s8  ;;  %v815_v54 = vld [vmem:[#allocation2 + $0x9c] sm:$0xf] }
  0xc0   : > { %v1360_v53 = vpop.permute.xlu0 %1359 }
  0xc1   : > { %v2385_v46 = vpop.permute.xlu1 %2384  ;;  %v2546_v8 = vsel %vm2542_vm11, %v4391_v48, %v1360_v53  ;;  %v816_v48 = vsel %vm4332_vm8, %v615_v63, %v815_v54  ;;  %v5017_v53 = vrot.slane %v1293_v15, 1  ;;  %v901_v54 = vld [vmem:[#allocation2 + $0x78] sm:$0xe] }
  0xc2   : > { %v2579_v21 = vsel %vm2575_vm12, %v2546_v8, %v4910_v34  ;;  %1886 = vrot.lane.b32.xlu0 %v1785_v61, %s4174_s22  ;;  %817 = vst [vmem:[#allocation2 + $0x9c] sm:$0xf] %v816_v48  ;;  %v625_v34 = vrot.slane %v620_v41, 4  ;;  %v302_v61 = vld [vmem:[%s4313_s5 + $0xe0] sm:$0xff]  ;;  %v1290_v41 = vrot.slane %v1288_v45, 1  ;;  %v2297_v48 = vsel %vm1164_vm4, %v2292_v27, %v2296_v24 }
  0xc3   : > { %1888 = vrot.lane.b32.xlu1 %v1797_v12, %s4174_s22  ;;  %v2612_v31 = vsel %vm2608_vm13, %v2579_v21, %v4850_v50  ;;  %v624_v50 = vsel %vm4325_vm7, %v616_v39, %v623_v25  ;;  %v2308_v39 = vrot.slane %v2306_v33, 1  ;;  %v5037_v8 = vld [vmem:[#allocation2 + $0x8c] ss:$0 sps:$4 sm:$0x11]   ;;  %v2304_v21 = vor.u32 %v2303_v32, %v2299_v52  ;;  %v5044_v25 = vld [vmem:[#allocation2 + $0x94] sm:$0xf] }
  0xc4   : > { %v2645_v14 = vsel %vm2641_vm14, %v2612_v31, %v1873_v19  ;;  %v1871_v12 = vpop.permute.xlu0 %1870  ;;  %v5027_v19 = vcombine.low %v927_v26, %v5003_v30  ;;  %818 = vst.msk [vmem:[#allocation2 + $0xa0] sm:$0xf] %vm218_vm0, %v624_v50  ;;  %v1300_v26 = vshll.u32 %v5010_v60, 16  ;;  %v2487_v31 = vrot.slane %v4947_v49, 1  ;;  %v992_v27 = vld [vmem:[#allocation2 + $0x90] sm:$0xf] }
  0xc5   : > { %v5014_v29 = vpop.permute.xlu1 %1361  ;;  %v2643_v51 = vsel %vm2641_vm14, %v2610_v58, %v1871_v12  ;;  %v2678_v63 = vsel %vm2674_vm15, %v2645_v14, %v4936_v5  ;;  %v5039_v5 = vpack.c.bf16 %v302_v61, %v302_v61  ;;  %v902_v61 = vld [vmem:[#allocation2 + $0x84] sm:$0xe]  ;;  %v3679_v32 = vcombine.low %v5022_v7, %v4938_v3  ;;  %v5058_v12 = vld [vmem:[#allocation2 + $0x8c] ss:$0 sps:$4 sm:$0x11]  }
  0xc6   : > { %v2676_v15 = vsel %vm2674_vm15, %v2643_v51, %v4908_v22  ;;  %2014 = vrot.lane.b32.xlu0 %v4955_v20, %s4172_s10  ;;  %v2711_v58 = vsel %vm2707_vm2, %v2678_v63, %v4884_v9  ;;  %v929_v22 = vld [vmem:[#allocation2 + $0x90] sm:$0xf]  ;;  %v820_v20 = vsel %vm4348_vm9, %v625_v34, %v819_v42  ;;  %v1291_v14 = vor.u32 %v1290_v41, %v1286_v40  ;;  %v965_v34 = vld [vmem:[#allocation2 + $0x84] sm:$0xe]  ;;  %v5071_v24 = vld [vmem:[#allocation2 + $0x94] sm:$0xf] }
  0xc7   : > { %2016 = vrot.lane.b32.xlu1 %v1979_v13, %s4172_s10  ;;  %v2709_v45 = vsel %vm2707_vm2, %v2676_v15, %v4886_v38  ;;  %v2744_v33 = vsel %vm2740_vm3, %v2711_v58, %v2385_v46  ;;  %v3584_v38 = vcombine.low %v901_v54, %v4957_v11  ;;  %821 = vst [vmem:[#allocation2 + $0xa4] sm:$0x1] %v820_v20  ;;  %v1801_v42 = vshll.u32 %v5027_v19, 16  ;;  %v303_v41 = vld [vmem:[%s4313_s5 + $0xe8] sm:$0xff]  ;;  %v966_v15 = vld [vmem:[#allocation2 + $0x90] sm:$0xe] }
  0xc8   : > { %v2383_v9 = vpop.permute.xlu0 %2382  ;;  %v1298_v11 = vshrl.u32 %v5010_v60, 16  ;;  %v1305_v46 = vshll.u32 %v5037_v8, 16  ;;  %v5069_v3 = vcombine.low %v929_v22, %v5044_v25  ;;  %v3585_v40 = vcombine.low %v902_v61, %v4992_v62  ;;  %v4028_v22 = vld [vmem:[#allocation2 + $0x98] ss:$0 sps:$4 sm:$0x11]  }
  0xc9   : > { %v5048_v13 = vpop.permute.xlu1 %1363  ;;  %v2742_v52 = vsel %vm2740_vm3, %v2709_v45, %v2383_v9  ;;  %v2488_v51 = vsel %vm1437_vm6, %v4990_v6, %v2487_v31  ;;  %v1468_v7 = vrot.slane %v3584_v38, 1  ;;  %v1469_v63 = vrot.slane %v4964_v47, 1  ;;  %v305_v61 = vld [vmem:[%s4313_s5 + $0xf8] sm:$0xff] }
  0xca   : > { %2126 = vrot.lane.b32.xlu0 %v4906_v16, %s4171_s9  ;;  %v2775_v49 = vsel %vm2773_vm5, %v2742_v52, %v4934_v35  ;;  %v2309_v16 = vsel %vm1164_vm4, %v2304_v21, %v2308_v39  ;;  %v1302_v35 = vrot.slane %v1300_v26, 1  ;;  %v1799_v58 = vshrl.u32 %v5027_v19, 16  ;;  %v304_v21 = vld [vmem:[%s4313_s5 + $0xf0] sm:$0xff] }
  0xcb   : > { %2128 = vrot.lane.b32.xlu1 %v4961_v37, %s4171_s9  ;;  %3832 = vmatprep.mubr.msk.bf16.mxu0 %vm2826_vm10, %v2775_v49  ;;  %v2777_v37 = vsel %vm2773_vm5, %v2744_v33, %v4966_v18  ;;  %v3632_v18 = vcombine.low %v965_v34, %v5003_v30  ;;  %v1803_v62 = vrot.slane %v1801_v42, 1  ;;  %v1806_v39 = vshll.u32 %v5058_v12, 16 }
  0xcc   : > { %3833 = vmatmul.mubr.msk.bf16.vlgmr.msra.gmra.mrb[0].mxu0 %vm2826_vm10, %v2777_v37  ;;  %v5081_v50 = vpop.permute.xlu0 %1490  ;;  %v5091_v45 = vcombine.low %v992_v27, %v5071_v24  ;;  %v1296_v47 = vsel %vm1164_vm4, %v1291_v14, %v5017_v53  ;;  %v2489_v6 = vrot.slane %v3679_v32, 1  ;;  %v2490_v30 = vrot.slane %v4983_v43, 1  ;;  %v5108_v32 = vld [vmem:[#allocation2 + $0x90] sm:$0xe] }
  0xcd   : > { %v5078_v54 = vpop.permute.xlu1 %1492  ;;  %v1813_v26 = vshll.u32 %v5069_v3, 16  ;;  %v1303_v20 = vor.u32 %v1302_v35, %v1298_v11  ;;  %v1307_v9 = vrot.slane %v1305_v46, 1  ;;  %v1471_v33 = vrot.slane %v3585_v40, 1  ;;  %v867_v11 = vld [vmem:[#allocation2 + $0x90] sm:$0xf] }
  0xce   : > { %2398 = vrot.lane.b32.xlu0 %v2297_v48, %s4175_s23  ;;  %v1472_v31 = vrot.slane %v5037_v8, 1  ;;  %v3633_v48 = vcombine.low %v966_v15, %v5044_v25  ;;  %v1980_v34 = vrot.slane %v3632_v18, 1  ;;  %v1981_v53 = vrot.slane %v5058_v12, 1  ;;  %v5118_v12 = vld [vmem:[#allocation2 + $0x94] sm:$0xf] }
  0xcf   : > { %2400 = vrot.lane.b32.xlu1 %v2309_v16, %s4175_s23  ;;  %v5110_v43 = vpack.c.bf16 %v303_v41, %v303_v41  ;;  %v1804_v14 = vor.u32 %v1803_v62, %v1799_v58  ;;  %v1808_v42 = vrot.slane %v1806_v39, 1  ;;  %v2313_v49 = vshll.u32 %v5091_v45, 16  ;;  %v994_v41 = vld [vmem:[#allocation2 + $0x9c] sm:$0xf]  ;;  %v5126_v15 = vld [vmem:[#allocation2 + $0xa0] sm:$0xf] }
  0xd0   : > { %v5104_v52 = vpop.permute.xlu0 %1602  ;;  %v5113_v8 = vpack.c.bf16 %v304_v21, %v304_v21  ;;  %v1811_v25 = vshrl.u32 %v5069_v3, 16  ;;  %v1815_v46 = vrot.slane %v1813_v26, 1  ;;  %v1818_v27 = vshll.u32 %v4028_v22, 16 }
  0xd1   : > { %v5102_v38 = vpop.permute.xlu1 %1604  ;;  %v5120_v37 = vpack.c.bf16 %v305_v61, %v305_v61  ;;  %v1308_v16 = vsel %vm1164_vm4, %v1303_v20, %v1307_v9  ;;  %v2491_v35 = vsel %vm1437_vm6, %v2489_v6, %v2490_v30  ;;  %v1473_v40 = vsel %vm1437_vm6, %v1471_v33, %v1472_v31  ;;  %v5137_v6 = vld [vmem:[#allocation2 + $0x98] ss:$0 sps:$4 sm:$0x11]  }
  0xd2   : > { %2526 = vrot.lane.b32.xlu0 %v2488_v51, %s4173_s13  ;;  %v1470_v18 = vsel %vm1437_vm6, %v1468_v7, %v1469_v63  ;;  %v1983_v62 = vrot.slane %v3633_v48, 1  ;;  %v1984_v39 = vrot.slane %v4028_v22, 1  ;;  %v5133_v21 = vsel %vm1437_vm6, %v1980_v34, %v1981_v53 }
  0xd3   : > { %1377 = vrot.lane.b32.xlu1 %v1296_v47, %s4169_s7  ;;  %v3680_v47 = vcombine.low %v5108_v32, %v5071_v24  ;;  %v5140_v30 = vsel %vm1164_vm4, %v1804_v14, %v1808_v42  ;;  %v2311_v7 = vshrl.u32 %v5091_v45, 16  ;;  %v2315_v63 = vrot.slane %v2313_v49, 1 }
  0xd4   : > { %v5130_v58 = vpop.permute.xlu0 %1874  ;;  %v5144_v26 = vcombine.low %v867_v11, %v5118_v12  ;;  %v1816_v22 = vor.u32 %v1815_v46, %v1811_v25  ;;  %v1820_v20 = vrot.slane %v1818_v27, 1  ;;  %v5149_v9 = vcombine.low %v994_v41, %v5126_v15  ;;  %v826_v27 = vld [vmem:[#allocation2 + $0xb0] sm:$0x1] }
  0xd5   : > { %v5128_v51 = vpop.permute.xlu1 %1876  ;;  %v627_v33 = vshrl.u32 %v4942_v55, 16  ;;  %v2548_v31 = vsel %vm2542_vm11, %v4407_v4, %v5014_v29  ;;  %v630_v61 = vshll.u32 %v4942_v55, 16  ;;  %v635_v48 = vshrl.u32 %v4949_v2, 16  ;;  %v822_v4 = vld [vmem:[#allocation2 + $0xa8] sm:$0xf] }
  0xd6   : > { %2528 = vrot.lane.b32.xlu0 %v2491_v35, %s4173_s13  ;;  %v638_v34 = vshll.u32 %v4949_v2, 16  ;;  %v2550_v53 = vsel %vm2542_vm11, %v4440_v57, %v5048_v13  ;;  %v5164_v49 = vsel %vm1437_vm6, %v1983_v62, %v1984_v39  ;;  %v2318_v11 = vshll.u32 %v5137_v6, 16  ;;  %v5175_v35 = vld [vmem:[#allocation2 + $0xa0] sm:$0xf] }
  0xd7   : > { %1379 = vrot.lane.b32.xlu1 %v1308_v16, %s4169_s7  ;;  %v629_v25 = vrot.slane %v627_v33, 7  ;;  %v5167_v29 = vor.u32 %v2315_v63, %v2311_v7  ;;  %v1310_v55 = vshrl.u32 %v5144_v26, 16  ;;  %v1312_v2 = vshll.u32 %v5144_v26, 16  ;;  %v869_v16 = vld [vmem:[#allocation2 + $0x9c] sm:$0xf] }
  0xd8   : > { %v2003_v42 = vpop.permute.xlu0 %2002  ;;  %v637_v46 = vrot.slane %v635_v48, 7  ;;  %v1821_v57 = vsel %vm1164_vm4, %v1816_v22, %v1820_v20  ;;  %v2325_v13 = vshll.u32 %v5149_v9, 16  ;;  %v2583_v39 = vsel %vm2575_vm12, %v2550_v53, %v5078_v54 }
  0xd9   : > { %v5161_v14 = vpop.permute.xlu1 %2004  ;;  %v632_v41 = vor.u32 %v630_v61, %v629_v25  ;;  %v633_v62 = vrot.slane %v629_v25, 4  ;;  %v644_v33 = vshrl.u32 %v5039_v5, 16  ;;  %v647_v48 = vshll.u32 %v5039_v5, 16  ;;  %v5188_v25 = vld [vmem:[#allocation2 + $0xa4] ss:$0 sps:$4 sm:$0x11]  }
  0xda   : > { %1506 = vrot.lane.b32.xlu0 %v1470_v18, %s4168_s6  ;;  %v640_v7 = vor.u32 %v638_v34, %v637_v46  ;;  %v642_v63 = vrot.slane %v637_v46, 4  ;;  %v652_v61 = vshrl.u32 %v5110_v43, 16  ;;  %v2323_v54 = vshrl.u32 %v5149_v9, 16 }
  0xdb   : > { %1508 = vrot.lane.b32.xlu1 %v1473_v40, %s4168_s6  ;;  %v2581_v40 = vsel %vm2575_vm12, %v2548_v31, %v5081_v50  ;;  %v823_v20 = vsel %vm4332_vm8, %v632_v41, %v822_v4  ;;  %v5192_v34 = vcombine.low %v869_v16, %v5175_v35  ;;  %v2327_v5 = vrot.slane %v2325_v13, 1  ;;  %v829_v16 = vld [vmem:[#allocation2 + $0xb4] sm:$0xf] }
  0xdc   : > { %v2115_v22 = vpop.permute.xlu0 %2114  ;;  %v641_v50 = vsel %vm4325_vm7, %v633_v62, %v640_v7  ;;  %824 = vst [vmem:[#allocation2 + $0xa8] sm:$0xf] %v823_v20  ;;  %v827_v31 = vsel %vm4348_vm9, %v642_v63, %v826_v27  ;;  %v2614_v53 = vsel %vm2608_vm13, %v2581_v40, %v5104_v52  ;;  %v646_v4 = vrot.slane %v644_v33, 7  ;;  %v833_v62 = vld [vmem:[#allocation2 + $0xbc] sm:$0x1] }
  0xdd   : > { %v5182_v18 = vpop.permute.xlu1 %2116  ;;  %825 = vst.msk [vmem:[#allocation2 + $0xac] sm:$0xf] %vm218_vm0, %v641_v50  ;;  %828 = vst [vmem:[#allocation2 + $0xb0] sm:$0x1] %v827_v31  ;;  %v654_v46 = vrot.slane %v652_v61, 7  ;;  %v655_v41 = vshll.u32 %v5110_v43, 16  ;;  %v2647_v33 = vsel %vm2641_vm14, %v2614_v53, %v5130_v58 }
  0xde   : > { %1618 = vrot.lane.b32.xlu0 %v5027_v19, %s4170_s8  ;;  %v661_v27 = vshrl.u32 %v5113_v8, 16  ;;  %v664_v52 = vshll.u32 %v5113_v8, 16  ;;  %v669_v7 = vshrl.u32 %v5120_v37, 16  ;;  %v649_v40 = vor.u32 %v647_v48, %v646_v4  ;;  %v5213_v43 = vld [vmem:[#allocation2 + $0x98] ss:$0 sps:$4 sm:$0x11]  }
  0xdf   : > { %1620 = vrot.lane.b32.xlu1 %v5069_v3, %s4170_s8  ;;  %v650_v19 = vrot.slane %v646_v4, 4  ;;  %v659_v13 = vrot.slane %v654_v46, 4  ;;  %v672_v20 = vshll.u32 %v5120_v37, 16  ;;  %v2330_v61 = vshll.u32 %v5188_v25, 16  ;;  %v836_v53 = vld [vmem:[#allocation2 + $0xc0] sm:$0xf] }
  0xe0   : > { %v2387_v63 = vpop.permute.xlu0 %2386  ;;  %v657_v50 = vor.u32 %v655_v41, %v654_v46  ;;  %v663_v31 = vrot.slane %v661_v27, 7  ;;  %v2680_v8 = vsel %vm2674_vm15, %v2647_v33, %v2003_v42  ;;  %v830_v48 = vsel %vm4332_vm8, %v649_v40, %v829_v16 }
  0xe1   : > { %v2389_v3 = vpop.permute.xlu1 %2388  ;;  %v834_v37 = vsel %vm4348_vm9, %v659_v13, %v833_v62  ;;  %v671_v58 = vrot.slane %v669_v7, 7  ;;  %v2713_v4 = vsel %vm2707_vm2, %v2680_v8, %v2115_v22  ;;  %831 = vst [vmem:[#allocation2 + $0xb4] sm:$0xf] %v830_v48  ;;  %v2320_v62 = vrot.slane %v2318_v11, 1  ;;  %v1031_v11 = vld [vmem:[#allocation2 + $0x9c] sm:$0xe] }
  0xe2   : > { %1890 = vrot.lane.b32.xlu0 %v5140_v30, %s4174_s22  ;;  %v658_v46 = vsel %vm4325_vm7, %v650_v19, %v657_v50  ;;  %835 = vst [vmem:[#allocation2 + $0xbc] sm:$0x1] %v834_v37  ;;  %v666_v42 = vor.u32 %v664_v52, %v663_v31  ;;  %v2616_v30 = vsel %vm2608_vm13, %v2583_v39, %v5102_v38  ;;  %v1317_v40 = vshll.u32 %v5213_v43, 16  ;;  %v5252_v13 = vld [vmem:[#allocation2 + $0xa4] ss:$0 sps:$4 sm:$0x11]  }
  0xe3   : > { %1892 = vrot.lane.b32.xlu1 %v1821_v57, %s4174_s22  ;;  %v667_v57 = vrot.slane %v663_v31, 4  ;;  %v2746_v41 = vsel %vm2740_vm3, %v2713_v4, %v2387_v63  ;;  %832 = vst.msk [vmem:[#allocation2 + $0xb8] sm:$0xf] %vm218_vm0, %v658_v46  ;;  %v674_v22 = vor.u32 %v672_v20, %v671_v58  ;;  %v2649_v7 = vsel %vm2641_vm14, %v2616_v30, %v5128_v51  ;;  %v840_v20 = vld [vmem:[#allocation2 + $0xc8] sm:$0x1] }
  0xe4   : > { %v2515_v27 = vpop.permute.xlu0 %2514  ;;  %v837_v38 = vsel %vm4332_vm8, %v666_v42, %v836_v53  ;;  %v2682_v39 = vsel %vm2674_vm15, %v2649_v7, %v5161_v14  ;;  %v2328_v63 = vor.u32 %v2327_v5, %v2323_v54  ;;  %v1314_v51 = vrot.slane %v1312_v2, 1  ;;  %v903_v50 = vld [vmem:[#allocation2 + $0x90] sm:$0xe]  ;;  %v904_v48 = vld [vmem:[#allocation2 + $0x9c] sm:$0xe] }
  0xe5   : > { %v5229_v16 = vpop.permute.xlu1 %1365  ;;  %v2779_v52 = vsel %vm2773_vm5, %v2746_v41, %v2515_v27  ;;  %v1324_v19 = vshll.u32 %v5192_v34, 16  ;;  %838 = vst [vmem:[#allocation2 + $0xc0] sm:$0xf] %v837_v38  ;;  %v2715_v28 = vsel %vm2707_vm2, %v2682_v39, %v5182_v18  ;;  %v2332_v14 = vrot.slane %v2330_v61, 1  ;;  %v933_v37 = vld [vmem:[#allocation2 + $0xa8] sm:$0xf] }
  0xe6   : > { %2018 = vrot.lane.b32.xlu0 %v5133_v21, %s4172_s10  ;;  %3836 = vmatprep.mubr.msk.bf16.mxu0 %vm2826_vm10, %v2779_v52  ;;  %v676_v21 = vrot.slane %v671_v58, 4  ;;  %v2748_v54 = vsel %vm2740_vm3, %v2715_v28, %v2389_v3  ;;  %v2321_v18 = vsel %vm1164_vm4, %v5167_v29, %v2320_v62  ;;  %v2492_v61 = vrot.slane %v3680_v47, 1  ;;  %v931_v47 = vld [vmem:[#allocation2 + $0x9c] sm:$0xf]  ;;  %v5286_v58 = vld [vmem:[#allocation2 + $0xac] sm:$0xf] }
  0xe7   : > { %2020 = vrot.lane.b32.xlu1 %v5164_v49, %s4172_s10  ;;  %v675_v49 = vsel %vm4325_vm7, %v667_v57, %v674_v22  ;;  %v2493_v23 = vrot.slane %v5137_v6, 1  ;;  %v3681_v3 = vcombine.low %v1031_v11, %v5126_v15  ;;  %v1315_v31 = vor.u32 %v1314_v51, %v1310_v55  ;;  %v5278_v6 = vld [vmem:[#allocation2 + $0xa0] sm:$0xf]  ;;  %v4045_v38 = vld [vmem:[#allocation2 + $0xa4] ss:$0 sps:$4 sm:$0x11]  }
  0xe8   : > { %v2517_v2 = vpop.permute.xlu0 %2516  ;;  %839 = vst.msk [vmem:[#allocation2 + $0xc4] sm:$0xf] %vm218_vm0, %v675_v49  ;;  %v1319_v8 = vrot.slane %v1317_v40, 1  ;;  %v1322_v29 = vshrl.u32 %v5192_v34, 16  ;;  %v2333_v24 = vsel %vm1164_vm4, %v2328_v63, %v2332_v14  ;;  %v1326_v32 = vrot.slane %v1324_v19, 1 }
  0xe9   : > { %v5257_v5 = vpop.permute.xlu1 %1367  ;;  %v2781_v33 = vsel %vm2773_vm5, %v2748_v54, %v2517_v2  ;;  %v1329_v15 = vshll.u32 %v5252_v13, 16  ;;  %v2494_v53 = vsel %vm1437_vm6, %v2492_v61, %v2493_v23  ;;  %v3586_v4 = vcombine.low %v903_v50, %v5118_v12  ;;  %v5307_v11 = vld [vmem:[#allocation2 + $0xb0] ss:$0 sps:$4 sm:$0x11]   ;;  %v967_v28 = vld [vmem:[#allocation2 + $0x9c] sm:$0xe] }
  0xea   : > { %2130 = vrot.lane.b32.xlu0 %v5091_v45, %s4171_s9  ;;  %3837 = vmatmul.mubr.msk.bf16.gmra.mrb[4].mxu0 %vm2826_vm10, %v2781_v33  ;;  %v841_v45 = vsel %vm4348_vm9, %v676_v21, %v840_v20  ;;  %v1320_v46 = vsel %vm1164_vm4, %v1315_v31, %v1319_v8  ;;  %v2495_v56 = vrot.slane %v3681_v3, 1  ;;  %v3587_v42 = vcombine.low %v904_v48, %v5175_v35  ;;  %v968_v54 = vld [vmem:[#allocation2 + $0xa8] sm:$0xe]  ;;  %v5316_v23 = vld [vmem:[#allocation2 + $0xac] sm:$0xf] }
  0xeb   : > { %2132 = vrot.lane.b32.xlu1 %v5149_v9, %s4171_s9  ;;  %842 = vst [vmem:[#allocation2 + $0xc8] sm:$0x1] %v841_v45  ;;  %v3602_v57 = vcombine.low %v931_v47, %v5278_v6  ;;  %v1327_v30 = vor.u32 %v1326_v32, %v1322_v29  ;;  %v1331_v41 = vrot.slane %v1329_v15, 1  ;;  %v2496_v27 = vrot.slane %v5188_v25, 1  ;;  %v996_v2 = vld [vmem:[#allocation2 + $0xa8] sm:$0xf] }
  0xec   : > { %v5284_v55 = vpop.permute.xlu0 %1494  ;;  %v3603_v62 = vcombine.low %v933_v37, %v5286_v58  ;;  %v1475_v7 = vrot.slane %v5213_v43, 1  ;;  %v1477_v52 = vrot.slane %v3587_v42, 1  ;;  %v1478_v35 = vrot.slane %v5252_v13, 1  ;;  %v998_v8 = vld [vmem:[#allocation2 + $0xb4] sm:$0xf] }
  0xed   : > { %v5282_v9 = vpop.permute.xlu1 %1496  ;;  %v1474_v40 = vrot.slane %v3586_v4, 1  ;;  %v1332_v39 = vsel %vm1164_vm4, %v1327_v30, %v1331_v41  ;;  %v2497_v25 = vsel %vm1437_vm6, %v2495_v56, %v2496_v27  ;;  %v1825_v51 = vshll.u32 %v3602_v57, 16  ;;  %v5321_v29 = vld [vmem:[#allocation2 + $0xb8] sm:$0xf] }
  0xee   : > { %2402 = vrot.lane.b32.xlu0 %v2321_v18, %s4175_s23  ;;  %v1837_v63 = vshll.u32 %v3603_v62, 16  ;;  %v1479_v14 = vsel %vm1437_vm6, %v1477_v52, %v1478_v35  ;;  %v1823_v49 = vshrl.u32 %v3602_v57, 16  ;;  %v1830_v21 = vshll.u32 %v4045_v38, 16  ;;  %v5335_v41 = vld [vmem:[#allocation2 + $0xb0] ss:$0 sps:$4 sm:$0x11]  }
  0xef   : > { %2404 = vrot.lane.b32.xlu1 %v2333_v24, %s4175_s23  ;;  %v1476_v13 = vsel %vm1437_vm6, %v1474_v40, %v1475_v7  ;;  %v1835_v20 = vshrl.u32 %v3603_v62, 16  ;;  %v1842_v18 = vshll.u32 %v5307_v11, 16  ;;  %v1827_v61 = vrot.slane %v1825_v51, 1  ;;  %v5342_v7 = vld [vmem:[#allocation2 + $0xbc] ss:$0 sps:$4 sm:$0x11]  }
  0xf0   : > { %v5299_v12 = vpop.permute.xlu0 %1606  ;;  %v1839_v33 = vrot.slane %v1837_v63, 1  ;;  %v3634_v31 = vcombine.low %v967_v28, %v5278_v6  ;;  %v3635_v48 = vcombine.low %v968_v54, %v5286_v58  ;;  %v1832_v24 = vrot.slane %v1830_v21, 1  ;;  %v871_v6 = vld [vmem:[#allocation2 + $0xa8] sm:$0xf]  ;;  %v5360_v51 = vld [vmem:[#allocation2 + $0xb8] sm:$0xf] }
  0xf1   : > { %v5297_v22 = vpop.permute.xlu1 %1608  ;;  %v5327_v32 = vcombine.low %v996_v2, %v5316_v23  ;;  %v1844_v47 = vrot.slane %v1842_v18, 1  ;;  %v1828_v45 = vor.u32 %v1827_v61, %v1823_v49  ;;  %v5330_v37 = vcombine.low %v998_v8, %v5321_v29  ;;  %v5371_v54 = vld [vmem:[#allocation2 + $0xb0] ss:$0 sps:$4 sm:$0x11]  }
  0xf2   : > { %2530 = vrot.lane.b32.xlu0 %v2494_v53, %s4173_s13  ;;  %v1840_v15 = vor.u32 %v1839_v33, %v1835_v20  ;;  %v5332_v53 = vld [vmem:[#allocation2 + $0xac] sm:$0xf]  ;;  %v1986_v58 = vrot.slane %v3634_v31, 1  ;;  %v1987_v56 = vrot.slane %v4045_v38, 1  ;;  %v1989_v42 = vrot.slane %v3635_v48, 1 }
  0xf3   : > { %1381 = vrot.lane.b32.xlu1 %v1320_v46, %s4169_s7  ;;  %v1990_v30 = vrot.slane %v5307_v11, 1  ;;  %v2552_v27 = vsel %vm2542_vm11, %v4541_v1, %v5229_v16  ;;  %v2337_v52 = vshll.u32 %v5327_v32, 16  ;;  %v5346_v35 = vcombine.low %v871_v6, %v5332_v53 }
  0xf4   : > { %v1879_v43 = vpop.permute.xlu0 %1878  ;;  %v2585_v40 = vsel %vm2575_vm12, %v2552_v27, %v5284_v55  ;;  %v1845_v38 = vsel %vm1164_vm4, %v1840_v15, %v1844_v47  ;;  %v2349_v1 = vshll.u32 %v5330_v37, 16  ;;  %v2554_v16 = vsel %vm2542_vm11, %v4564_v17, %v5257_v5  ;;  %v873_v55 = vld [vmem:[#allocation2 + $0xb4] sm:$0xf]  ;;  %v1032_v5 = vld [vmem:[#allocation2 + $0xa8] sm:$0xe] }
  0xf5   : > { %v5309_v19 = vpop.permute.xlu1 %1880  ;;  %v1988_v11 = vsel %vm1437_vm6, %v1986_v58, %v1987_v56  ;;  %v2335_v63 = vshrl.u32 %v5327_v32, 16  ;;  %v2587_v28 = vsel %vm2575_vm12, %v2554_v16, %v5282_v9  ;;  %v2342_v17 = vshll.u32 %v5335_v41, 16 }
  0xf6   : > { %2532 = vrot.lane.b32.xlu0 %v2497_v25, %s4173_s13  ;;  %v2354_v49 = vshll.u32 %v5342_v7, 16  ;;  %v2339_v21 = vrot.slane %v2337_v52, 1  ;;  %v1336_v9 = vshll.u32 %v5346_v35, 16  ;;  %v2347_v2 = vshrl.u32 %v5330_v37, 16  ;;  %v1033_v52 = vld [vmem:[#allocation2 + $0xb4] sm:$0xe] }
  0xf7   : > { %1383 = vrot.lane.b32.xlu1 %v1332_v39, %s4169_s7  ;;  %v1833_v39 = vsel %vm1164_vm4, %v1828_v45, %v1832_v24  ;;  %v2351_v20 = vrot.slane %v2349_v1, 1  ;;  %v5377_v33 = vcombine.low %v873_v55, %v5360_v51  ;;  %v2620_v18 = vsel %vm2608_vm13, %v2587_v28, %v5297_v22  ;;  %v937_v55 = vld [vmem:[#allocation2 + $0xc0] sm:$0xf] }
  0xf8   : > { %v2007_v3 = vpop.permute.xlu0 %2006  ;;  %v3682_v8 = vcombine.low %v1032_v5, %v5316_v23  ;;  %v2653_v48 = vsel %vm2641_vm14, %v2620_v18, %v5309_v19  ;;  %v2344_v15 = vrot.slane %v2342_v17, 1  ;;  %v1334_v47 = vshrl.u32 %v5346_v35, 16  ;;  %v5394_v23 = vld [vmem:[#allocation2 + $0xbc] ss:$0 sps:$4 sm:$0x11]  }
  0xf9   : > { %v5318_v50 = vpop.permute.xlu1 %2008  ;;  %v2340_v22 = vor.u32 %v2339_v21, %v2335_v63  ;;  %v1338_v6 = vrot.slane %v1336_v9, 1  ;;  %v2352_v58 = vor.u32 %v2351_v20, %v2347_v2  ;;  %v2356_v56 = vrot.slane %v2354_v49, 1  ;;  %v5420_v17 = vld [vmem:[#allocation2 + $0xb8] sm:$0xf] }
  0xfa   : > { %1510 = vrot.lane.b32.xlu0 %v1476_v13, %s4168_s6  ;;  %v1991_v13 = vsel %vm1437_vm6, %v1989_v42, %v1990_v30  ;;  %v2686_v45 = vsel %vm2674_vm15, %v2653_v48, %v5318_v50  ;;  %v1348_v42 = vshll.u32 %v5377_v33, 16  ;;  %v3683_v63 = vcombine.low %v1033_v52, %v5321_v29 }
  0xfb   : > { %1512 = vrot.lane.b32.xlu1 %v1479_v14, %s4168_s6  ;;  %v1339_v1 = vor.u32 %v1338_v6, %v1334_v47 }
  0xfc   : > { %v2119_v46 = vpop.permute.xlu0 %2118  ;;  %v2501_v2 = vrot.slane %v3683_v63, 1 }
  0xfd   : > { %v2121_v4 = vpop.permute.xlu1 %2120 }
  0xfe   : > { %1622 = vrot.lane.b32.xlu0 %v3602_v57, %s4170_s8  ;;  %v2618_v57 = vsel %vm2608_vm13, %v2585_v40, %v5299_v12  ;;  %v2719_v19 = vsel %vm2707_vm2, %v2686_v45, %v2121_v4  ;;  %v2345_v4 = vsel %vm1164_vm4, %v2340_v22, %v2344_v15  ;;  %v5441_v45 = vld [vmem:[#allocation2 + $0xbc] ss:$0 sps:$4 sm:$0x11]  }
  0xff   : > { %1624 = vrot.lane.b32.xlu1 %v3603_v62, %s4170_s8  ;;  %v2651_v14 = vsel %vm2641_vm14, %v2618_v57, %v1879_v43  ;;  %v1353_v57 = vshll.u32 %v5394_v23, 16 }
 0x100   : > { %v2391_v25 = vpop.permute.xlu0 %2390  ;;  %v2684_v12 = vsel %vm2674_vm15, %v2651_v14, %v2007_v3  ;;  %v5418_v14 = vld [vmem:[#allocation2 + $0xc4] sm:$0xf] }
 0x101   : > { %v2393_v62 = vpop.permute.xlu1 %2392  ;;  %v2717_v43 = vsel %vm2707_vm2, %v2684_v12, %v2119_v46  ;;  %v1341_v46 = vshll.u32 %v5371_v54, 16  ;;  %v2502_v12 = vrot.slane %v5342_v7, 1  ;;  %v1355_v49 = vrot.slane %v1353_v57, 1  ;;  %v5453_v57 = vld [vmem:[#allocation2 + $0xc4] sm:$0xf] }
 0x102   : > { %1894 = vrot.lane.b32.xlu0 %v1833_v39, %s4174_s22  ;;  %v2750_v61 = vsel %vm2740_vm3, %v2717_v43, %v2391_v25  ;;  %v2752_v50 = vsel %vm2740_vm3, %v2719_v19, %v2393_v62  ;;  %v2499_v39 = vrot.slane %v5335_v41, 1  ;;  %v906_v62 = vld [vmem:[#allocation2 + $0xb4] sm:$0xe]  ;;  %v2357_v25 = vsel %vm1164_vm4, %v2352_v58, %v2356_v56 }
 0x103   : > { %1896 = vrot.lane.b32.xlu1 %v1845_v38, %s4174_s22  ;;  %v2498_v38 = vrot.slane %v3682_v8, 1  ;;  %v1343_v16 = vrot.slane %v1341_v46, 1  ;;  %v1350_v41 = vrot.slane %v1348_v42, 1  ;;  %v3589_v21 = vcombine.low %v906_v62, %v5360_v51  ;;  %v970_v42 = vld [vmem:[#allocation2 + $0xc0] sm:$0xe] }
 0x104   : > { %v2519_v31 = vpop.permute.xlu0 %2518  ;;  %v3605_v20 = vcombine.low %v937_v55, %v5418_v14  ;;  %v1481_v51 = vrot.slane %v5371_v54, 1  ;;  %v2503_v15 = vsel %vm1437_vm6, %v2501_v2, %v2502_v12  ;;  %v4068_v2 = vld [vmem:[#allocation2 + $0xc8] ss:$0 sps:$4 sm:$0x11]  }
 0x105   : > { %v5382_v3 = vpop.permute.xlu1 %1369  ;;  %v2783_v24 = vsel %vm2773_vm5, %v2750_v61, %v2519_v31  ;;  %v2500_v5 = vsel %vm1437_vm6, %v2498_v38, %v2499_v39  ;;  %v1344_v29 = vsel %vm1164_vm4, %v1339_v1, %v1343_v16  ;;  %v1484_v31 = vrot.slane %v5394_v23, 1  ;;  %v1002_v23 = vld [vmem:[#allocation2 + $0xcc] sm:$0xf]  ;;  %v969_v39 = vld [vmem:[#allocation2 + $0xb4] sm:$0xe] }
 0x106   : > { %2022 = vrot.lane.b32.xlu0 %v1988_v11, %s4172_s10  ;;  %3840 = vmatprep.mubr.msk.bf16.mxu0 %vm2826_vm10, %v2783_v24  ;;  %v1346_v11 = vshrl.u32 %v5377_v33, 16  ;;  %v1483_v8 = vrot.slane %v3589_v21, 1  ;;  %v1861_v47 = vshll.u32 %v3605_v20, 16  ;;  %v1859_v58 = vshrl.u32 %v3605_v20, 16  ;;  %v1000_v16 = vld [vmem:[#allocation2 + $0xc0] sm:$0xf] }
 0x107   : > { %2024 = vrot.lane.b32.xlu1 %v1991_v13, %s4172_s10  ;;  %v935_v13 = vld [vmem:[#allocation2 + $0xb4] sm:$0xf]  ;;  %v1854_v38 = vshll.u32 %v5441_v45, 16 }
 0x108   : > { %v2521_v27 = vpop.permute.xlu0 %2520  ;;  %v1351_v43 = vor.u32 %v1350_v41, %v1346_v11  ;;  %v3604_v18 = vcombine.low %v935_v13, %v5420_v17  ;;  %v1485_v54 = vsel %vm1437_vm6, %v1483_v8, %v1484_v31  ;;  %v3637_v11 = vcombine.low %v970_v42, %v5418_v14 }
 0x109   : > { %v5400_v30 = vpop.permute.xlu1 %1371  ;;  %v2785_v40 = vsel %vm2773_vm5, %v2752_v50, %v2521_v27  ;;  %v5450_v50 = vld [vmem:[#allocation2 + $0xd0] sm:$0xf]  ;;  %v1863_v27 = vrot.slane %v1861_v47, 1  ;;  %v3636_v41 = vcombine.low %v969_v39, %v5420_v17  ;;  %v1856_v55 = vrot.slane %v1854_v38, 1 }
 0x10a   : > { %2134 = vrot.lane.b32.xlu0 %v5327_v32, %s4171_s9  ;;  %3841 = vmatmul.mubr.msk.bf16.gmra.mrb[8].mxu0 %vm2826_vm10, %v2785_v40  ;;  %v1356_v24 = vsel %vm1164_vm4, %v1351_v43, %v1355_v49  ;;  %v1849_v22 = vshll.u32 %v3604_v18, 16  ;;  %v1847_v52 = vshrl.u32 %v3604_v18, 16  ;;  %v5456_v62 = vcombine.low %v1002_v23, %v5450_v50  ;;  %v5464_v49 = vld [vmem:[#allocation2 + $0xd4] ss:$0 sps:$4 sm:$0x11]  }
 0x10b   : > { %2136 = vrot.lane.b32.xlu1 %v5330_v37, %s4171_s9  ;;  %v905_v37 = vld [vmem:[#allocation2 + $0xa8] sm:$0xe]  ;;  %v1864_v63 = vor.u32 %v1863_v27, %v1859_v58  ;;  %v3652_v13 = vcombine.low %v1000_v16, %v5453_v57  ;;  %v1995_v14 = vrot.slane %v3637_v11, 1  ;;  %v1992_v17 = vrot.slane %v3636_v41, 1  ;;  %v1035_v58 = vld [vmem:[#allocation2 + $0xcc] sm:$0xe] }
 0x10c   : > { %v5416_v32 = vpop.permute.xlu0 %1498  ;;  %v3588_v9 = vcombine.low %v905_v37, %v5332_v53  ;;  %v5437_v53 = vld [vmem:[#allocation2 + $0xc8] ss:$0 sps:$4 sm:$0x11]   ;;  %v1851_v40 = vrot.slane %v1849_v22, 1  ;;  %v2373_v21 = vshll.u32 %v5456_v62, 16  ;;  %v1993_v43 = vrot.slane %v5441_v45, 1 }
 0x10d   : > { %v5414_v28 = vpop.permute.xlu1 %1500  ;;  %v1866_v56 = vshll.u32 %v5437_v53, 16  ;;  %v2359_v47 = vshrl.u32 %v3652_v13, 16  ;;  %v2366_v22 = vshll.u32 %v4068_v2, 16  ;;  %v1034_v27 = vld [vmem:[#allocation2 + $0xc0] sm:$0xe] }
 0x10e   : > { %2406 = vrot.lane.b32.xlu0 %v2345_v4, %s4175_s23  ;;  %v1480_v48 = vrot.slane %v3588_v9, 1  ;;  %v1852_v37 = vor.u32 %v1851_v40, %v1847_v52  ;;  %v2556_v9 = vsel %vm2542_vm11, %v4668_v10, %v5382_v3 }
 0x10f   : > { %2408 = vrot.lane.b32.xlu1 %v2357_v25, %s4175_s23  ;;  %v1868_v25 = vrot.slane %v1866_v56, 1  ;;  %v2589_v31 = vsel %vm2575_vm12, %v2556_v9, %v5416_v32  ;;  %v2558_v32 = vsel %vm2542_vm11, %v4691_v59, %v5400_v30 }
 0x110   : > { %v1611_v7 = vpop.permute.xlu0 %1610  ;;  %v1482_v19 = vsel %vm1437_vm6, %v1480_v48, %v1481_v51  ;;  %v1857_v48 = vsel %vm1164_vm4, %v1852_v37, %v1856_v55  ;;  %v2361_v51 = vshll.u32 %v3652_v13, 16 }
 0x111   : > { %v5431_v61 = vpop.permute.xlu1 %1612  ;;  %v1869_v8 = vsel %vm1164_vm4, %v1864_v63, %v1868_v25  ;;  %v2368_v25 = vrot.slane %v2366_v22, 1 }
 0x112   : > { %2534 = vrot.lane.b32.xlu0 %v2500_v5, %s4173_s13 }
 0x113   : > { %1385 = vrot.lane.b32.xlu1 %v1344_v29, %s4169_s7  ;;  %v1996_v29 = vrot.slane %v5437_v53, 1  ;;  %v2622_v53 = vsel %vm2608_vm13, %v2589_v31, %v1611_v7 }
 0x114   : > { %v1883_v46 = vpop.permute.xlu0 %1882 }
 0x115   : > { %v5443_v6 = vpop.permute.xlu1 %1884  ;;  %v1997_v7 = vsel %vm1437_vm6, %v1995_v14, %v1996_v29 }
 0x116   : > { %2536 = vrot.lane.b32.xlu0 %v2503_v15, %s4173_s13  ;;  %v2378_v15 = vshll.u32 %v5464_v49, 16 }
 0x117   : > { %1387 = vrot.lane.b32.xlu1 %v1356_v24, %s4169_s7  ;;  %v2375_v24 = vrot.slane %v2373_v21, 1  ;;  %s5591_s7 = scalar_lea.vmem %s5823_s2, %s3742_s30  ;;  %s4176_s30 = smov [#allocation3]  }
 0x118   : > { %v2011_v1 = vpop.permute.xlu0 %2010  ;;  %v2380_v39 = vrot.slane %v2378_v15, 1  ;;  %s4075_s5 = sshll.u32 %s4176_s30, 4  ;;  %s4076_s5 = int_to_ptr.vmem [resolvable:$false] %s4075_s5 }
 0x119   : > { %v2013_v4 = vpop.permute.xlu1 %2012 }
 0x11a   : > { %1514 = vrot.lane.b32.xlu0 %v1482_v19, %s4168_s6  ;;  %v2363_v19 = vrot.slane %v2361_v51, 1 }
 0x11b   : > { %1516 = vrot.lane.b32.xlu1 %v1485_v54, %s4168_s6  ;;  %v1994_v54 = vsel %vm1437_vm6, %v1992_v17, %v1993_v43  ;;  %s4077_s6 = scalar_lea.vmem %s4076_s5, 32 }
 0x11c   : > { %v2123_v12 = vpop.permute.xlu0 %2122  ;;  %v2364_v16 = vor.u32 %v2363_v19, %v2359_v47 }
 0x11d   : > { %v2125_v5 = vpop.permute.xlu1 %2124 }
 0x11e   : > { %1626 = vrot.lane.b32.xlu0 %v3604_v18, %s4170_s8  ;;  %v2655_v18 = vsel %vm2641_vm14, %v2622_v53, %v1883_v46  ;;  %v2591_v46 = vsel %vm2575_vm12, %v2558_v32, %v5414_v28  ;;  %v2369_v55 = vsel %vm1164_vm4, %v2364_v16, %v2368_v25 }
 0x11f   : > { %1628 = vrot.lane.b32.xlu1 %v3605_v20, %s4170_s8  ;;  %v2371_v20 = vshrl.u32 %v5456_v62, 16  ;;  %v2688_v45 = vsel %vm2674_vm15, %v2655_v18, %v2011_v1  ;;  %v2624_v59 = vsel %vm2608_vm13, %v2591_v46, %v5431_v61  ;;  %v3685_v61 = vcombine.low %v1035_v58, %v5450_v50  ;;  %s3737_s8 = sshll.u32 %s4224_s19, 4 }
 0x120   : > { %v2395_v3 = vpop.permute.xlu0 %2394  ;;  %v2721_v23 = vsel %vm2707_vm2, %v2688_v45, %v2123_v12  ;;  %v2657_v52 = vsel %vm2641_vm14, %v2624_v59, %v5443_v6  ;;  %v3684_v6 = vcombine.low %v1034_v27, %v5453_v57  ;;  %v2508_v57 = vrot.slane %v5464_v49, 1  ;;  %s5745_s20 = scalar_lea.hbm %s5824_s3, %s3737_s8 }
 0x121   : > { %v2397_v10 = vpop.permute.xlu1 %2396  ;;  %v2754_v30 = vsel %vm2740_vm3, %v2721_v23, %v2395_v3  ;;  %v2690_v28 = vsel %vm2674_vm15, %v2657_v52, %v2013_v4  ;;  %v2376_v38 = vor.u32 %v2375_v24, %v2371_v20  ;;  %v2507_v37 = vrot.slane %v3685_v61, 1 }
 0x122   : > { %1898 = vrot.lane.b32.xlu0 %v1857_v48, %s4174_s22  ;;  %v2723_v1 = vsel %vm2707_vm2, %v2690_v28, %v2125_v5  ;;  %v2504_v5 = vrot.slane %v3684_v6, 1  ;;  %v2505_v12 = vrot.slane %v4068_v2, 1 }
 0x123   : > { %1900 = vrot.lane.b32.xlu1 %v1869_v8, %s4174_s22  ;;  %v2756_v11 = vsel %vm2740_vm3, %v2723_v1, %v2397_v10  ;;  %v2381_v50 = vsel %vm1164_vm4, %v2376_v38, %v2380_v39 }
 0x124   : > { %v2523_v42 = vpop.permute.xlu0 %2522 }
 0x125   : > { %v1374_v56 = vpop.permute.xlu1 %1373  ;;  %v2787_v40 = vsel %vm2773_vm5, %v2754_v30, %v2523_v42 }
 0x126   : > { %2026 = vrot.lane.b32.xlu0 %v1994_v54, %s4172_s10  ;;  %3844 = vmatprep.mubr.msk.bf16.mxu0 %vm2826_vm10, %v2787_v40  ;;  %v2560_v48 = vsel %vm2542_vm11, %v4777_v0, %v1374_v56 }
 0x127   : > { %2028 = vrot.lane.b32.xlu1 %v1997_v7, %s4172_s10 }
 0x128   : > { %v2525_v4 = vpop.permute.xlu0 %2524 }
 0x129   : > { %v1376_v41 = vpop.permute.xlu1 %1375  ;;  %v2789_v63 = vsel %vm2773_vm5, %v2756_v11, %v2525_v4 }
 0x12a   : > { %2138 = vrot.lane.b32.xlu0 %v3652_v13, %s4171_s9  ;;  %3845 = vmatmul.mubr.msk.bf16.gmra.mrb[12].mxu0 %vm2826_vm10, %v2789_v63  ;;  %v2506_v13 = vsel %vm1437_vm6, %v2504_v5, %v2505_v12  ;;  %v2562_v18 = vsel %vm2542_vm11, %v4814_v36, %v1376_v41 }
 0x12b   : > { %2140 = vrot.lane.b32.xlu1 %v5456_v62, %s4171_s9  ;;  %v2509_v62 = vsel %vm1437_vm6, %v2507_v37, %v2508_v57  ;;  %s200_s9 = scalar_lea.vmem [#allocation3], %s5735_s27 }
 0x12c   : > { %v1503_v21 = vpop.permute.xlu0 %1502  ;;  %s3381_s10 = sshll.u32 %s200_s9, 4  ;;  %s5747_s10 = int_to_ptr.vmem [resolvable:$true] %s3381_s10 }
 0x12d   : > { %v1505_v29 = vpop.permute.xlu1 %1504  ;;  %v2593_v51 = vsel %vm2575_vm12, %v2560_v48, %v1503_v21  ;;  %s4071_s29 = scalar_lea.vmem %s5747_s10, 16  ;;  %p4078_p0 = scmp.lt.s32.totalorder %s5747_s10, %s4076_s5 }
 0x12e   : > { %2410 = vrot.lane.b32.xlu0 %v2369_v55, %s4175_s23  ;;  %v2595_v15 = vsel %vm2575_vm12, %v2562_v18, %v1505_v29  ;;  %p4072_p11 = scmp.ne.s32.totalorder %s5747_s10, %s4071_s29  ;;  %p4079_p1 = scmp.lt.s32.totalorder %s4077_s6, %s4071_s29 }
 0x12f   : > { %2412 = vrot.lane.b32.xlu1 %v2381_v50, %s4175_s23  ;;  %s5753_s23 = scalar_lea.hbm %s5825_s4, %s3737_s8 }
 0x130   : > { %v1615_v14 = vpop.permute.xlu0 %1614  ;;  %p4073_p12 = pnand %p4072_p11, %p4241_p5  ;;  %p4080_p2 = por %p4079_p1, %p4078_p0 }
 0x131   : > { %v1617_v9 = vpop.permute.xlu1 %1616  ;;  %v2626_v53 = vsel %vm2608_vm13, %v2593_v51, %v1615_v14 }
 0x132   : > { %2538 = vrot.lane.b32.xlu0 %v2506_v13, %s4173_s13  ;;  %v2628_v32 = vsel %vm2608_vm13, %v2595_v15, %v1617_v9  ;;  %p4074_p13 = pneg %p4073_p12 }
 0x133   : > { %2540 = vrot.lane.b32.xlu1 %v2509_v62, %s4173_s13 }
 0x134   : > { %v1887_v49 = vpop.permute.xlu0 %1886  ;;  %p4081_p3 = pnand %p4080_p2, %p4074_p13 }
 0x135   : > { %v1889_v17 = vpop.permute.xlu1 %1888  ;;  %v2659_v20 = vsel %vm2641_vm14, %v2626_v53, %v1887_v49 }
 0x136   : > { %v2661_v22 = vsel %vm2641_vm14, %v2628_v32, %v1889_v17 }
 0x138   : > { %v2015_v2 = vpop.permute.xlu0 %2014 }
 0x139   : > { %v2017_v43 = vpop.permute.xlu1 %2016  ;;  %v2692_v24 = vsel %vm2674_vm15, %v2659_v20, %v2015_v2 }
 0x13a   : > { %v2694_v23 = vsel %vm2674_vm15, %v2661_v22, %v2017_v43 }
 0x13c   : > { %v2127_v8 = vpop.permute.xlu0 %2126 }
 0x13d   : > { %v2129_v31 = vpop.permute.xlu1 %2128  ;;  %v2725_v47 = vsel %vm2707_vm2, %v2692_v24, %v2127_v8 }
 0x13e   : > { %v2727_v36 = vsel %vm2707_vm2, %v2694_v23, %v2129_v31 }
 0x140   : > { %v2399_v3 = vpop.permute.xlu0 %2398 }
 0x141   : > { %v2401_v10 = vpop.permute.xlu1 %2400  ;;  %v2758_v0 = vsel %vm2740_vm3, %v2725_v47, %v2399_v3 }
 0x142   : > { %v2760_v54 = vsel %vm2740_vm3, %v2727_v36, %v2401_v10 }
 0x144   : > { %v2527_v7 = vpop.permute.xlu0 %2526 }
 0x145   : > { %v1378_v45 = vpop.permute.xlu1 %1377  ;;  %v2791_v46 = vsel %vm2773_vm5, %v2758_v0, %v2527_v7 }
 0x146   : > { %3848 = vmatprep.mubr.msk.bf16.mxu1 %vm2826_vm10, %v2791_v46  ;;  %v2564_v1 = vsel %vm2542_vm11, %v4973_v44, %v1378_v45 }
 0x148   : > { %v2529_v58 = vpop.permute.xlu0 %2528 }
 0x149   : > { %v1380_v19 = vpop.permute.xlu1 %1379  ;;  %v2793_v59 = vsel %vm2773_vm5, %v2760_v54, %v2529_v58 }
 0x14a   : > { %3849 = vmatmul.mubr.msk.bf16.vlgmr.msra.gmra.mrb[0].mxu1 %vm2826_vm10, %v2793_v59  ;;  %v2566_v4 = vsel %vm2542_vm11, %v5010_v60, %v1380_v19 }
 0x14c   : > { %v1507_v56 = vpop.permute.xlu0 %1506 }
 0x14d   : > { %v1509_v30 = vpop.permute.xlu1 %1508  ;;  %v2597_v16 = vsel %vm2575_vm12, %v2564_v1, %v1507_v56 }
 0x14e   : > { %v2599_v50 = vsel %vm2575_vm12, %v2566_v4, %v1509_v30 }
 0x150   : > { %v1619_v27 = vpop.permute.xlu0 %1618 }
 0x151   : > { %v1621_v42 = vpop.permute.xlu1 %1620  ;;  %v2630_v25 = vsel %vm2608_vm13, %v2597_v16, %v1619_v27 }
 0x152   : > { %v2632_v55 = vsel %vm2608_vm13, %v2599_v50, %v1621_v42 }
 0x154   : > { %v1891_v40 = vpop.permute.xlu0 %1890 }
 0x155   : > { %v1893_v52 = vpop.permute.xlu1 %1892  ;;  %v2663_v41 = vsel %vm2641_vm14, %v2630_v25, %v1891_v40 }
 0x156   : > { %v2665_v12 = vsel %vm2641_vm14, %v2632_v55, %v1893_v52 }
 0x158   : > { %v2019_v38 = vpop.permute.xlu0 %2018 }
 0x159   : > { %v2021_v28 = vpop.permute.xlu1 %2020  ;;  %v2696_v63 = vsel %vm2674_vm15, %v2663_v41, %v2019_v38 }
 0x15a   : > { %v2698_v21 = vsel %vm2674_vm15, %v2665_v12, %v2021_v28 }
 0x15c   : > { %v2131_v61 = vpop.permute.xlu0 %2130 }
 0x15d   : > { %v2133_v39 = vpop.permute.xlu1 %2132  ;;  %v2729_v37 = vsel %vm2707_vm2, %v2696_v63, %v2131_v61 }
 0x15e   : > { %v2731_v60 = vsel %vm2707_vm2, %v2698_v21, %v2133_v39 }
 0x160   : > { %v2403_v11 = vpop.permute.xlu0 %2402 }
 0x161   : > { %v2405_v6 = vpop.permute.xlu1 %2404  ;;  %v2762_v44 = vsel %vm2740_vm3, %v2729_v37, %v2403_v11 }
 0x162   : > { %v2764_v62 = vsel %vm2740_vm3, %v2731_v60, %v2405_v6 }
 0x164   : > { %v2531_v5 = vpop.permute.xlu0 %2530 }
 0x165   : > { %v1382_v57 = vpop.permute.xlu1 %1381  ;;  %v2795_v29 = vsel %vm2773_vm5, %v2762_v44, %v2531_v5 }
 0x166   : > { %3852 = vmatprep.mubr.msk.bf16.mxu1 %vm2826_vm10, %v2795_v29  ;;  %v2568_v3 = vsel %vm2542_vm11, %v5144_v26, %v1382_v57 }
 0x168   : > { %v2533_v9 = vpop.permute.xlu0 %2532 }
 0x169   : > { %v1384_v13 = vpop.permute.xlu1 %1383  ;;  %v2797_v14 = vsel %vm2773_vm5, %v2764_v62, %v2533_v9 }
 0x16a   : > { %3853 = vmatmul.mubr.msk.bf16.gmra.mrb[4].mxu1 %vm2826_vm10, %v2797_v14  ;;  %v2570_v32 = vsel %vm2542_vm11, %v5192_v34, %v1384_v13 }
 0x16c   : > { %v1511_v49 = vpop.permute.xlu0 %1510 }
 0x16d   : > { %v1513_v17 = vpop.permute.xlu1 %1512  ;;  %v2601_v20 = vsel %vm2575_vm12, %v2568_v3, %v1511_v49 }
 0x16e   : > { %v2603_v45 = vsel %vm2575_vm12, %v2570_v32, %v1513_v17 }
 0x170   : > { %v1623_v2 = vpop.permute.xlu0 %1622 }
 0x171   : > { %v1625_v43 = vpop.permute.xlu1 %1624  ;;  %v2634_v18 = vsel %vm2608_vm13, %v2601_v20, %v1623_v2 }
 0x172   : > { %v2636_v22 = vsel %vm2608_vm13, %v2603_v45, %v1625_v43 }
 0x174   : > { %v1895_v8 = vpop.permute.xlu0 %1894 }
 0x175   : > { %v1897_v31 = vpop.permute.xlu1 %1896  ;;  %v2667_v47 = vsel %vm2641_vm14, %v2634_v18, %v1895_v8 }
 0x176   : > { %v2669_v36 = vsel %vm2641_vm14, %v2636_v22, %v1897_v31 }
 0x178   : > { %v2023_v51 = vpop.permute.xlu0 %2022 }
 0x179   : > { %v2025_v48 = vpop.permute.xlu1 %2024  ;;  %v2700_v0 = vsel %vm2674_vm15, %v2667_v47, %v2023_v51 }
 0x17a   : > { %v2702_v19 = vsel %vm2674_vm15, %v2669_v36, %v2025_v48 }
 0x17c   : > { %v2135_v10 = vpop.permute.xlu0 %2134 }
 0x17d   : > { %v2137_v53 = vpop.permute.xlu1 %2136  ;;  %v2733_v7 = vsel %vm2707_vm2, %v2700_v0, %v2135_v10 }
 0x17e   : > { %v2735_v34 = vsel %vm2707_vm2, %v2702_v19, %v2137_v53 }
 0x180   : > { %v2407_v15 = vpop.permute.xlu0 %2406 }
 0x181   : > { %v2409_v24 = vpop.permute.xlu1 %2408  ;;  %v2766_v26 = vsel %vm2740_vm3, %v2733_v7, %v2407_v15 }
 0x182   : > { %v2768_v58 = vsel %vm2740_vm3, %v2735_v34, %v2409_v24 }
 0x184   : > { %v2535_v23 = vpop.permute.xlu0 %2534 }
 0x185   : > { %v1386_v46 = vpop.permute.xlu1 %1385  ;;  %v2799_v54 = vsel %vm2773_vm5, %v2766_v26, %v2535_v23 }
 0x186   : > { %3856 = vmatprep.mubr.msk.bf16.mxu1 %vm2826_vm10, %v2799_v54  ;;  %v2572_v6 = vsel %vm2542_vm11, %v5346_v35, %v1386_v46 }
 0x188   : > { %v2537_v30 = vpop.permute.xlu0 %2536 }
 0x189   : > { %v1388_v59 = vpop.permute.xlu1 %1387  ;;  %v2801_v56 = vsel %vm2773_vm5, %v2768_v58, %v2537_v30 }
 0x18a   : > { %3857 = vmatmul.mubr.msk.bf16.gmra.mrb[8].mxu1 %vm2826_vm10, %v2801_v56  ;;  %v2574_v25 = vsel %vm2542_vm11, %v5377_v33, %v1388_v59 }
 0x18c   : > { %v1515_v27 = vpop.permute.xlu0 %1514 }
 0x18d   : > { %v1517_v42 = vpop.permute.xlu1 %1516  ;;  %v2605_v41 = vsel %vm2575_vm12, %v2572_v6, %v1515_v27 }
 0x18e   : > { %v2607_v11 = vsel %vm2575_vm12, %v2574_v25, %v1517_v42 }
 0x190   : > { %v1627_v40 = vpop.permute.xlu0 %1626 }
 0x191   : > { %v1629_v52 = vpop.permute.xlu1 %1628  ;;  %v2638_v50 = vsel %vm2608_vm13, %v2605_v41, %v1627_v40 }
 0x192   : > { %v2640_v4 = vsel %vm2608_vm13, %v2607_v11, %v1629_v52 }
 0x194   : > { %v1899_v38 = vpop.permute.xlu0 %1898 }
 0x195   : > { %v1901_v28 = vpop.permute.xlu1 %1900  ;;  %v2671_v44 = vsel %vm2641_vm14, %v2638_v50, %v1899_v38 }
 0x196   : > { %v2673_v33 = vsel %vm2641_vm14, %v2640_v4, %v1901_v28 }
 0x198   : > { %v2027_v61 = vpop.permute.xlu0 %2026 }
 0x199   : > { %v2029_v39 = vpop.permute.xlu1 %2028  ;;  %v2704_v60 = vsel %vm2674_vm15, %v2671_v44, %v2027_v61 }
 0x19a   : > { %v2706_v57 = vsel %vm2674_vm15, %v2673_v33, %v2029_v39 }
 0x19c   : > { %v2139_v16 = vpop.permute.xlu0 %2138 }
 0x19d   : > { %v2141_v1 = vpop.permute.xlu1 %2140  ;;  %v2737_v14 = vsel %vm2707_vm2, %v2704_v60, %v2139_v16 }
 0x19e   : > { %v2739_v62 = vsel %vm2707_vm2, %v2706_v57, %v2141_v1 }
 0x19f   : > { %v3834_v63 = vpop.f32.mrb[0].mxu0 }
 0x1a0   : > { %v3777_v37 = vpack.c.bf16 %v3834_v63, %v3834_v63  ;;  %v2897_v55 = vpop.f32.mrb[1].mxu0  ;;  %v2411_v29 = vpop.permute.xlu0 %2410  ;;  %v3256_v2 = vmul.f32 %v3834_v63, %v3834_v63  ;;  %v3187_v53 = vsel %vm2542_vm11, %v3834_v63, 0.0 }
 0x1a1   : > { %v2413_v35 = vpop.permute.xlu1 %2412  ;;  %v3775_v5 = vpack.c.bf16 %v2897_v55, %v2897_v55  ;;  %v3254_v12 = vmul.f32 %v2897_v55, %v2897_v55  ;;  %v3835_v21 = vpop.f32.mrb[2].mxu0  ;;  %v3184_v17 = vsel %vm2542_vm11, %v2897_v55, 0.0  ;;  %v2770_v3 = vsel %vm2740_vm3, %v2737_v14, %v2411_v29 }
 0x1a2   : > { %3154 = vst.msk [vmem:[%s5591_s7 + $0x8] sm:$0xf] %vm218_vm0, %v3777_v37  ;;  %v3778_v13 = vpack.c.bf16 %v3835_v21, %v3835_v21  ;;  %v2900_v9 = vpop.f32.mrb[3].mxu0  ;;  %v2772_v31 = vsel %vm2740_vm3, %v2739_v62, %v2413_v35  ;;  %v3257_v24 = vmul.f32 %v3835_v21, %v3835_v21  ;;  %v3189_v0 = vsel %vm2542_vm11, %v3835_v21, 0.0 }
 0x1a3   : > { %3152 = vst.msk [vmem:[%s5591_s7] sm:$0xf] %vm218_vm0, %v3775_v5  ;;  %v3776_v49 = vpack.c.bf16 %v2900_v9, %v2900_v9  ;;  %v3185_v43 = vsel %vm2542_vm11, %v2900_v9, 0.0  ;;  %v3255_v48 = vmul.f32 %v2900_v9, %v2900_v9  ;;  %v3286_v10 = vsel %vm2542_vm11, %v3254_v12, 0.0 }
 0x1a4   : > { %3155 = vst.msk [vmem:[%s5591_s7 + $0xc] sm:$0xf] %vm218_vm0, %v3778_v13  ;;  %v3186_v8 = vadd.f32 %v3185_v43, %v3184_v17  ;;  %v2539_v18 = vpop.permute.xlu0 %2538  ;;  %v3289_v7 = vsel %vm2542_vm11, %v3256_v2, 0.0  ;;  %v3291_v46 = vsel %vm2542_vm11, %v3257_v24, 0.0 }
 0x1a5   : > { %v2541_v51 = vpop.permute.xlu1 %2540  ;;  %3153 = vst.msk [vmem:[%s5591_s7 + $0x4] sm:$0xf] %vm218_vm0, %v3776_v49  ;;  %v3287_v47 = vsel %vm2542_vm11, %v3255_v48, 0.0  ;;  %v2803_v32 = vsel %vm2773_vm5, %v2770_v3, %v2539_v18 }
 0x1a6   : > { %v2805_v20 = vsel %vm2773_vm5, %v2772_v31, %v2541_v51  ;;  %v3188_v15 = vadd.f32 %v3187_v53, %v3186_v8  ;;  %v3288_v45 = vadd.f32 %v3287_v47, %v3286_v10  ;;  %3860 = vmatprep.mubr.msk.bf16.mxu1 %vm2826_vm10, %v2803_v32 }
 0x1a7   : > { %3861 = vmatmul.mubr.msk.bf16.gmra.mrb[12].mxu1 %vm2826_vm10, %v2805_v20 }
 0x1a8   : > { %v3190_v22 = vadd.f32 %v3189_v0, %v3188_v15  ;;  %v3290_v26 = vadd.f32 %v3289_v7, %v3288_v45 }
 0x1aa   : > { %v3292_v23 = vadd.f32 %v3291_v46, %v3290_v26 }
 0x1bd   : > { %v3838_v36 = vpop.f32.mrb[4].mxu0 }
 0x1be   : > { %v3781_v54 = vpack.c.bf16 %v3838_v36, %v3838_v36  ;;  %v2913_v19 = vpop.f32.mrb[5].mxu0  ;;  %v3260_v38 = vmul.f32 %v3838_v36, %v3838_v36  ;;  %v3195_v16 = vsel %vm2542_vm11, %v3838_v36, 0.0 }
 0x1bf   : > { %v3779_v34 = vpack.c.bf16 %v2913_v19, %v2913_v19  ;;  %v3191_v58 = vsel %vm2542_vm11, %v2913_v19, 0.0  ;;  %v3258_v59 = vmul.f32 %v2913_v19, %v2913_v19  ;;  %v3839_v30 = vpop.f32.mrb[6].mxu0 }
 0x1c0   : > { %3158 = vst.msk [vmem:[%s5591_s7 + $0x18] sm:$0xf] %vm218_vm0, %v3781_v54  ;;  %v3192_v56 = vadd.f32 %v3191_v58, %v3190_v22  ;;  %v3782_v42 = vpack.c.bf16 %v3839_v30, %v3839_v30  ;;  %v2916_v27 = vpop.f32.mrb[7].mxu0  ;;  %v3261_v25 = vmul.f32 %v3839_v30, %v3839_v30  ;;  %v3197_v41 = vsel %vm2542_vm11, %v3839_v30, 0.0 }
 0x1c1   : > { %3156 = vst.msk [vmem:[%s5591_s7 + $0x10] sm:$0xf] %vm218_vm0, %v3779_v34  ;;  %v3293_v52 = vsel %vm2542_vm11, %v3258_v59, 0.0  ;;  %v3780_v40 = vpack.c.bf16 %v2916_v27, %v2916_v27  ;;  %v3193_v28 = vsel %vm2542_vm11, %v2916_v27, 0.0  ;;  %v3259_v1 = vmul.f32 %v2916_v27, %v2916_v27 }
 0x1c2   : > { %v3294_v39 = vadd.f32 %v3293_v52, %v3292_v23  ;;  %3159 = vst.msk [vmem:[%s5591_s7 + $0x1c] sm:$0xf] %vm218_vm0, %v3782_v42  ;;  %v3194_v61 = vadd.f32 %v3193_v28, %v3192_v56  ;;  %v3297_v63 = vsel %vm2542_vm11, %v3260_v38, 0.0  ;;  %v3299_v37 = vsel %vm2542_vm11, %v3261_v25, 0.0 }
 0x1c3   : > { %3157 = vst.msk [vmem:[%s5591_s7 + $0x14] sm:$0xf] %vm218_vm0, %v3780_v40  ;;  %v3295_v11 = vsel %vm2542_vm11, %v3259_v1, 0.0 }
 0x1c4   : > { %v3196_v6 = vadd.f32 %v3195_v16, %v3194_v61  ;;  %v3296_v4 = vadd.f32 %v3295_v11, %v3294_v39 }
 0x1c6   : > { %v3198_v50 = vadd.f32 %v3197_v41, %v3196_v6  ;;  %v3298_v33 = vadd.f32 %v3297_v63, %v3296_v4 }
 0x1c8   : > { %v3300_v35 = vadd.f32 %v3299_v37, %v3298_v33 }
 0x1dd   : > { %v3842_v55 = vpop.f32.mrb[8].mxu0 }
 0x1de   : > { %v3785_v44 = vpack.c.bf16 %v3842_v55, %v3842_v55  ;;  %v2929_v57 = vpop.f32.mrb[9].mxu0  ;;  %v3264_v49 = vmul.f32 %v3842_v55, %v3842_v55  ;;  %v3203_v8 = vsel %vm2542_vm11, %v3842_v55, 0.0 }
 0x1df   : > { %v3783_v5 = vpack.c.bf16 %v2929_v57, %v2929_v57  ;;  %v3199_v12 = vsel %vm2542_vm11, %v2929_v57, 0.0  ;;  %v3262_v29 = vmul.f32 %v2929_v57, %v2929_v57  ;;  %v3843_v21 = vpop.f32.mrb[10].mxu0 }
 0x1e0   : > { %3162 = vst.msk [vmem:[%s5591_s7 + $0x28] sm:$0xf] %vm218_vm0, %v3785_v44  ;;  %v3200_v60 = vadd.f32 %v3199_v12, %v3198_v50  ;;  %v3786_v62 = vpack.c.bf16 %v3843_v21, %v3843_v21  ;;  %v2932_v13 = vpop.f32.mrb[11].mxu0  ;;  %v3265_v48 = vmul.f32 %v3843_v21, %v3843_v21  ;;  %v3205_v10 = vsel %vm2542_vm11, %v3843_v21, 0.0 }
 0x1e1   : > { %3160 = vst.msk [vmem:[%s5591_s7 + $0x20] sm:$0xf] %vm218_vm0, %v3783_v5  ;;  %v3301_v9 = vsel %vm2542_vm11, %v3262_v29, 0.0  ;;  %v3784_v14 = vpack.c.bf16 %v2932_v13, %v2932_v13  ;;  %v3201_v17 = vsel %vm2542_vm11, %v2932_v13, 0.0  ;;  %v3263_v31 = vmul.f32 %v2932_v13, %v2932_v13 }
 0x1e2   : > { %v3302_v43 = vadd.f32 %v3301_v9, %v3300_v35  ;;  %3163 = vst.msk [vmem:[%s5591_s7 + $0x2c] sm:$0xf] %vm218_vm0, %v3786_v62  ;;  %v3202_v2 = vadd.f32 %v3201_v17, %v3200_v60  ;;  %v3305_v20 = vsel %vm2542_vm11, %v3264_v49, 0.0  ;;  %v3307_v15 = vsel %vm2542_vm11, %v3265_v48, 0.0 }
 0x1e3   : > { %3161 = vst.msk [vmem:[%s5591_s7 + $0x24] sm:$0xf] %vm218_vm0, %v3784_v14  ;;  %v3303_v53 = vsel %vm2542_vm11, %v3263_v31, 0.0 }
 0x1e4   : > { %v3204_v51 = vadd.f32 %v3203_v8, %v3202_v2  ;;  %v3304_v3 = vadd.f32 %v3303_v53, %v3302_v43 }
 0x1e6   : > { %v3206_v18 = vadd.f32 %v3205_v10, %v3204_v51  ;;  %v3306_v24 = vadd.f32 %v3305_v20, %v3304_v3 }
 0x1e8   : > { %v3308_v47 = vadd.f32 %v3307_v15, %v3306_v24 }
 0x1fd   : > { %v3846_v32 = vpop.f32.mrb[12].mxu0 }
 0x1fe   : > { %v3789_v0 = vpack.c.bf16 %v3846_v32, %v3846_v32  ;;  %v2945_v45 = vpop.f32.mrb[13].mxu0  ;;  %v3268_v59 = vmul.f32 %v3846_v32, %v3846_v32  ;;  %v3211_v27 = vsel %vm2542_vm11, %v3846_v32, 0.0 }
 0x1ff   : > { %v3787_v7 = vpack.c.bf16 %v2945_v45, %v2945_v45  ;;  %v3207_v22 = vsel %vm2542_vm11, %v2945_v45, 0.0  ;;  %v3266_v26 = vmul.f32 %v2945_v45, %v2945_v45  ;;  %v3847_v46 = vpop.f32.mrb[14].mxu0 }
 0x200   : > { %3166 = vst.msk [vmem:[%s5591_s7 + $0x38] sm:$0xf] %vm218_vm0, %v3789_v0  ;;  %v3208_v23 = vadd.f32 %v3207_v22, %v3206_v18  ;;  %v3790_v36 = vpack.c.bf16 %v3847_v46, %v3847_v46  ;;  %v2948_v54 = vpop.f32.mrb[15].mxu0  ;;  %v3269_v52 = vmul.f32 %v3847_v46, %v3847_v46  ;;  %v3213_v38 = vsel %vm2542_vm11, %v3847_v46, 0.0 }
 0x201   : > { %3164 = vst.msk [vmem:[%s5591_s7 + $0x30] sm:$0xf] %vm218_vm0, %v3787_v7  ;;  %v3309_v19 = vsel %vm2542_vm11, %v3266_v26, 0.0  ;;  %v3788_v34 = vpack.c.bf16 %v2948_v54, %v2948_v54  ;;  %v3209_v58 = vsel %vm2542_vm11, %v2948_v54, 0.0  ;;  %v3267_v42 = vmul.f32 %v2948_v54, %v2948_v54 }
 0x202   : > { %v3310_v30 = vadd.f32 %v3309_v19, %v3308_v47  ;;  %3167 = vst.msk [vmem:[%s5591_s7 + $0x3c] sm:$0xf] %vm218_vm0, %v3790_v36  ;;  %v3210_v56 = vadd.f32 %v3209_v58, %v3208_v23  ;;  %v3313_v61 = vsel %vm2542_vm11, %v3268_v59, 0.0  ;;  %v3315_v25 = vsel %vm2542_vm11, %v3269_v52, 0.0 }
 0x203   : > { %3165 = vst.msk [vmem:[%s5591_s7 + $0x34] sm:$0xf] %vm218_vm0, %v3788_v34  ;;  %v3311_v28 = vsel %vm2542_vm11, %v3267_v42, 0.0 }
 0x204   : > { %v3212_v40 = vadd.f32 %v3211_v27, %v3210_v56  ;;  %v3312_v39 = vadd.f32 %v3311_v28, %v3310_v30 }
 0x206   : > { %v3214_v1 = vadd.f32 %v3213_v38, %v3212_v40  ;;  %v3314_v16 = vadd.f32 %v3313_v61, %v3312_v39 }
 0x208   : > { %v3316_v6 = vadd.f32 %v3315_v25, %v3314_v16 }
 0x21d   : > { %v3850_v11 = vpop.f32.mrb[0].mxu1 }
 0x21e   : > { %v3793_v41 = vpack.c.bf16 %v3850_v11, %v3850_v11  ;;  %v2961_v4 = vpop.f32.mrb[1].mxu1  ;;  %v3272_v29 = vmul.f32 %v3850_v11, %v3850_v11  ;;  %v3219_v13 = vsel %vm2542_vm11, %v3850_v11, 0.0 }
 0x21f   : > { %v3791_v63 = vpack.c.bf16 %v2961_v4, %v2961_v4  ;;  %v3215_v50 = vsel %vm2542_vm11, %v2961_v4, 0.0  ;;  %v3270_v33 = vmul.f32 %v2961_v4, %v2961_v4  ;;  %v3851_v37 = vpop.f32.mrb[2].mxu1 }
 0x220   : > { %3170 = vst.msk [vmem:[%s5591_s7 + $0x48] sm:$0xf] %vm218_vm0, %v3793_v41  ;;  %v3216_v35 = vadd.f32 %v3215_v50, %v3214_v1  ;;  %v3794_v55 = vpack.c.bf16 %v3851_v37, %v3851_v37  ;;  %v2964_v44 = vpop.f32.mrb[3].mxu1  ;;  %v3273_v9 = vmul.f32 %v3851_v37, %v3851_v37  ;;  %v3221_v49 = vsel %vm2542_vm11, %v3851_v37, 0.0 }
 0x221   : > { %3168 = vst.msk [vmem:[%s5591_s7 + $0x40] sm:$0xf] %vm218_vm0, %v3791_v63  ;;  %v3317_v57 = vsel %vm2542_vm11, %v3270_v33, 0.0  ;;  %v3792_v5 = vpack.c.bf16 %v2964_v44, %v2964_v44  ;;  %v3217_v12 = vsel %vm2542_vm11, %v2964_v44, 0.0  ;;  %v3271_v62 = vmul.f32 %v2964_v44, %v2964_v44 }
 0x222   : > { %v3318_v21 = vadd.f32 %v3317_v57, %v3316_v6  ;;  %3171 = vst.msk [vmem:[%s5591_s7 + $0x4c] sm:$0xf] %vm218_vm0, %v3794_v55  ;;  %v3218_v60 = vadd.f32 %v3217_v12, %v3216_v35  ;;  %v3321_v2 = vsel %vm2542_vm11, %v3272_v29, 0.0  ;;  %v3323_v48 = vsel %vm2542_vm11, %v3273_v9, 0.0 }
 0x223   : > { %3169 = vst.msk [vmem:[%s5591_s7 + $0x44] sm:$0xf] %vm218_vm0, %v3792_v5  ;;  %v3319_v17 = vsel %vm2542_vm11, %v3271_v62, 0.0 }
 0x224   : > { %v3220_v14 = vadd.f32 %v3219_v13, %v3218_v60  ;;  %v3320_v43 = vadd.f32 %v3319_v17, %v3318_v21 }
 0x226   : > { %v3222_v31 = vadd.f32 %v3221_v49, %v3220_v14  ;;  %v3322_v8 = vadd.f32 %v3321_v2, %v3320_v43 }
 0x228   : > { %v3324_v51 = vadd.f32 %v3323_v48, %v3322_v8 }
 0x23d   : > { %v3854_v53 = vpop.f32.mrb[4].mxu1 }
 0x23e   : > { %v3797_v10 = vpack.c.bf16 %v3854_v53, %v3854_v53  ;;  %v2977_v3 = vpop.f32.mrb[5].mxu1  ;;  %v3276_v26 = vmul.f32 %v3854_v53, %v3854_v53  ;;  %v3227_v54 = vsel %vm2542_vm11, %v3854_v53, 0.0 }
 0x23f   : > { %v3795_v20 = vpack.c.bf16 %v2977_v3, %v2977_v3  ;;  %v3223_v18 = vsel %vm2542_vm11, %v2977_v3, 0.0  ;;  %v3274_v24 = vmul.f32 %v2977_v3, %v2977_v3  ;;  %v3855_v15 = vpop.f32.mrb[6].mxu1 }
 0x240   : > { %3174 = vst.msk [vmem:[%s5591_s7 + $0x58] sm:$0xf] %vm218_vm0, %v3797_v10  ;;  %v3224_v47 = vadd.f32 %v3223_v18, %v3222_v31  ;;  %v3798_v32 = vpack.c.bf16 %v3855_v15, %v3855_v15  ;;  %v2980_v0 = vpop.f32.mrb[7].mxu1  ;;  %v3277_v19 = vmul.f32 %v3855_v15, %v3855_v15  ;;  %v3229_v59 = vsel %vm2542_vm11, %v3855_v15, 0.0 }
 0x241   : > { %3172 = vst.msk [vmem:[%s5591_s7 + $0x50] sm:$0xf] %vm218_vm0, %v3795_v20  ;;  %v3325_v45 = vsel %vm2542_vm11, %v3274_v24, 0.0  ;;  %v3796_v7 = vpack.c.bf16 %v2980_v0, %v2980_v0  ;;  %v3225_v22 = vsel %vm2542_vm11, %v2980_v0, 0.0  ;;  %v3275_v36 = vmul.f32 %v2980_v0, %v2980_v0 }
 0x242   : > { %v3326_v46 = vadd.f32 %v3325_v45, %v3324_v51  ;;  %3175 = vst.msk [vmem:[%s5591_s7 + $0x5c] sm:$0xf] %vm218_vm0, %v3798_v32  ;;  %v3226_v23 = vadd.f32 %v3225_v22, %v3224_v47  ;;  %v3329_v56 = vsel %vm2542_vm11, %v3276_v26, 0.0  ;;  %v3331_v52 = vsel %vm2542_vm11, %v3277_v19, 0.0 }
 0x243   : > { %3173 = vst.msk [vmem:[%s5591_s7 + $0x54] sm:$0xf] %vm218_vm0, %v3796_v7  ;;  %v3327_v58 = vsel %vm2542_vm11, %v3275_v36, 0.0 }
 0x244   : > { %v3228_v34 = vadd.f32 %v3227_v54, %v3226_v23  ;;  %v3328_v30 = vadd.f32 %v3327_v58, %v3326_v46 }
 0x246   : > { %v3230_v42 = vadd.f32 %v3229_v59, %v3228_v34  ;;  %v3330_v27 = vadd.f32 %v3329_v56, %v3328_v30 }
 0x248   : > { %v3332_v40 = vadd.f32 %v3331_v52, %v3330_v27 }
 0x25d   : > { %v3858_v28 = vpop.f32.mrb[8].mxu1 }
 0x25e   : > { %v3801_v38 = vpack.c.bf16 %v3858_v28, %v3858_v28  ;;  %v2993_v39 = vpop.f32.mrb[9].mxu1  ;;  %v3280_v33 = vmul.f32 %v3858_v28, %v3858_v28  ;;  %v3235_v44 = vsel %vm2542_vm11, %v3858_v28, 0.0 }
 0x25f   : > { %v3799_v61 = vpack.c.bf16 %v2993_v39, %v2993_v39  ;;  %v3231_v1 = vsel %vm2542_vm11, %v2993_v39, 0.0  ;;  %v3278_v16 = vmul.f32 %v2993_v39, %v2993_v39  ;;  %v3859_v25 = vpop.f32.mrb[10].mxu1 }
 0x260   : > { %3178 = vst.msk [vmem:[%s5591_s7 + $0x68] sm:$0xf] %vm218_vm0, %v3801_v38  ;;  %v3232_v6 = vadd.f32 %v3231_v1, %v3230_v42  ;;  %v3802_v11 = vpack.c.bf16 %v3859_v25, %v3859_v25  ;;  %v2996_v41 = vpop.f32.mrb[11].mxu1  ;;  %v3281_v57 = vmul.f32 %v3859_v25, %v3859_v25  ;;  %v3237_v29 = vsel %vm2542_vm11, %v3859_v25, 0.0 }
 0x261   : > { %3176 = vst.msk [vmem:[%s5591_s7 + $0x60] sm:$0xf] %vm218_vm0, %v3799_v61  ;;  %v3333_v4 = vsel %vm2542_vm11, %v3278_v16, 0.0  ;;  %v3800_v63 = vpack.c.bf16 %v2996_v41, %v2996_v41  ;;  %v3233_v50 = vsel %vm2542_vm11, %v2996_v41, 0.0  ;;  %v3279_v55 = vmul.f32 %v2996_v41, %v2996_v41 }
 0x262   : > { %v3334_v37 = vadd.f32 %v3333_v4, %v3332_v40  ;;  %3179 = vst.msk [vmem:[%s5591_s7 + $0x6c] sm:$0xf] %vm218_vm0, %v3802_v11  ;;  %v3234_v35 = vadd.f32 %v3233_v50, %v3232_v6  ;;  %v3337_v60 = vsel %vm2542_vm11, %v3280_v33, 0.0  ;;  %v3339_v9 = vsel %vm2542_vm11, %v3281_v57, 0.0 }
 0x263   : > { %3177 = vst.msk [vmem:[%s5591_s7 + $0x64] sm:$0xf] %vm218_vm0, %v3800_v63  ;;  %v3335_v12 = vsel %vm2542_vm11, %v3279_v55, 0.0 }
 0x264   : > { %v3236_v5 = vadd.f32 %v3235_v44, %v3234_v35  ;;  %v3336_v21 = vadd.f32 %v3335_v12, %v3334_v37 }
 0x266   : > { %v3238_v62 = vadd.f32 %v3237_v29, %v3236_v5  ;;  %v3338_v13 = vadd.f32 %v3337_v60, %v3336_v21 }
 0x268   : > { %v3340_v14 = vadd.f32 %v3339_v9, %v3338_v13 }
 0x27a   : > { %v3862_v17 = vpop.f32.mrb[12].mxu1 }
 0x27b   : > { %v3805_v49 = vpack.c.bf16 %v3862_v17, %v3862_v17  ;;  %v3009_v43 = vpop.f32.mrb[13].mxu1  ;;  %v3284_v24 = vmul.f32 %v3862_v17, %v3862_v17  ;;  %v3243_v0 = vsel %vm2542_vm11, %v3862_v17, 0.0 }
 0x27c   : > { %v3803_v2 = vpack.c.bf16 %v3009_v43, %v3009_v43  ;;  %v3239_v31 = vsel %vm2542_vm11, %v3009_v43, 0.0  ;;  %v3282_v8 = vmul.f32 %v3009_v43, %v3009_v43  ;;  %v3863_v48 = vpop.f32.mrb[14].mxu1 }
 0x27d   : > { %3182 = vst.msk [vmem:[%s5591_s7 + $0x78] sm:$0xf] %vm218_vm0, %v3805_v49  ;;  %v3240_v51 = vadd.f32 %v3239_v31, %v3238_v62  ;;  %v3806_v53 = vpack.c.bf16 %v3863_v48, %v3863_v48  ;;  %v3012_v10 = vpop.f32.mrb[15].mxu1  ;;  %v3285_v45 = vmul.f32 %v3863_v48, %v3863_v48  ;;  %v3245_v26 = vsel %vm2542_vm11, %v3863_v48, 0.0 }
 0x27e   : > { %3180 = vst.msk [vmem:[%s5591_s7 + $0x70] sm:$0xf] %vm218_vm0, %v3803_v2  ;;  %v3341_v3 = vsel %vm2542_vm11, %v3282_v8, 0.0  ;;  %v3804_v20 = vpack.c.bf16 %v3012_v10, %v3012_v10  ;;  %v3241_v18 = vsel %vm2542_vm11, %v3012_v10, 0.0  ;;  %v3283_v32 = vmul.f32 %v3012_v10, %v3012_v10 }
 0x27f   : > { %v3342_v15 = vadd.f32 %v3341_v3, %v3340_v14  ;;  %3183 = vst.msk [vmem:[%s5591_s7 + $0x7c] sm:$0xf] %vm218_vm0, %v3806_v53  ;;  %v3242_v47 = vadd.f32 %v3241_v18, %v3240_v51  ;;  %v3345_v23 = vsel %vm2542_vm11, %v3284_v24, 0.0  ;;  %v3347_v19 = vsel %vm2542_vm11, %v3285_v45, 0.0 }
 0x280   : > { %3181 = vst.msk [vmem:[%s5591_s7 + $0x74] sm:$0xf] %vm218_vm0, %v3804_v20  ;;  %v3343_v22 = vsel %vm2542_vm11, %v3283_v32, 0.0 }
 0x281   : > { %v3244_v7 = vadd.f32 %v3243_v0, %v3242_v47  ;;  %v3344_v46 = vadd.f32 %v3343_v22, %v3342_v15 }
 0x283   : > { %v3246_v36 = vadd.f32 %v3245_v26, %v3244_v7  ;;  %v3346_v54 = vadd.f32 %v3345_v23, %v3344_v46 }
 0x285   : > { %v3247_v34 = vrot.slane %v3246_v36, 4  ;;  %v3348_v58 = vadd.f32 %v3347_v19, %v3346_v54 }
 0x287   : > { %v3248_v59 = vadd.f32 %v3247_v34, %v3246_v36  ;;  %v3349_v30 = vrot.slane %v3348_v58, 4 }
 0x289   : > { %v3249_v56 = vrot.slane %v3248_v59, 2  ;;  %v3350_v42 = vadd.f32 %v3349_v30, %v3348_v58 }
 0x28b   : > { %v3250_v27 = vadd.f32 %v3249_v56, %v3248_v59  ;;  %v3351_v52 = vrot.slane %v3350_v42, 2 }
 0x28d   : > { %v3251_v40 = vrot.slane %v3250_v27, 1  ;;  %v3352_v28 = vadd.f32 %v3351_v52, %v3350_v42 }
 0x28f   : > { %v3252_v38 = vadd.f32 %v3251_v40, %v3250_v27  ;;  %v3353_v39 = vrot.slane %v3352_v28, 1 }
 0x291   : > { %3253 = vst.msk [vmem:[%s200_s9] sm:$0x1] %vm221_vm1, %v3252_v38 }
 0x292   : > { %4084 = shalt.err (!%p4081_p3)
}
 0x293   : > { %s4085_s7 = scalar_lea.hbm %s5745_s20, 16  ;;  %s4089_s13 = scalar_lea.hbm %s5824_s3, 32 }
 0x294   : > { %p4086_p4 = scmp.ne.s32.totalorder %s5745_s20, %s4085_s7  ;;  %p4090_p9 = scmp.lt.u32.totalorder %s5745_s20, %s5824_s3 }
 0x295   : > { %p4091_p10 = scmp.lt.u32.totalorder %s4089_s13, %s4085_s7  ;;  %p4093_p12 = scmp.lt.u32.totalorder %s4085_s7, %s5745_s20 }
 0x296   : > { %p4087_p7 = pnand %p4086_p4, %p4241_p5 }
 0x297   : > { %p4092_p11 = por %p4091_p10, %p4090_p9 }
 0x298   : > { %p4088_p8 = pneg %p4087_p7 }
 0x299   : > { %p4094_p13 = por %p4093_p12, %p4092_p11 }
 0x29b   : > { %p4095_p0 = pnand %p4094_p13, %p4088_p8 }
 0x29d   : > { %4098 = shalt.err (!%p4095_p0)
}
 0x29e   : > { %3872 = dma.vmem_to_hbm [thread:$0]  (%p4241_p5), %s5747_s10, 16, %s5745_s20, %s3362_s28   ;;  %v3354_v61 = vadd.f32 %v3353_v39, %v3352_v28 }
 0x29f   : > { %s3366_s22 = scalar_lea.sflag [#allocation6], %s5735_s27  ;;  %s4099_s29 = scalar_lea.vmem %s5755_s12, 16 }
 0x2a0   : > { %3355 = vst.msk [vmem:[%s206_s11] sm:$0x1] %vm221_vm1, %v3354_v61  ;;  %p4100_p1 = scmp.ne.s32.totalorder %s5755_s12, %s4099_s29  ;;  %s4177_s30 = smov [#allocation5]  }
 0x2a1   : > { %s4103_s5 = sshll.u32 %s4177_s30, 4  ;;  %s4104_s5 = int_to_ptr.vmem [resolvable:$false] %s4103_s5 }
 0x2a2   : > { %p4101_p2 = pnand %p4100_p1, %p4241_p5  ;;  %s4105_s6 = scalar_lea.vmem %s4104_s5, 32 }
 0x2a3   : > { %p4106_p4 = scmp.lt.s32.totalorder %s5755_s12, %s4104_s5  ;;  %p4107_p7 = scmp.lt.s32.totalorder %s4105_s6, %s4099_s29 }
 0x2a4   : > { %p4102_p3 = pneg %p4101_p2 }
 0x2a5   : > { %p4108_p8 = por %p4107_p7, %p4106_p4 }
 0x2a7   : > { %p4109_p9 = pnand %p4108_p8, %p4102_p3 }
 0x2a9   : > { %4112 = shalt.err (!%p4109_p9)
}
 0x2aa   : > { %s4113_s27 = scalar_lea.hbm %s5753_s23, 16  ;;  %s4117_s20 = scalar_lea.hbm %s5825_s4, 32 }
 0x2ab   : > { %p4114_p10 = scmp.ne.s32.totalorder %s5753_s23, %s4113_s27  ;;  %p4118_p13 = scmp.lt.u32.totalorder %s5753_s23, %s5825_s4 }
 0x2ac   : > { %p4119_p0 = scmp.lt.u32.totalorder %s4117_s20, %s4113_s27  ;;  %p4121_p2 = scmp.lt.u32.totalorder %s4113_s27, %s5753_s23 }
 0x2ad   : > { %p4115_p11 = pnand %p4114_p10, %p4241_p5 }
 0x2ae   : > { %p4120_p1 = por %p4119_p0, %p4118_p13 }
 0x2af   : > { %p4116_p12 = pneg %p4115_p11 }
 0x2b0   : > { %p4122_p3 = por %p4121_p2, %p4120_p1 }
 0x2b2   : > { %p4123_p4 = pnand %p4122_p3, %p4116_p12 }
 0x2b4   : > { %4126 = shalt.err (!%p4123_p4)
}
 0x2b5   : > { %3873 = dma.vmem_to_hbm [thread:$0]  (%p4241_p5), %s5755_s12, 16, %s5753_s23, %s3366_s22  }
 0x2b6 PF: > { %p3883_p7 = scmp.ge.s32.totalorder %s4165_s18, 2  ;;  %s3414_s8 = sand.u32 1, %s4153_s15  }
 0x2b7   : > { %s3415_s9 = scalar_lea.sflag [#allocation4], %s3414_s8 }
 0x2b8   : > { %p3877_p8 = pnand %p3883_p7, %p4245_p6 }
 0x2ba   : > { %4144 = dma.done.wait (!%p3877_p8), %s3415_s9, 16  }
 0x2bb   : > { %4146 = vsyncadd (!%p3877_p8), %s3415_s9, 4294967280  ;;  %s3423_s13 = scalar_lea.sflag [#allocation6], %s3414_s8 }
 0x2bc   : > { %4148 = dma.done.wait (!%p3877_p8), %s3423_s13, 16  }
 0x2bd   : > { %4150 = vsyncadd (!%p3877_p8), %s3423_s13, 4294967280  ;;  %p18_p5 = scmp.ge.s32.totalorder %s4228_s21, 4   ;;  %s5834_s15 = smov %s4157_s16 }
 0x2be   : > { %s5835_s16 = smov %s4161_s17  ;;  %s5836_s17 = smov %s4239_s24 }
 0x2bf   : > { %s5837_s18 = smov %s4228_s21  ;;  %20 = sbr.rel (!%p18_p5) target bundleno = 5 (0x5), region = 94 }
 0x2c6   :  { %3427 = vsyncpa [#allocation4], 1 }
 0x2c7   :  { %3429 = vsyncpa [#allocation4 + $0x1], 1 }
 0x2c8   :  { %3430 = vsyncpa [#allocation6], 1 }
 0x2c9   :  { %3432 = vsyncpa [#allocation6 + $0x1], 1 }

</bundles_post_ra>
